<compile_context>
chip_gen: v7x
topology: tpu7x:2x2x1
jax: 0.10.0
libtpu: 0.0.40
codegen_flags: <defaults>
</compile_context>

<pallas_src>
import math
import functools

import jax
import jax.numpy as jnp
from jax.experimental import pallas as pl
from jax.experimental.pallas import tpu as pltpu

_GELU_C = math.sqrt(2.0 / math.pi)


# ------------------------------ fused Pallas kernel -------------------------------

def decoder_layer_kernel(
    # scalar prefetch (SMEM): rel_shift source-batch / source-head tables
    srcb_ref, srch_ref,
    # per-batch activations
    x_ref, xsrc_ref, kv_ref, pos_ref, mask_ref,
    # per-head attention weights (head-major layouts, selected via index_map)
    wq_ref, bq_ref, rwb_ref,
    wqs_ref, bqs_ref, rrb_ref, wrs_ref,
    wk_ref, bk_ref, wv_ref, bv_ref,
    wo_ref, bo_ref, ln1g_ref, ln1b_ref,
    w1_ref, b1_ref, w2_ref, b2_ref, ln2g_ref, ln2b_ref,
    # outputs
    out_ref, prob_ref,
    # scratch
    acc_ref,
    *, n_head, n_batch, scale, eps):
  del srcb_ref, srch_ref  # consumed by the BlockSpec index_maps only
  b = pl.program_id(0)
  h = pl.program_id(1)
  H, B = n_head, n_batch
  f32, bf16 = jnp.float32, jnp.bfloat16

  def dot_nt(a, c):  # (M, C) x (N, C) -> (M, N): contract last dims on the MXU
    return jax.lax.dot_general(a, c, (((1,), (1,)), ((), ())),
                               preferred_element_type=f32)

  @pl.when(h == 0)
  def _init():
    acc_ref[...] = jnp.zeros_like(acc_ref)

  x = x_ref[0]                                   # (Q, D) f32 (kept f32 for residual)
  xb = x.astype(bf16)
  kvb = kv_ref[0]                                # (K, D) bf16

  # ---- per-head projections (head column picked by the BlockSpec index_map) ----
  q = jnp.dot(xb, wq_ref[0], preferred_element_type=f32) + bq_ref[0]    # (Q, Dh)
  k = jnp.dot(kvb, wk_ref[0], preferred_element_type=f32) + bk_ref[0]   # (K, Dh)
  v = jnp.dot(kvb, wv_ref[0], preferred_element_type=f32) + bv_ref[0]   # (K, Dh)

  # ---- AC = (q + r_w_bias_h) @ k^T ----
  ac = dot_nt((q + rwb_ref[0]).astype(bf16), k.astype(bf16))            # (Q, K)

  # ---- BD with the reference _rel_shift folded into the index_maps:
  #      shifted_BD[b, h] = Q_rr[src_batch, src_head] @ r_s[src_head]^T, and the
  #      zero-pad slabs of the flat remap are zeroed with a scalar multiplier. ----
  hp = (b * H + h + B) % (H + 1)                 # 0 -> zero-pad slab
  qs = (jnp.dot(xsrc_ref[0].astype(bf16), wqs_ref[0], preferred_element_type=f32)
        + bqs_ref[0] + rrb_ref[0])                                      # (Q, Dh)
  r = jnp.dot(pos_ref[...], wrs_ref[0], preferred_element_type=f32)     # (R, Dh)
  bd = dot_nt(qs.astype(bf16), r.astype(bf16))                          # (Q, R == K)
  bd = bd * jnp.where(hp == 0, 0.0, 1.0)

  # ---- scale + mask + softmax (all f32) ----
  score = (ac + bd) * scale
  score = jnp.where(mask_ref[0] != 0.0, jnp.float32(-1000000000.0), score)
  m = jnp.max(score, axis=-1, keepdims=True)
  e = jnp.exp(score - m)
  p = e * pl.reciprocal(jnp.sum(e, axis=-1, keepdims=True), approx=False)
  prob_ref[0, 0] = p                             # direct per-(b, h) block store

  # ---- context + this head's slice of the output projection, accumulated ----
  ctx = jnp.dot(p.astype(bf16), v.astype(bf16), preferred_element_type=f32)   # (Q, Dh)
  acc_ref[...] += jnp.dot(ctx.astype(bf16), wo_ref[0], preferred_element_type=f32)

  # ---- epilogue on the last head: +bias, residual, LN1, FFN(gelu), LN2 ----
  @pl.when(h == H - 1)
  def _finish():
    z = x + acc_ref[...] + bo_ref[...]
    mu = jnp.mean(z, axis=-1, keepdims=True)
    var = jnp.mean((z - mu) ** 2, axis=-1, keepdims=True)
    h1 = (z - mu) * jax.lax.rsqrt(var + eps) * ln1g_ref[...] + ln1b_ref[...]

    f = jnp.dot(h1.astype(bf16), w1_ref[...], preferred_element_type=f32) + b1_ref[...]
    f = 0.5 * f * (1.0 + jnp.tanh(_GELU_C * (f + 0.044715 * f * f * f)))
    f = jnp.dot(f.astype(bf16), w2_ref[...], preferred_element_type=f32) + b2_ref[...]
    z2 = f + h1
    mu2 = jnp.mean(z2, axis=-1, keepdims=True)
    var2 = jnp.mean((z2 - mu2) ** 2, axis=-1, keepdims=True)
    out_ref[0] = (z2 - mu2) * jax.lax.rsqrt(var2 + eps) * ln2g_ref[...] + ln2b_ref[...]


# --------------------------------- wrapper / glue ----------------------------------

def decoder_layer(params, cfg, input_h, input_g, pos_emb, r_w_bias, r_r_bias,
                  attn_mask_h, attn_mask_g, mems):
  B, Q, D = input_h.shape
  H, Dh = cfg["n_head"], cfg["d_head"]
  F = cfg["d_ff"]
  f32, bf16 = jnp.float32, jnp.bfloat16

  kv = jnp.concatenate([mems[:B], input_h], axis=1)
  K = kv.shape[1]
  R = pos_emb.shape[0]
  assert R == K, "reference AC + rel_shift(BD) requires r_len == k_len"
  assert attn_mask_h.shape == (B, Q, K)

  p = params["attn"]

  # head-major weight layouts: per-head columns selected by a LEADING-axis index.
  def head_major(w):                       # (D, H*Dh) -> (H, D, Dh)
    return jnp.transpose(w.reshape(D, H, Dh), (1, 0, 2)).astype(bf16)

  wq_h = head_major(p["wq"]); wk_h = head_major(p["wk"])
  wv_h = head_major(p["wv"]); wr_h = head_major(p["wr"])
  wo_h = p["wo"].reshape(H, Dh, D).astype(bf16)
  bq_h = p["bq"].reshape(H, 1, Dh).astype(f32)
  bk_h = p["bk"].reshape(H, 1, Dh).astype(f32)
  bv_h = p["bv"].reshape(H, 1, Dh).astype(f32)
  rwb = r_w_bias.reshape(H, 1, Dh).astype(f32)
  rrb = r_r_bias.reshape(H, 1, Dh).astype(f32)
  mask_f = attn_mask_h.astype(f32)         # nonzero == masked

  # rel_shift source tables (scalar prefetch): shifted_BD[b, h] lives in padded slab
  # b*H + h + B of the reference's flat [zero, bd[b,0..H-1]] layout.
  bb = jnp.arange(B, dtype=jnp.int32)[:, None]
  hh = jnp.arange(H, dtype=jnp.int32)[None, :]
  s_pad = bb * H + hh + B
  src_b = (s_pad // (H + 1)).astype(jnp.int32)                    # (B, H)
  src_h = jnp.maximum(s_pad % (H + 1) - 1, 0).astype(jnp.int32)   # (B, H), clamped

  kernel = functools.partial(
      decoder_layer_kernel, n_head=H, n_batch=B,
      scale=1.0 / (Dh ** 0.5), eps=cfg["layer_norm_epsilon"])

  def bmap(b, h, sb, sh): return (b, 0, 0)            # per-batch activations
  def hmap(b, h, sb, sh): return (h, 0, 0)            # this head's weights / biases
  def sbmap(b, h, sb, sh): return (sb[b, h], 0, 0)    # BD source batch (rel_shift)
  def shmap(b, h, sb, sh): return (sh[b, h], 0, 0)    # BD source head  (rel_shift)
  def wmap2(b, h, sb, sh): return (0, 0)              # resident full-array weights
  def omap(b, h, sb, sh): return (b, 0, 0)
  def pmap(b, h, sb, sh): return (b, h, 0, 0)

  grid_spec = pltpu.PrefetchScalarGridSpec(
      num_scalar_prefetch=2,
      grid=(B, H),
      in_specs=[
          pl.BlockSpec((1, Q, D), bmap),        # x (query batch, f32 for residual)
          pl.BlockSpec((1, Q, D), sbmap),       # x of the BD source batch
          pl.BlockSpec((1, K, D), bmap),        # kv (bf16)
          pl.BlockSpec((R, D), wmap2),          # pos_emb (bf16, resident)
          pl.BlockSpec((1, Q, K), bmap),        # mask
          pl.BlockSpec((1, D, Dh), hmap),       # W_Q head h
          pl.BlockSpec((1, 1, Dh), hmap),       # b_Q head h
          pl.BlockSpec((1, 1, Dh), hmap),       # r_w_bias head h
          pl.BlockSpec((1, D, Dh), shmap),      # W_Q source head (BD)
          pl.BlockSpec((1, 1, Dh), shmap),      # b_Q source head (BD)
          pl.BlockSpec((1, 1, Dh), shmap),      # r_r_bias source head (BD)
          pl.BlockSpec((1, D, Dh), shmap),      # W_R source head (BD)
          pl.BlockSpec((1, D, Dh), hmap),       # W_K head h
          pl.BlockSpec((1, 1, Dh), hmap),       # b_K head h
          pl.BlockSpec((1, D, Dh), hmap),       # W_V head h
          pl.BlockSpec((1, 1, Dh), hmap),       # b_V head h
          pl.BlockSpec((1, Dh, D), hmap),       # W_O rows for head h
          pl.BlockSpec((1, D), wmap2),          # b_O
          pl.BlockSpec((1, D), wmap2),          # ln1 gamma
          pl.BlockSpec((1, D), wmap2),          # ln1 beta
          pl.BlockSpec((D, F), wmap2),          # ffn W1 (resident)
          pl.BlockSpec((1, F), wmap2),          # ffn b1
          pl.BlockSpec((F, D), wmap2),          # ffn W2 (resident)
          pl.BlockSpec((1, D), wmap2),          # ffn b2
          pl.BlockSpec((1, D), wmap2),          # ln2 gamma
          pl.BlockSpec((1, D), wmap2),          # ln2 beta
      ],
      out_specs=[
          pl.BlockSpec((1, Q, D), omap),
          pl.BlockSpec((1, 1, Q, K), pmap),
      ],
      scratch_shapes=[pltpu.VMEM((Q, D), f32)],  # per-batch attention-output accum
  )

  out_h, attn_prob = pl.pallas_call(
      kernel,
      out_shape=(
          jax.ShapeDtypeStruct((B, Q, D), f32),
          jax.ShapeDtypeStruct((B, H, Q, K), f32),
      ),
      grid_spec=grid_spec,
      compiler_params=pltpu.CompilerParams(
          dimension_semantics=("parallel", "arbitrary"),
          vmem_limit_bytes=64 * 1024 * 1024),
  )(src_b, src_h,
    input_h, input_h, kv.astype(bf16), pos_emb.astype(bf16), mask_f,
    wq_h, bq_h, rwb, wq_h, bq_h, rrb, wr_h,
    wk_h, bk_h, wv_h, bv_h,
    wo_h, p["bo"].reshape(1, D).astype(f32),
    params["ln1_g"].reshape(1, D), params["ln1_b"].reshape(1, D),
    params["ffn_w1"].astype(bf16), params["ffn_b1"].reshape(1, F),
    params["ffn_w2"].astype(bf16), params["ffn_b2"].reshape(1, D),
    params["ln2_g"].reshape(1, D), params["ln2_b"].reshape(1, D))

  # TODO(synk): the reference also runs the attention with input_g / attn_mask_g and
  # discards the result (returns input_g unchanged); with eval-mode dropout it is
  # pure dead code, so it is skipped without affecting the returned values.
  return out_h, input_g, attn_prob


# ------------------------------ pure-JAX reference ---------------------------------

def reference_decoder_layer(params, cfg, input_h, input_g, pos_emb, r_w_bias, r_r_bias,
                            attn_mask_h, attn_mask_g, mems):
  B, q_len, D = input_h.shape
  H, Dh = cfg["n_head"], cfg["d_head"]
  eps = cfg["layer_norm_epsilon"]
  p = params["attn"]
  kv = jnp.concatenate([mems[:B], input_h], axis=1)
  k_len = kv.shape[1]
  r_len = pos_emb.shape[0]

  q_s = (input_h @ p["wq"] + p["bq"]).reshape(B, q_len, H, Dh)
  Q_rw = (q_s + r_w_bias).transpose(0, 2, 1, 3)
  Q_rr = (q_s + r_r_bias).transpose(0, 2, 1, 3)
  k_s = (kv @ p["wk"] + p["bk"]).reshape(B, k_len, H, Dh).transpose(0, 2, 1, 3)
  v_s = (kv @ p["wv"] + p["bv"]).reshape(B, k_len, H, Dh).transpose(0, 2, 1, 3)
  r_s = (pos_emb @ p["wr"]).reshape(r_len, H, Dh).transpose(1, 0, 2)

  AC = jnp.einsum("bhqd,bhkd->bhqk", Q_rw, k_s)
  BD = jnp.einsum("bhqd,hrd->bhqr", Q_rr, r_s)
  pad = jnp.zeros((B, 1, q_len, r_len), BD.dtype)        # exact replica of _rel_shift
  BD = jnp.concatenate([pad, BD], axis=1).reshape(-1)[B * q_len * r_len:]
  BD = BD.reshape(B, H, q_len, r_len)

  score = (AC + BD) * (1.0 / Dh ** 0.5)
  score = jnp.where(attn_mask_h[:, None, :, :], jnp.float32(-1000000000.0), score)
  prob = jax.nn.softmax(score, axis=-1)
  vec = jnp.einsum("bhqk,bhkd->bhqd", prob, v_s).transpose(0, 2, 1, 3).reshape(B, q_len, H * Dh)
  attn_out = vec @ p["wo"] + p["bo"]

  def ln(z, g, b):
    mu = z.mean(-1, keepdims=True)
    var = ((z - mu) ** 2).mean(-1, keepdims=True)
    return (z - mu) / jnp.sqrt(var + eps) * g + b

  h1 = ln(input_h + attn_out, params["ln1_g"], params["ln1_b"])
  f = h1 @ params["ffn_w1"] + params["ffn_b1"]
  f = 0.5 * f * (1.0 + jnp.tanh(_GELU_C * (f + 0.044715 * f ** 3)))
  f = f @ params["ffn_w2"] + params["ffn_b2"]
  h2 = ln(f + h1, params["ln2_g"], params["ln2_b"])
  return h2, input_g, prob


# ---------------------------------- parameters --------------------------------------

def init_params(key, cfg):
  d_embed, H, Dh, d_ff = cfg["d_embed"], cfg["n_head"], cfg["d_head"], cfg["d_ff"]
  d_proj = H * Dh
  ks = jax.random.split(key, 12)
  s = 0.02

  def w(k, shape):
    return (s * jax.random.normal(k, shape)).astype(jnp.float32)

  return {
      "attn": {
          "wq": w(ks[0], (d_embed, d_proj)), "bq": w(ks[1], (d_proj,)),
          "wk": w(ks[2], (d_embed, d_proj)), "bk": w(ks[3], (d_proj,)),
          "wv": w(ks[4], (d_embed, d_proj)), "bv": w(ks[5], (d_proj,)),
          "wr": w(ks[6], (d_embed, d_proj)),
          "wo": w(ks[7], (d_proj, d_embed)), "bo": w(ks[8], (d_embed,)),
      },
      "ln1_g": jnp.ones((d_embed,), jnp.float32),
      "ln1_b": jnp.zeros((d_embed,), jnp.float32),
      "ffn_w1": w(ks[9], (d_embed, d_ff)),
      "ffn_b1": jnp.zeros((d_ff,), jnp.float32),
      "ffn_w2": w(ks[10], (d_ff, d_embed)),
      "ffn_b2": jnp.zeros((d_embed,), jnp.float32),
      "ln2_g": jnp.ones((d_embed,), jnp.float32),
      "ln2_b": jnp.zeros((d_embed,), jnp.float32),
  }


# -------------------------------------- main ----------------------------------------

if __name__ == "__main__":
  cfg = dict(d_embed=32, n_head=2, d_head=8, d_ff=64,
             dropout=0.0, layer_norm_epsilon=1e-12)
  B, q_len, m_len = 2, 8, 8
  k_len = m_len + q_len          # = r_len

  key = jax.random.PRNGKey(0)
  kp, k1, k2, k3, k4, k5, k6 = jax.random.split(key, 7)
  params = init_params(kp, cfg)

  input_h = jax.random.normal(k1, (B, q_len, cfg["d_embed"]), jnp.float32)
  input_g = jax.random.normal(k2, (B, q_len, cfg["d_embed"]), jnp.float32)
  mems = jax.random.normal(k3, (B, m_len, cfg["d_embed"]), jnp.float32)
  pos_emb = jax.random.normal(k4, (k_len, cfg["d_embed"]), jnp.float32)
  r_w_bias = 0.02 * jax.random.normal(k5, (cfg["n_head"], cfg["d_head"]), jnp.float32)
  r_r_bias = 0.02 * jax.random.normal(k6, (cfg["n_head"], cfg["d_head"]), jnp.float32)

  # causal mask with memory: query i may attend keys j <= i + m_len (True == masked)
  qi = jnp.arange(q_len)[:, None]
  kj = jnp.arange(k_len)[None, :]
  causal = kj > qi + m_len
  attn_mask_h = jnp.broadcast_to(causal, (B, q_len, k_len))
  attn_mask_g = attn_mask_h

  fwd = jax.jit(functools.partial(decoder_layer, params, cfg))
  out_h, out_g, attn_prob = fwd(input_h, input_g, pos_emb, r_w_bias, r_r_bias,
                                attn_mask_h, attn_mask_g, mems)
  jax.block_until_ready((out_h, out_g, attn_prob))

  assert out_h.shape == (B, q_len, cfg["d_embed"])
  assert out_g.shape == (B, q_len, cfg["d_embed"])
  assert attn_prob.shape == (B, cfg["n_head"], q_len, k_len)

  # sanity check vs pure-JAX reference (tolerance covers bf16 matmul operands)
  ref_h, ref_g, ref_p = reference_decoder_layer(
      params, cfg, input_h, input_g, pos_emb, r_w_bias, r_r_bias,
      attn_mask_h, attn_mask_g, mems)
  assert jnp.allclose(out_h, ref_h, atol=1e-2, rtol=1e-2), \
      float(jnp.max(jnp.abs(out_h - ref_h)))
  assert jnp.allclose(attn_prob, ref_p, atol=1e-2, rtol=1e-2), \
      float(jnp.max(jnp.abs(attn_prob - ref_p)))

  print("KERNEL_OK")
</pallas_src>

<mosaic_0001>
module attributes {stable_mosaic.version = 11 : i64} {
  func.func @decoder_layer_kernel(%arg0: i32, %arg1: i32, %arg2: memref<2x2xi32, #tpu.memory_space<smem>>, %arg3: memref<2x2xi32, #tpu.memory_space<smem>>, %arg4: memref<1x8x32xf32, #tpu.memory_space<vmem>>, %arg5: memref<1x8x32xf32, #tpu.memory_space<vmem>>, %arg6: memref<1x16x32xbf16, #tpu.memory_space<vmem>>, %arg7: memref<16x32xbf16, #tpu.memory_space<vmem>>, %arg8: memref<1x8x16xf32, #tpu.memory_space<vmem>>, %arg9: memref<1x32x8xbf16, #tpu.memory_space<vmem>>, %arg10: memref<1x1x8xf32, #tpu.memory_space<vmem>>, %arg11: memref<1x1x8xf32, #tpu.memory_space<vmem>>, %arg12: memref<1x32x8xbf16, #tpu.memory_space<vmem>>, %arg13: memref<1x1x8xf32, #tpu.memory_space<vmem>>, %arg14: memref<1x1x8xf32, #tpu.memory_space<vmem>>, %arg15: memref<1x32x8xbf16, #tpu.memory_space<vmem>>, %arg16: memref<1x32x8xbf16, #tpu.memory_space<vmem>>, %arg17: memref<1x1x8xf32, #tpu.memory_space<vmem>>, %arg18: memref<1x32x8xbf16, #tpu.memory_space<vmem>>, %arg19: memref<1x1x8xf32, #tpu.memory_space<vmem>>, %arg20: memref<1x8x32xbf16, #tpu.memory_space<vmem>>, %arg21: memref<1x32xf32, #tpu.memory_space<vmem>>, %arg22: memref<1x32xf32, #tpu.memory_space<vmem>>, %arg23: memref<1x32xf32, #tpu.memory_space<vmem>>, %arg24: memref<32x64xbf16, #tpu.memory_space<vmem>>, %arg25: memref<1x64xf32, #tpu.memory_space<vmem>>, %arg26: memref<64x32xbf16, #tpu.memory_space<vmem>>, %arg27: memref<1x32xf32, #tpu.memory_space<vmem>>, %arg28: memref<1x32xf32, #tpu.memory_space<vmem>>, %arg29: memref<1x32xf32, #tpu.memory_space<vmem>>, %arg30: memref<1x8x32xf32, #tpu.memory_space<vmem>>, %arg31: memref<1x1x8x16xf32, #tpu.memory_space<vmem>>, %arg32: memref<8x32xf32, #tpu.memory_space<vmem>>) attributes {dimension_semantics = [#tpu.dimension_semantics<parallel>, #tpu.dimension_semantics<arbitrary>], iteration_bounds = array<i64: 2, 2>, scalar_prefetch = 2 : i64, scratch_operands = 1 : i64, tpu.core_type = #tpu.core_type<tc>, window_params = [{transform_indices = @transform_0, window_bounds = array<i64: 1, 8, 32>}, {transform_indices = @transform_1, window_bounds = array<i64: 1, 8, 32>}, {transform_indices = @transform_2, window_bounds = array<i64: 1, 16, 32>}, {pipeline_mode = #tpu.pipeline_mode<synchronous>, transform_indices = @transform_3, window_bounds = array<i64: 16, 32>}, {transform_indices = @transform_4, window_bounds = array<i64: 1, 8, 16>}, {transform_indices = @transform_5, window_bounds = array<i64: 1, 32, 8>}, {transform_indices = @transform_6, window_bounds = array<i64: 1, 1, 8>}, {transform_indices = @transform_7, window_bounds = array<i64: 1, 1, 8>}, {transform_indices = @transform_8, window_bounds = array<i64: 1, 32, 8>}, {transform_indices = @transform_9, window_bounds = array<i64: 1, 1, 8>}, {transform_indices = @transform_10, window_bounds = array<i64: 1, 1, 8>}, {transform_indices = @transform_11, window_bounds = array<i64: 1, 32, 8>}, {transform_indices = @transform_12, window_bounds = array<i64: 1, 32, 8>}, {transform_indices = @transform_13, window_bounds = array<i64: 1, 1, 8>}, {transform_indices = @transform_14, window_bounds = array<i64: 1, 32, 8>}, {transform_indices = @transform_15, window_bounds = array<i64: 1, 1, 8>}, {transform_indices = @transform_16, window_bounds = array<i64: 1, 8, 32>}, {pipeline_mode = #tpu.pipeline_mode<synchronous>, transform_indices = @transform_17, window_bounds = array<i64: 1, 32>}, {pipeline_mode = #tpu.pipeline_mode<synchronous>, transform_indices = @transform_18, window_bounds = array<i64: 1, 32>}, {pipeline_mode = #tpu.pipeline_mode<synchronous>, transform_indices = @transform_19, window_bounds = array<i64: 1, 32>}, {pipeline_mode = #tpu.pipeline_mode<synchronous>, transform_indices = @transform_20, window_bounds = array<i64: 32, 64>}, {pipeline_mode = #tpu.pipeline_mode<synchronous>, transform_indices = @transform_21, window_bounds = array<i64: 1, 64>}, {pipeline_mode = #tpu.pipeline_mode<synchronous>, transform_indices = @transform_22, window_bounds = array<i64: 64, 32>}, {pipeline_mode = #tpu.pipeline_mode<synchronous>, transform_indices = @transform_23, window_bounds = array<i64: 1, 32>}, {pipeline_mode = #tpu.pipeline_mode<synchronous>, transform_indices = @transform_24, window_bounds = array<i64: 1, 32>}, {pipeline_mode = #tpu.pipeline_mode<synchronous>, transform_indices = @transform_25, window_bounds = array<i64: 1, 32>}, {transform_indices = @transform_26, window_bounds = array<i64: 1, 8, 32>}, {transform_indices = @transform_27, window_bounds = array<i64: 1, 1, 8, 16>}]} {
    %c0_i32 = arith.constant 0 : i32
    %0 = arith.cmpi eq, %arg1, %c0_i32 : i32
    %1 = arith.extui %0 : i1 to i32
    %c0_i32_0 = arith.constant 0 : i32
    %2 = arith.cmpi ne, %1, %c0_i32_0 : i32
    scf.if %2 {
      %cst_81 = arith.constant 0.000000e+00 : f32
      %109 = vector.broadcast %cst_81 : f32 to vector<8x32xf32>
      %c0_82 = arith.constant 0 : index
      %c0_83 = arith.constant 0 : index
      %110 = vector.load %arg32[%c0_82, %c0_83] : memref<8x32xf32, #tpu.memory_space<vmem>>, vector<8x32xf32>
      tpu.vector_store %arg32[%c0_82, %c0_83], %109 {strides = array<i32>} : memref<8x32xf32, #tpu.memory_space<vmem>>, vector<8x32xf32>,
    } else {
    }
    %c0 = arith.constant 0 : index
    %c0_1 = arith.constant 0 : index
    %c0_2 = arith.constant 0 : index
    %3 = vector.load %arg4[%c0, %c0_1, %c0_2] : memref<1x8x32xf32, #tpu.memory_space<vmem>>, vector<1x8x32xf32>
    %4 = vector.shape_cast %3 : vector<1x8x32xf32> to vector<8x32xf32>
    %5 = arith.truncf %4 : vector<8x32xf32> to vector<8x32xbf16>
    %c0_3 = arith.constant 0 : index
    %c0_4 = arith.constant 0 : index
    %c0_5 = arith.constant 0 : index
    %6 = vector.load %arg6[%c0_3, %c0_4, %c0_5] : memref<1x16x32xbf16, #tpu.memory_space<vmem>>, vector<1x16x32xbf16>
    %7 = vector.shape_cast %6 : vector<1x16x32xbf16> to vector<16x32xbf16>
    %c0_6 = arith.constant 0 : index
    %c0_7 = arith.constant 0 : index
    %c0_8 = arith.constant 0 : index
    %8 = vector.load %arg9[%c0_6, %c0_7, %c0_8] : memref<1x32x8xbf16, #tpu.memory_space<vmem>>, vector<1x32x8xbf16>
    %9 = vector.shape_cast %8 : vector<1x32x8xbf16> to vector<32x8xbf16>
    %cst = arith.constant dense<0.000000e+00> : vector<8x8xf32>
    %10 = tpu.matmul %5, %9, %cst {dimension_numbers = #tpu.dot_dimension_numbers<[1], [0], [0], [1], [0, 0, 1, 1], [], []>} : vector<8x32xbf16>, vector<32x8xbf16>, vector<8x8xf32> -> vector<8x8xf32>
    %c0_9 = arith.constant 0 : index
    %c0_10 = arith.constant 0 : index
    %c0_11 = arith.constant 0 : index
    %11 = vector.load %arg10[%c0_9, %c0_10, %c0_11] : memref<1x1x8xf32, #tpu.memory_space<vmem>>, vector<1x1x8xf32>
    %12 = vector.shape_cast %11 : vector<1x1x8xf32> to vector<1x8xf32>
    %13 = vector.broadcast %12 : vector<1x8xf32> to vector<8x8xf32>
    %14 = arith.addf %10, %13 : vector<8x8xf32>
    %c0_12 = arith.constant 0 : index
    %c0_13 = arith.constant 0 : index
    %c0_14 = arith.constant 0 : index
    %15 = vector.load %arg16[%c0_12, %c0_13, %c0_14] : memref<1x32x8xbf16, #tpu.memory_space<vmem>>, vector<1x32x8xbf16>
    %16 = vector.shape_cast %15 : vector<1x32x8xbf16> to vector<32x8xbf16>
    %cst_15 = arith.constant dense<0.000000e+00> : vector<16x8xf32>
    %17 = tpu.matmul %7, %16, %cst_15 {dimension_numbers = #tpu.dot_dimension_numbers<[1], [0], [0], [1], [0, 0, 1, 1], [], []>} : vector<16x32xbf16>, vector<32x8xbf16>, vector<16x8xf32> -> vector<16x8xf32>
    %c0_16 = arith.constant 0 : index
    %c0_17 = arith.constant 0 : index
    %c0_18 = arith.constant 0 : index
    %18 = vector.load %arg17[%c0_16, %c0_17, %c0_18] : memref<1x1x8xf32, #tpu.memory_space<vmem>>, vector<1x1x8xf32>
    %19 = vector.shape_cast %18 : vector<1x1x8xf32> to vector<1x8xf32>
    %20 = vector.broadcast %19 : vector<1x8xf32> to vector<16x8xf32>
    %21 = arith.addf %17, %20 : vector<16x8xf32>
    %c0_19 = arith.constant 0 : index
    %c0_20 = arith.constant 0 : index
    %c0_21 = arith.constant 0 : index
    %22 = vector.load %arg18[%c0_19, %c0_20, %c0_21] : memref<1x32x8xbf16, #tpu.memory_space<vmem>>, vector<1x32x8xbf16>
    %23 = vector.shape_cast %22 : vector<1x32x8xbf16> to vector<32x8xbf16>
    %cst_22 = arith.constant dense<0.000000e+00> : vector<16x8xf32>
    %24 = tpu.matmul %7, %23, %cst_22 {dimension_numbers = #tpu.dot_dimension_numbers<[1], [0], [0], [1], [0, 0, 1, 1], [], []>} : vector<16x32xbf16>, vector<32x8xbf16>, vector<16x8xf32> -> vector<16x8xf32>
    %c0_23 = arith.constant 0 : index
    %c0_24 = arith.constant 0 : index
    %c0_25 = arith.constant 0 : index
    %25 = vector.load %arg19[%c0_23, %c0_24, %c0_25] : memref<1x1x8xf32, #tpu.memory_space<vmem>>, vector<1x1x8xf32>
    %26 = vector.shape_cast %25 : vector<1x1x8xf32> to vector<1x8xf32>
    %27 = vector.broadcast %26 : vector<1x8xf32> to vector<16x8xf32>
    %28 = arith.addf %24, %27 : vector<16x8xf32>
    %c0_26 = arith.constant 0 : index
    %c0_27 = arith.constant 0 : index
    %c0_28 = arith.constant 0 : index
    %29 = vector.load %arg11[%c0_26, %c0_27, %c0_28] : memref<1x1x8xf32, #tpu.memory_space<vmem>>, vector<1x1x8xf32>
    %30 = vector.shape_cast %29 : vector<1x1x8xf32> to vector<1x8xf32>
    %31 = vector.broadcast %30 : vector<1x8xf32> to vector<8x8xf32>
    %32 = arith.addf %14, %31 : vector<8x8xf32>
    %33 = arith.truncf %32 : vector<8x8xf32> to vector<8x8xbf16>
    %34 = arith.truncf %21 : vector<16x8xf32> to vector<16x8xbf16>
    %cst_29 = arith.constant dense<0.000000e+00> : vector<8x16xf32>
    %35 = tpu.matmul %33, %34, %cst_29 {dimension_numbers = #tpu.dot_dimension_numbers<[1], [1], [0], [0], [0, 0, 1, 0], [], []>} : vector<8x8xbf16>, vector<16x8xbf16>, vector<8x16xf32> -> vector<8x16xf32>
    %c2_i32 = arith.constant 2 : i32
    %36 = arith.muli %arg0, %c2_i32 : i32
    %37 = arith.addi %36, %arg1 : i32
    %c2_i32_30 = arith.constant 2 : i32
    %38 = arith.addi %37, %c2_i32_30 : i32
    %c3_i32 = arith.constant 3 : i32
    %c0_i32_31 = arith.constant 0 : i32
    %39 = arith.cmpi eq, %c3_i32, %c0_i32_31 : i32
    %c1_i32 = arith.constant 1 : i32
    %40 = arith.select %39, %c1_i32, %c3_i32 : i32
    %41 = arith.remsi %38, %40 : i32
    %c0_i32_32 = arith.constant 0 : i32
    %42 = arith.cmpi ne, %41, %c0_i32_32 : i32
    %c0_i32_33 = arith.constant 0 : i32
    %43 = arith.cmpi slt, %41, %c0_i32_33 : i32
    %c0_i32_34 = arith.constant 0 : i32
    %44 = arith.cmpi slt, %40, %c0_i32_34 : i32
    %45 = arith.xori %43, %44 : i1
    %46 = arith.andi %45, %42 : i1
    %47 = arith.addi %41, %40 : i32
    %48 = arith.select %46, %47, %41 : i32
    %c0_35 = arith.constant 0 : index
    %c0_36 = arith.constant 0 : index
    %c0_37 = arith.constant 0 : index
    %49 = vector.load %arg5[%c0_35, %c0_36, %c0_37] : memref<1x8x32xf32, #tpu.memory_space<vmem>>, vector<1x8x32xf32>
    %50 = vector.shape_cast %49 : vector<1x8x32xf32> to vector<8x32xf32>
    %51 = arith.truncf %50 : vector<8x32xf32> to vector<8x32xbf16>
    %c0_38 = arith.constant 0 : index
    %c0_39 = arith.constant 0 : index
    %c0_40 = arith.constant 0 : index
    %52 = vector.load %arg12[%c0_38, %c0_39, %c0_40] : memref<1x32x8xbf16, #tpu.memory_space<vmem>>, vector<1x32x8xbf16>
    %53 = vector.shape_cast %52 : vector<1x32x8xbf16> to vector<32x8xbf16>
    %cst_41 = arith.constant dense<0.000000e+00> : vector<8x8xf32>
    %54 = tpu.matmul %51, %53, %cst_41 {dimension_numbers = #tpu.dot_dimension_numbers<[1], [0], [0], [1], [0, 0, 1, 1], [], []>} : vector<8x32xbf16>, vector<32x8xbf16>, vector<8x8xf32> -> vector<8x8xf32>
    %c0_42 = arith.constant 0 : index
    %c0_43 = arith.constant 0 : index
    %c0_44 = arith.constant 0 : index
    %55 = vector.load %arg13[%c0_42, %c0_43, %c0_44] : memref<1x1x8xf32, #tpu.memory_space<vmem>>, vector<1x1x8xf32>
    %56 = vector.shape_cast %55 : vector<1x1x8xf32> to vector<1x8xf32>
    %57 = vector.broadcast %56 : vector<1x8xf32> to vector<8x8xf32>
    %58 = arith.addf %54, %57 : vector<8x8xf32>
    %c0_45 = arith.constant 0 : index
    %c0_46 = arith.constant 0 : index
    %c0_47 = arith.constant 0 : index
    %59 = vector.load %arg14[%c0_45, %c0_46, %c0_47] : memref<1x1x8xf32, #tpu.memory_space<vmem>>, vector<1x1x8xf32>
    %60 = vector.shape_cast %59 : vector<1x1x8xf32> to vector<1x8xf32>
    %61 = vector.broadcast %60 : vector<1x8xf32> to vector<8x8xf32>
    %62 = arith.addf %58, %61 : vector<8x8xf32>
    %c0_48 = arith.constant 0 : index
    %c0_49 = arith.constant 0 : index
    %63 = vector.load %arg7[%c0_48, %c0_49] : memref<16x32xbf16, #tpu.memory_space<vmem>>, vector<16x32xbf16>
    %c0_50 = arith.constant 0 : index
    %c0_51 = arith.constant 0 : index
    %c0_52 = arith.constant 0 : index
    %64 = vector.load %arg15[%c0_50, %c0_51, %c0_52] : memref<1x32x8xbf16, #tpu.memory_space<vmem>>, vector<1x32x8xbf16>
    %65 = vector.shape_cast %64 : vector<1x32x8xbf16> to vector<32x8xbf16>
    %cst_53 = arith.constant dense<0.000000e+00> : vector<16x8xf32>
    %66 = tpu.matmul %63, %65, %cst_53 {dimension_numbers = #tpu.dot_dimension_numbers<[1], [0], [0], [1], [0, 0, 1, 1], [], []>} : vector<16x32xbf16>, vector<32x8xbf16>, vector<16x8xf32> -> vector<16x8xf32>
    %67 = arith.truncf %62 : vector<8x8xf32> to vector<8x8xbf16>
    %68 = arith.truncf %66 : vector<16x8xf32> to vector<16x8xbf16>
    %cst_54 = arith.constant dense<0.000000e+00> : vector<8x16xf32>
    %69 = tpu.matmul %67, %68, %cst_54 {dimension_numbers = #tpu.dot_dimension_numbers<[1], [1], [0], [0], [0, 0, 1, 0], [], []>} : vector<8x8xbf16>, vector<16x8xbf16>, vector<8x16xf32> -> vector<8x16xf32>
    %c0_i32_55 = arith.constant 0 : i32
    %70 = arith.cmpi eq, %48, %c0_i32_55 : i32
    %cst_56 = arith.constant 0.000000e+00 : f32
    %cst_57 = arith.constant 1.000000e+00 : f32
    %71 = arith.select %70, %cst_56, %cst_57 : f32
    %72 = vector.broadcast %71 : f32 to vector<8x16xf32>
    %73 = arith.mulf %69, %72 : vector<8x16xf32>
    %74 = arith.addf %35, %73 : vector<8x16xf32>
    %cst_58 = arith.constant 0.353553385 : f32
    %75 = vector.broadcast %cst_58 : f32 to vector<8x16xf32>
    %76 = arith.mulf %74, %75 : vector<8x16xf32>
    %c0_59 = arith.constant 0 : index
    %c0_60 = arith.constant 0 : index
    %c0_61 = arith.constant 0 : index
    %77 = vector.load %arg8[%c0_59, %c0_60, %c0_61] : memref<1x8x16xf32, #tpu.memory_space<vmem>>, vector<1x8x16xf32>
    %78 = vector.shape_cast %77 : vector<1x8x16xf32> to vector<8x16xf32>
    %cst_62 = arith.constant 0.000000e+00 : f32
    %79 = vector.broadcast %cst_62 : f32 to vector<8x16xf32>
    %80 = arith.cmpf one, %78, %79 : vector<8x16xf32>
    %cst_63 = arith.constant -1.000000e+09 : f32
    %81 = vector.broadcast %cst_63 : f32 to vector<8x16xf32>
    %82 = arith.select %80, %81, %76 : vector<8x16xi1>, vector<8x16xf32>
    %cst_64 = arith.constant dense<0xFF800000> : vector<8xf32>
    %83 = vector.multi_reduction <maximumf>, %82, %cst_64 [1] : vector<8x16xf32> to vector<8xf32>
    %84 = vector.shape_cast %83 : vector<8xf32> to vector<8x1xf32>
    %85 = vector.broadcast %84 : vector<8x1xf32> to vector<8x16xf32>
    %86 = arith.subf %82, %85 : vector<8x16xf32>
    %87 = math.exp %86 : vector<8x16xf32>
    %cst_65 = arith.constant dense<0.000000e+00> : vector<8xf32>
    %88 = vector.multi_reduction <add>, %87, %cst_65 [1] : vector<8x16xf32> to vector<8xf32>
    %89 = vector.shape_cast %88 : vector<8xf32> to vector<8x1xf32>
    %90 = tpu.reciprocal %89 : vector<8x1xf32> -> vector<8x1xf32>
    %91 = vector.broadcast %90 : vector<8x1xf32> to vector<8x16xf32>
    %92 = arith.mulf %87, %91 : vector<8x16xf32>
    %c0_66 = arith.constant 0 : index
    %c0_67 = arith.constant 0 : index
    %c0_68 = arith.constant 0 : index
    %c0_69 = arith.constant 0 : index
    %93 = vector.load %arg31[%c0_66, %c0_67, %c0_68, %c0_69] : memref<1x1x8x16xf32, #tpu.memory_space<vmem>>, vector<1x1x8x16xf32>
    %94 = vector.shape_cast %93 : vector<1x1x8x16xf32> to vector<8x16xf32>
    %95 = vector.shape_cast %92 : vector<8x16xf32> to vector<1x1x8x16xf32>
    tpu.vector_store %arg31[%c0_66, %c0_67, %c0_68, %c0_69], %95 {strides = array<i32>} : memref<1x1x8x16xf32, #tpu.memory_space<vmem>>, vector<1x1x8x16xf32>,
    %96 = arith.truncf %92 : vector<8x16xf32> to vector<8x16xbf16>
    %97 = arith.truncf %28 : vector<16x8xf32> to vector<16x8xbf16>
    %cst_70 = arith.constant dense<0.000000e+00> : vector<8x8xf32>
    %98 = tpu.matmul %96, %97, %cst_70 {dimension_numbers = #tpu.dot_dimension_numbers<[1], [0], [0], [1], [0, 0, 1, 1], [], []>} : vector<8x16xbf16>, vector<16x8xbf16>, vector<8x8xf32> -> vector<8x8xf32>
    %c0_71 = arith.constant 0 : index
    %c0_72 = arith.constant 0 : index
    %99 = vector.load %arg32[%c0_71, %c0_72] : memref<8x32xf32, #tpu.memory_space<vmem>>, vector<8x32xf32>
    %100 = arith.truncf %98 : vector<8x8xf32> to vector<8x8xbf16>
    %c0_73 = arith.constant 0 : index
    %c0_74 = arith.constant 0 : index
    %c0_75 = arith.constant 0 : index
    %101 = vector.load %arg20[%c0_73, %c0_74, %c0_75] : memref<1x8x32xbf16, #tpu.memory_space<vmem>>, vector<1x8x32xbf16>
    %102 = vector.shape_cast %101 : vector<1x8x32xbf16> to vector<8x32xbf16>
    %cst_76 = arith.constant dense<0.000000e+00> : vector<8x32xf32>
    %103 = tpu.matmul %100, %102, %cst_76 {dimension_numbers = #tpu.dot_dimension_numbers<[1], [0], [0], [1], [0, 0, 1, 1], [], []>} : vector<8x8xbf16>, vector<8x32xbf16>, vector<8x32xf32> -> vector<8x32xf32>
    %104 = arith.addf %99, %103 : vector<8x32xf32>
    %c0_77 = arith.constant 0 : index
    %c0_78 = arith.constant 0 : index
    %105 = vector.load %arg32[%c0_77, %c0_78] : memref<8x32xf32, #tpu.memory_space<vmem>>, vector<8x32xf32>
    tpu.vector_store %arg32[%c0_77, %c0_78], %104 {strides = array<i32>} : memref<8x32xf32, #tpu.memory_space<vmem>>, vector<8x32xf32>,
    %c1_i32_79 = arith.constant 1 : i32
    %106 = arith.cmpi eq, %arg1, %c1_i32_79 : i32
    %107 = arith.extui %106 : i1 to i32
    %c0_i32_80 = arith.constant 0 : i32
    %108 = arith.cmpi ne, %107, %c0_i32_80 : i32
    scf.if %108 {
      %c0_81 = arith.constant 0 : index
      %c0_82 = arith.constant 0 : index
      %109 = vector.load %arg32[%c0_81, %c0_82] : memref<8x32xf32, #tpu.memory_space<vmem>>, vector<8x32xf32>
      %110 = arith.addf %4, %109 : vector<8x32xf32>
      %c0_83 = arith.constant 0 : index
      %c0_84 = arith.constant 0 : index
      %111 = vector.load %arg21[%c0_83, %c0_84] : memref<1x32xf32, #tpu.memory_space<vmem>>, vector<1x32xf32>
      %112 = vector.broadcast %111 : vector<1x32xf32> to vector<8x32xf32>
      %113 = arith.addf %110, %112 : vector<8x32xf32>
      %cst_85 = arith.constant dense<0.000000e+00> : vector<8xf32>
      %114 = vector.multi_reduction <add>, %113, %cst_85 [1] : vector<8x32xf32> to vector<8xf32>
      %115 = vector.shape_cast %114 : vector<8xf32> to vector<8x1xf32>
      %cst_86 = arith.constant 3.200000e+01 : f32
      %116 = vector.broadcast %cst_86 : f32 to vector<8x1xf32>
      %117 = arith.divf %115, %116 : vector<8x1xf32>
      %118 = vector.broadcast %117 : vector<8x1xf32> to vector<8x32xf32>
      %119 = arith.subf %113, %118 : vector<8x32xf32>
      %120 = arith.mulf %119, %119 : vector<8x32xf32>
      %cst_87 = arith.constant dense<0.000000e+00> : vector<8xf32>
      %121 = vector.multi_reduction <add>, %120, %cst_87 [1] : vector<8x32xf32> to vector<8xf32>
      %122 = vector.shape_cast %121 : vector<8xf32> to vector<8x1xf32>
      %cst_88 = arith.constant 3.200000e+01 : f32
      %123 = vector.broadcast %cst_88 : f32 to vector<8x1xf32>
      %124 = arith.divf %122, %123 : vector<8x1xf32>
      %125 = vector.broadcast %117 : vector<8x1xf32> to vector<8x32xf32>
      %126 = arith.subf %113, %125 : vector<8x32xf32>
      %cst_89 = arith.constant 9.99999996E-13 : f32
      %127 = vector.broadcast %cst_89 : f32 to vector<8x1xf32>
      %128 = arith.addf %124, %127 : vector<8x1xf32>
      %129 = math.rsqrt %128 : vector<8x1xf32>
      %130 = vector.broadcast %129 : vector<8x1xf32> to vector<8x32xf32>
      %131 = arith.mulf %126, %130 : vector<8x32xf32>
      %c0_90 = arith.constant 0 : index
      %c0_91 = arith.constant 0 : index
      %132 = vector.load %arg22[%c0_90, %c0_91] : memref<1x32xf32, #tpu.memory_space<vmem>>, vector<1x32xf32>
      %133 = vector.broadcast %132 : vector<1x32xf32> to vector<8x32xf32>
      %134 = arith.mulf %131, %133 : vector<8x32xf32>
      %c0_92 = arith.constant 0 : index
      %c0_93 = arith.constant 0 : index
      %135 = vector.load %arg23[%c0_92, %c0_93] : memref<1x32xf32, #tpu.memory_space<vmem>>, vector<1x32xf32>
      %136 = vector.broadcast %135 : vector<1x32xf32> to vector<8x32xf32>
      %137 = arith.addf %134, %136 : vector<8x32xf32>
      %138 = arith.truncf %137 : vector<8x32xf32> to vector<8x32xbf16>
      %c0_94 = arith.constant 0 : index
      %c0_95 = arith.constant 0 : index
      %139 = vector.load %arg24[%c0_94, %c0_95] : memref<32x64xbf16, #tpu.memory_space<vmem>>, vector<32x64xbf16>
      %cst_96 = arith.constant dense<0.000000e+00> : vector<8x64xf32>
      %140 = tpu.matmul %138, %139, %cst_96 {dimension_numbers = #tpu.dot_dimension_numbers<[1], [0], [0], [1], [0, 0, 1, 1], [], []>} : vector<8x32xbf16>, vector<32x64xbf16>, vector<8x64xf32> -> vector<8x64xf32>
      %c0_97 = arith.constant 0 : index
      %c0_98 = arith.constant 0 : index
      %141 = vector.load %arg25[%c0_97, %c0_98] : memref<1x64xf32, #tpu.memory_space<vmem>>, vector<1x64xf32>
      %142 = vector.broadcast %141 : vector<1x64xf32> to vector<8x64xf32>
      %143 = arith.addf %140, %142 : vector<8x64xf32>
      %cst_99 = arith.constant 5.000000e-01 : f32
      %144 = vector.broadcast %cst_99 : f32 to vector<8x64xf32>
      %145 = arith.mulf %144, %143 : vector<8x64xf32>
      %cst_100 = arith.constant 4.471500e-02 : f32
      %146 = vector.broadcast %cst_100 : f32 to vector<8x64xf32>
      %147 = arith.mulf %146, %143 : vector<8x64xf32>
      %148 = arith.mulf %147, %143 : vector<8x64xf32>
      %149 = arith.mulf %148, %143 : vector<8x64xf32>
      %150 = arith.addf %143, %149 : vector<8x64xf32>
      %cst_101 = arith.constant 0.797884583 : f32
      %151 = vector.broadcast %cst_101 : f32 to vector<8x64xf32>
      %152 = arith.mulf %151, %150 : vector<8x64xf32>
      %153 = math.tanh %152 : vector<8x64xf32>
      %cst_102 = arith.constant 1.000000e+00 : f32
      %154 = vector.broadcast %cst_102 : f32 to vector<8x64xf32>
      %155 = arith.addf %154, %153 : vector<8x64xf32>
      %156 = arith.mulf %145, %155 : vector<8x64xf32>
      %157 = arith.truncf %156 : vector<8x64xf32> to vector<8x64xbf16>
      %c0_103 = arith.constant 0 : index
      %c0_104 = arith.constant 0 : index
      %158 = vector.load %arg26[%c0_103, %c0_104] : memref<64x32xbf16, #tpu.memory_space<vmem>>, vector<64x32xbf16>
      %cst_105 = arith.constant dense<0.000000e+00> : vector<8x32xf32>
      %159 = tpu.matmul %157, %158, %cst_105 {dimension_numbers = #tpu.dot_dimension_numbers<[1], [0], [0], [1], [0, 0, 1, 1], [], []>} : vector<8x64xbf16>, vector<64x32xbf16>, vector<8x32xf32> -> vector<8x32xf32>
      %c0_106 = arith.constant 0 : index
      %c0_107 = arith.constant 0 : index
      %160 = vector.load %arg27[%c0_106, %c0_107] : memref<1x32xf32, #tpu.memory_space<vmem>>, vector<1x32xf32>
      %161 = vector.broadcast %160 : vector<1x32xf32> to vector<8x32xf32>
      %162 = arith.addf %159, %161 : vector<8x32xf32>
      %163 = arith.addf %162, %137 : vector<8x32xf32>
      %cst_108 = arith.constant dense<0.000000e+00> : vector<8xf32>
      %164 = vector.multi_reduction <add>, %163, %cst_108 [1] : vector<8x32xf32> to vector<8xf32>
      %165 = vector.shape_cast %164 : vector<8xf32> to vector<8x1xf32>
      %cst_109 = arith.constant 3.200000e+01 : f32
      %166 = vector.broadcast %cst_109 : f32 to vector<8x1xf32>
      %167 = arith.divf %165, %166 : vector<8x1xf32>
      %168 = vector.broadcast %167 : vector<8x1xf32> to vector<8x32xf32>
      %169 = arith.subf %163, %168 : vector<8x32xf32>
      %170 = arith.mulf %169, %169 : vector<8x32xf32>
      %cst_110 = arith.constant dense<0.000000e+00> : vector<8xf32>
      %171 = vector.multi_reduction <add>, %170, %cst_110 [1] : vector<8x32xf32> to vector<8xf32>
      %172 = vector.shape_cast %171 : vector<8xf32> to vector<8x1xf32>
      %cst_111 = arith.constant 3.200000e+01 : f32
      %173 = vector.broadcast %cst_111 : f32 to vector<8x1xf32>
      %174 = arith.divf %172, %173 : vector<8x1xf32>
      %175 = vector.broadcast %167 : vector<8x1xf32> to vector<8x32xf32>
      %176 = arith.subf %163, %175 : vector<8x32xf32>
      %cst_112 = arith.constant 9.99999996E-13 : f32
      %177 = vector.broadcast %cst_112 : f32 to vector<8x1xf32>
      %178 = arith.addf %174, %177 : vector<8x1xf32>
      %179 = math.rsqrt %178 : vector<8x1xf32>
      %180 = vector.broadcast %179 : vector<8x1xf32> to vector<8x32xf32>
      %181 = arith.mulf %176, %180 : vector<8x32xf32>
      %c0_113 = arith.constant 0 : index
      %c0_114 = arith.constant 0 : index
      %182 = vector.load %arg28[%c0_113, %c0_114] : memref<1x32xf32, #tpu.memory_space<vmem>>, vector<1x32xf32>
      %183 = vector.broadcast %182 : vector<1x32xf32> to vector<8x32xf32>
      %184 = arith.mulf %181, %183 : vector<8x32xf32>
      %c0_115 = arith.constant 0 : index
      %c0_116 = arith.constant 0 : index
      %185 = vector.load %arg29[%c0_115, %c0_116] : memref<1x32xf32, #tpu.memory_space<vmem>>, vector<1x32xf32>
      %186 = vector.broadcast %185 : vector<1x32xf32> to vector<8x32xf32>
      %187 = arith.addf %184, %186 : vector<8x32xf32>
      %c0_117 = arith.constant 0 : index
      %c0_118 = arith.constant 0 : index
      %c0_119 = arith.constant 0 : index
      %188 = vector.load %arg30[%c0_117, %c0_118, %c0_119] : memref<1x8x32xf32, #tpu.memory_space<vmem>>, vector<1x8x32xf32>
      %189 = vector.shape_cast %188 : vector<1x8x32xf32> to vector<8x32xf32>
      %190 = vector.shape_cast %187 : vector<8x32xf32> to vector<1x8x32xf32>
      tpu.vector_store %arg30[%c0_117, %c0_118, %c0_119], %190 {strides = array<i32>} : memref<1x8x32xf32, #tpu.memory_space<vmem>>, vector<1x8x32xf32>,
    } else {
    }
    return
  }
  func.func @transform_0(%arg0: i32, %arg1: i32, %arg2: memref<2x2xi32, #tpu.memory_space<smem>>, %arg3: memref<2x2xi32, #tpu.memory_space<smem>>) -> (i32, i32, i32) {
    %c0_i32 = arith.constant 0 : i32
    %c0_i32_0 = arith.constant 0 : i32
    %c0_i32_1 = arith.constant 0 : i32
    return %arg0, %c0_i32, %c0_i32_0 : i32, i32, i32
  }
  func.func @transform_1(%arg0: i32, %arg1: i32, %arg2: memref<2x2xi32, #tpu.memory_space<smem>>, %arg3: memref<2x2xi32, #tpu.memory_space<smem>>) -> (i32, i32, i32) {
    %0 = arith.index_cast %arg0 : i32 to index
    %1 = arith.index_cast %arg1 : i32 to index
    %2 = memref.load %arg2[%0, %1] : memref<2x2xi32, #tpu.memory_space<smem>>
    %c0_i32 = arith.constant 0 : i32
    %c0_i32_0 = arith.constant 0 : i32
    %c0_i32_1 = arith.constant 0 : i32
    return %2, %c0_i32, %c0_i32_0 : i32, i32, i32
  }
  func.func @transform_2(%arg0: i32, %arg1: i32, %arg2: memref<2x2xi32, #tpu.memory_space<smem>>, %arg3: memref<2x2xi32, #tpu.memory_space<smem>>) -> (i32, i32, i32) {
    %c0_i32 = arith.constant 0 : i32
    %c0_i32_0 = arith.constant 0 : i32
    %c0_i32_1 = arith.constant 0 : i32
    return %arg0, %c0_i32, %c0_i32_0 : i32, i32, i32
  }
  func.func @transform_3(%arg0: i32, %arg1: i32, %arg2: memref<2x2xi32, #tpu.memory_space<smem>>, %arg3: memref<2x2xi32, #tpu.memory_space<smem>>) -> (i32, i32) {
    %c0_i32 = arith.constant 0 : i32
    %c0_i32_0 = arith.constant 0 : i32
    %c0_i32_1 = arith.constant 0 : i32
    return %c0_i32, %c0_i32_0 : i32, i32
  }
  func.func @transform_4(%arg0: i32, %arg1: i32, %arg2: memref<2x2xi32, #tpu.memory_space<smem>>, %arg3: memref<2x2xi32, #tpu.memory_space<smem>>) -> (i32, i32, i32) {
    %c0_i32 = arith.constant 0 : i32
    %c0_i32_0 = arith.constant 0 : i32
    %c0_i32_1 = arith.constant 0 : i32
    return %arg0, %c0_i32, %c0_i32_0 : i32, i32, i32
  }
  func.func @transform_5(%arg0: i32, %arg1: i32, %arg2: memref<2x2xi32, #tpu.memory_space<smem>>, %arg3: memref<2x2xi32, #tpu.memory_space<smem>>) -> (i32, i32, i32) {
    %c0_i32 = arith.constant 0 : i32
    %c0_i32_0 = arith.constant 0 : i32
    %c0_i32_1 = arith.constant 0 : i32
    return %arg1, %c0_i32, %c0_i32_0 : i32, i32, i32
  }
  func.func @transform_6(%arg0: i32, %arg1: i32, %arg2: memref<2x2xi32, #tpu.memory_space<smem>>, %arg3: memref<2x2xi32, #tpu.memory_space<smem>>) -> (i32, i32, i32) {
    %c0_i32 = arith.constant 0 : i32
    %c0_i32_0 = arith.constant 0 : i32
    %c0_i32_1 = arith.constant 0 : i32
    return %arg1, %c0_i32, %c0_i32_0 : i32, i32, i32
  }
  func.func @transform_7(%arg0: i32, %arg1: i32, %arg2: memref<2x2xi32, #tpu.memory_space<smem>>, %arg3: memref<2x2xi32, #tpu.memory_space<smem>>) -> (i32, i32, i32) {
    %c0_i32 = arith.constant 0 : i32
    %c0_i32_0 = arith.constant 0 : i32
    %c0_i32_1 = arith.constant 0 : i32
    return %arg1, %c0_i32, %c0_i32_0 : i32, i32, i32
  }
  func.func @transform_8(%arg0: i32, %arg1: i32, %arg2: memref<2x2xi32, #tpu.memory_space<smem>>, %arg3: memref<2x2xi32, #tpu.memory_space<smem>>) -> (i32, i32, i32) {
    %0 = arith.index_cast %arg0 : i32 to index
    %1 = arith.index_cast %arg1 : i32 to index
    %2 = memref.load %arg3[%0, %1] : memref<2x2xi32, #tpu.memory_space<smem>>
    %c0_i32 = arith.constant 0 : i32
    %c0_i32_0 = arith.constant 0 : i32
    %c0_i32_1 = arith.constant 0 : i32
    return %2, %c0_i32, %c0_i32_0 : i32, i32, i32
  }
  func.func @transform_9(%arg0: i32, %arg1: i32, %arg2: memref<2x2xi32, #tpu.memory_space<smem>>, %arg3: memref<2x2xi32, #tpu.memory_space<smem>>) -> (i32, i32, i32) {
    %0 = arith.index_cast %arg0 : i32 to index
    %1 = arith.index_cast %arg1 : i32 to index
    %2 = memref.load %arg3[%0, %1] : memref<2x2xi32, #tpu.memory_space<smem>>
    %c0_i32 = arith.constant 0 : i32
    %c0_i32_0 = arith.constant 0 : i32
    %c0_i32_1 = arith.constant 0 : i32
    return %2, %c0_i32, %c0_i32_0 : i32, i32, i32
  }
  func.func @transform_10(%arg0: i32, %arg1: i32, %arg2: memref<2x2xi32, #tpu.memory_space<smem>>, %arg3: memref<2x2xi32, #tpu.memory_space<smem>>) -> (i32, i32, i32) {
    %0 = arith.index_cast %arg0 : i32 to index
    %1 = arith.index_cast %arg1 : i32 to index
    %2 = memref.load %arg3[%0, %1] : memref<2x2xi32, #tpu.memory_space<smem>>
    %c0_i32 = arith.constant 0 : i32
    %c0_i32_0 = arith.constant 0 : i32
    %c0_i32_1 = arith.constant 0 : i32
    return %2, %c0_i32, %c0_i32_0 : i32, i32, i32
  }
  func.func @transform_11(%arg0: i32, %arg1: i32, %arg2: memref<2x2xi32, #tpu.memory_space<smem>>, %arg3: memref<2x2xi32, #tpu.memory_space<smem>>) -> (i32, i32, i32) {
    %0 = arith.index_cast %arg0 : i32 to index
    %1 = arith.index_cast %arg1 : i32 to index
    %2 = memref.load %arg3[%0, %1] : memref<2x2xi32, #tpu.memory_space<smem>>
    %c0_i32 = arith.constant 0 : i32
    %c0_i32_0 = arith.constant 0 : i32
    %c0_i32_1 = arith.constant 0 : i32
    return %2, %c0_i32, %c0_i32_0 : i32, i32, i32
  }
  func.func @transform_12(%arg0: i32, %arg1: i32, %arg2: memref<2x2xi32, #tpu.memory_space<smem>>, %arg3: memref<2x2xi32, #tpu.memory_space<smem>>) -> (i32, i32, i32) {
    %c0_i32 = arith.constant 0 : i32
    %c0_i32_0 = arith.constant 0 : i32
    %c0_i32_1 = arith.constant 0 : i32
    return %arg1, %c0_i32, %c0_i32_0 : i32, i32, i32
  }
  func.func @transform_13(%arg0: i32, %arg1: i32, %arg2: memref<2x2xi32, #tpu.memory_space<smem>>, %arg3: memref<2x2xi32, #tpu.memory_space<smem>>) -> (i32, i32, i32) {
    %c0_i32 = arith.constant 0 : i32
    %c0_i32_0 = arith.constant 0 : i32
    %c0_i32_1 = arith.constant 0 : i32
    return %arg1, %c0_i32, %c0_i32_0 : i32, i32, i32
  }
  func.func @transform_14(%arg0: i32, %arg1: i32, %arg2: memref<2x2xi32, #tpu.memory_space<smem>>, %arg3: memref<2x2xi32, #tpu.memory_space<smem>>) -> (i32, i32, i32) {
    %c0_i32 = arith.constant 0 : i32
    %c0_i32_0 = arith.constant 0 : i32
    %c0_i32_1 = arith.constant 0 : i32
    return %arg1, %c0_i32, %c0_i32_0 : i32, i32, i32
  }
  func.func @transform_15(%arg0: i32, %arg1: i32, %arg2: memref<2x2xi32, #tpu.memory_space<smem>>, %arg3: memref<2x2xi32, #tpu.memory_space<smem>>) -> (i32, i32, i32) {
    %c0_i32 = arith.constant 0 : i32
    %c0_i32_0 = arith.constant 0 : i32
    %c0_i32_1 = arith.constant 0 : i32
    return %arg1, %c0_i32, %c0_i32_0 : i32, i32, i32
  }
  func.func @transform_16(%arg0: i32, %arg1: i32, %arg2: memref<2x2xi32, #tpu.memory_space<smem>>, %arg3: memref<2x2xi32, #tpu.memory_space<smem>>) -> (i32, i32, i32) {
    %c0_i32 = arith.constant 0 : i32
    %c0_i32_0 = arith.constant 0 : i32
    %c0_i32_1 = arith.constant 0 : i32
    return %arg1, %c0_i32, %c0_i32_0 : i32, i32, i32
  }
  func.func @transform_17(%arg0: i32, %arg1: i32, %arg2: memref<2x2xi32, #tpu.memory_space<smem>>, %arg3: memref<2x2xi32, #tpu.memory_space<smem>>) -> (i32, i32) {
    %c0_i32 = arith.constant 0 : i32
    %c0_i32_0 = arith.constant 0 : i32
    %c0_i32_1 = arith.constant 0 : i32
    return %c0_i32, %c0_i32_0 : i32, i32
  }
  func.func @transform_18(%arg0: i32, %arg1: i32, %arg2: memref<2x2xi32, #tpu.memory_space<smem>>, %arg3: memref<2x2xi32, #tpu.memory_space<smem>>) -> (i32, i32) {
    %c0_i32 = arith.constant 0 : i32
    %c0_i32_0 = arith.constant 0 : i32
    %c0_i32_1 = arith.constant 0 : i32
    return %c0_i32, %c0_i32_0 : i32, i32
  }
  func.func @transform_19(%arg0: i32, %arg1: i32, %arg2: memref<2x2xi32, #tpu.memory_space<smem>>, %arg3: memref<2x2xi32, #tpu.memory_space<smem>>) -> (i32, i32) {
    %c0_i32 = arith.constant 0 : i32
    %c0_i32_0 = arith.constant 0 : i32
    %c0_i32_1 = arith.constant 0 : i32
    return %c0_i32, %c0_i32_0 : i32, i32
  }
  func.func @transform_20(%arg0: i32, %arg1: i32, %arg2: memref<2x2xi32, #tpu.memory_space<smem>>, %arg3: memref<2x2xi32, #tpu.memory_space<smem>>) -> (i32, i32) {
    %c0_i32 = arith.constant 0 : i32
    %c0_i32_0 = arith.constant 0 : i32
    %c0_i32_1 = arith.constant 0 : i32
    return %c0_i32, %c0_i32_0 : i32, i32
  }
  func.func @transform_21(%arg0: i32, %arg1: i32, %arg2: memref<2x2xi32, #tpu.memory_space<smem>>, %arg3: memref<2x2xi32, #tpu.memory_space<smem>>) -> (i32, i32) {
    %c0_i32 = arith.constant 0 : i32
    %c0_i32_0 = arith.constant 0 : i32
    %c0_i32_1 = arith.constant 0 : i32
    return %c0_i32, %c0_i32_0 : i32, i32
  }
  func.func @transform_22(%arg0: i32, %arg1: i32, %arg2: memref<2x2xi32, #tpu.memory_space<smem>>, %arg3: memref<2x2xi32, #tpu.memory_space<smem>>) -> (i32, i32) {
    %c0_i32 = arith.constant 0 : i32
    %c0_i32_0 = arith.constant 0 : i32
    %c0_i32_1 = arith.constant 0 : i32
    return %c0_i32, %c0_i32_0 : i32, i32
  }
  func.func @transform_23(%arg0: i32, %arg1: i32, %arg2: memref<2x2xi32, #tpu.memory_space<smem>>, %arg3: memref<2x2xi32, #tpu.memory_space<smem>>) -> (i32, i32) {
    %c0_i32 = arith.constant 0 : i32
    %c0_i32_0 = arith.constant 0 : i32
    %c0_i32_1 = arith.constant 0 : i32
    return %c0_i32, %c0_i32_0 : i32, i32
  }
  func.func @transform_24(%arg0: i32, %arg1: i32, %arg2: memref<2x2xi32, #tpu.memory_space<smem>>, %arg3: memref<2x2xi32, #tpu.memory_space<smem>>) -> (i32, i32) {
    %c0_i32 = arith.constant 0 : i32
    %c0_i32_0 = arith.constant 0 : i32
    %c0_i32_1 = arith.constant 0 : i32
    return %c0_i32, %c0_i32_0 : i32, i32
  }
  func.func @transform_25(%arg0: i32, %arg1: i32, %arg2: memref<2x2xi32, #tpu.memory_space<smem>>, %arg3: memref<2x2xi32, #tpu.memory_space<smem>>) -> (i32, i32) {
    %c0_i32 = arith.constant 0 : i32
    %c0_i32_0 = arith.constant 0 : i32
    %c0_i32_1 = arith.constant 0 : i32
    return %c0_i32, %c0_i32_0 : i32, i32
  }
  func.func @transform_26(%arg0: i32, %arg1: i32, %arg2: memref<2x2xi32, #tpu.memory_space<smem>>, %arg3: memref<2x2xi32, #tpu.memory_space<smem>>) -> (i32, i32, i32) {
    %c0_i32 = arith.constant 0 : i32
    %c0_i32_0 = arith.constant 0 : i32
    %c0_i32_1 = arith.constant 0 : i32
    return %arg0, %c0_i32, %c0_i32_0 : i32, i32, i32
  }
  func.func @transform_27(%arg0: i32, %arg1: i32, %arg2: memref<2x2xi32, #tpu.memory_space<smem>>, %arg3: memref<2x2xi32, #tpu.memory_space<smem>>) -> (i32, i32, i32, i32) {
    %c0_i32 = arith.constant 0 : i32
    %c0_i32_0 = arith.constant 0 : i32
    %c0_i32_1 = arith.constant 0 : i32
    return %arg0, %arg1, %c0_i32, %c0_i32_0 : i32, i32, i32, i32
  }
}

</mosaic_0001>

<bundles_post_ra>
// kernel: decoder_layer.1
= control target key start
LH: loop header
LB: loop body
LE: loop exit
PB: predicated region body
PF: predicated region fallthrough
CT: control target
= control target key end

     0   :  { %s4946_s6 = smov 2   ;;  %s4947_s10 = smov 3   ;;  %s6570_s0 = inlined_call_operand.smem [shape: u32[30], index: -1, kind: input, shape index: {}] }
   0x1   :  { %s5022_s5 = sld [smem:[%s6570_s0]]   ;;  %s4948_s14 = smov 4  }
   0x2   :  { %s5027_s9 = sld [smem:[%s6570_s0 + %s4946_s6]]   ;;  %s4949_s18 = smov 5  }
   0x3   :  { %s5032_s13 = sld [smem:[%s6570_s0 + %s4947_s10]]   ;;  %s4950_s22 = smov 6  }
   0x4   :  { %s5037_s17 = sld [smem:[%s6570_s0 + %s4948_s14]]   ;;  %s4951_s26 = smov 7  }
   0x5   :  { %s5042_s21 = sld [smem:[%s6570_s0 + %s4949_s18]]   ;;  %s4952_s30 = smov 8  }
   0x6   :  { %s5047_s25 = sld [smem:[%s6570_s0 + %s4950_s22]]   ;;  %s4953_s4 = smov 9  }
   0x7   :  { %s5052_s29 = sld [smem:[%s6570_s0 + %s4951_s26]]   ;;  %s4954_s10 = smov 10  }
   0x8   :  { %6724 = sst [smem:[#allocation74_spill]] %s5027_s9  ;;  %s4955_s15 = smov 11  }
   0x9   :  { %6725 = sst [smem:[#allocation75_spill]] %s5032_s13  ;;  %s4956_s20 = smov 12  }
   0xa   :  { %6726 = sst [smem:[#allocation76_spill]] %s5037_s17  ;;  %s4957_s26 = smov 13  }
   0xb   :  { %6727 = sst [smem:[#allocation77_spill]] %s5042_s21  ;;  %s4958_s1 = smov 14  }
   0xc   :  { %6728 = sst [smem:[#allocation78_spill]] %s5047_s25  ;;  %s4959_s7 = smov 15  }
   0xd   :  { %6729 = sst [smem:[#allocation79_spill]] %s5052_s29  ;;  %s4961_s22 = smov 17  }
   0xe   :  { %s5057_s3 = sld [smem:[%s6570_s0 + %s4952_s30]]   ;;  %s4962_s28 = smov 18  }
   0xf   :  { %s5062_s8 = sld [smem:[%s6570_s0 + %s4953_s4]]   ;;  %s4968_s16 = smov 24  }
  0x10   :  { %s5067_s14 = sld [smem:[%s6570_s0 + %s4954_s10]]   ;;  %s4970_s2 = smov 26  }
  0x11   :  { %s5072_s19 = sld [smem:[%s6570_s0 + %s4955_s15]]   ;;  %s4960_s15 = smov 16  }
  0x12   :  { %s5077_s24 = sld [smem:[%s6570_s0 + %s4956_s20]]  }
  0x13   :  { %s5082_s30 = sld [smem:[%s6570_s0 + %s4957_s26]]   ;;  %s4969_s26 = smov 25  }
  0x14   :  { %6730 = sst [smem:[#allocation80_spill]] %s5057_s3 }
  0x15   :  { %6731 = sst [smem:[#allocation81_spill]] %s5062_s8 }
  0x16   :  { %6732 = sst [smem:[#allocation82_spill]] %s5067_s14 }
  0x17   :  { %6733 = sst [smem:[#allocation83_spill]] %s5072_s19 }
  0x18   :  { %6734 = sst [smem:[#allocation84_spill]] %s5077_s24  ;;  %s4973_s24 = smov 29  }
  0x19   :  { %6735 = sst [smem:[#allocation85_spill]] %s5082_s30 }
  0x1a   :  { %s5087_s6 = sld [smem:[%s6570_s0 + %s4958_s1]]  }
  0x1b   :  { %s5092_s12 = sld [smem:[%s6570_s0 + %s4959_s7]]   ;;  %s4963_s7 = smov 19  }
  0x1c   :  { %s5097_s20 = sld [smem:[%s6570_s0 + %s4960_s15]]   ;;  %s4964_s15 = smov 20  }
  0x1d   :  { %s5102_s27 = sld [smem:[%s6570_s0 + %s4961_s22]]   ;;  %s4965_s22 = smov 21  }
  0x1e   :  { %s5107_s4 = sld [smem:[%s6570_s0 + %s4962_s28]]   ;;  %s4966_s28 = smov 22  }
  0x1f   :  { %s5112_s30 = sld [smem:[%s6570_s0 + %s4963_s7]]   ;;  %s4967_s7 = smov 23  }
  0x20   :  { %6736 = sst [smem:[#allocation86_spill]] %s5087_s6  ;;  %s3808_s6 = scalar_lea.hbm %s5022_s5, 32 }
  0x21   :  { %6737 = sst [smem:[#allocation87_spill]] %s5092_s12  ;;  %p3809_p0 = scmp.ne.s32.totalorder %s5022_s5, %s3808_s6 }
  0x22   :  { %6738 = sst [smem:[#allocation88_spill]] %s5097_s20  ;;  %p3812_p1 = scmp.lt.u32.totalorder %s3808_s6, %s5022_s5 }
  0x23   :  { %6739 = sst [smem:[#allocation89_spill]] %s5102_s27 }
  0x24   :  { %6740 = sst [smem:[#allocation90_spill]] %s5107_s4  ;;  %p3814_p2 = pnand %p3812_p1, %p3809_p0 }
  0x25   :  { %6741 = sst [smem:[#allocation91_spill]] %s5112_s30 }
  0x26   :  { %s5117_s20 = sld [smem:[%s6570_s0 + %s4964_s15]]  }
  0x27   :  { %s5122_s27 = sld [smem:[%s6570_s0 + %s4965_s22]]  }
  0x28   :  { %s5127_s10 = sld [smem:[%s6570_s0 + %s4966_s28]]  }
  0x29   :  { %s5132_s15 = sld [smem:[%s6570_s0 + %s4967_s7]]   ;;  %s4971_s7 = smov 27  }
  0x2a   :  { %s5137_s22 = sld [smem:[%s6570_s0 + %s4968_s16]]   ;;  %s4972_s16 = smov 28  }
  0x2b   :  { %s5142_s28 = sld [smem:[%s6570_s0 + %s4969_s26]]  }
  0x2c   :  { %6742 = sst [smem:[#allocation92_spill]] %s5117_s20 }
  0x2d   :  { %6743 = sst [smem:[#allocation93_spill]] %s5122_s27 }
  0x2e   :  { %6744 = sst [smem:[#allocation94_spill]] %s5127_s10 }
  0x2f   :  { %6745 = sst [smem:[#allocation95_spill]] %s5132_s15 }
  0x30   :  { %6746 = sst [smem:[#allocation96_spill]] %s5137_s22 }
  0x31   :  { %6747 = sst [smem:[#allocation97_spill]] %s5142_s28 }
  0x32   :  { %s5147_s4 = sld [smem:[%s6570_s0 + %s4970_s2]]  }
  0x33   :  { %s5152_s14 = sld [smem:[%s6570_s0 + %s4971_s7]]  }
  0x34   :  { %s5157_s8 = sld [smem:[%s6570_s0 + %s4972_s16]]  }
  0x35   :  { %s5162_s3 = sld [smem:[%s6570_s0 + %s4973_s24]]  }
  0x38   :  { %6748 = sst [smem:[#allocation98_spill]] %s5147_s4 }
  0x39   :  { %6749 = sst [smem:[#allocation99_spill]] %s5152_s14 }
  0x3a   :  { %6750 = sst [smem:[#allocation100_spill]] %s5157_s8 }
  0x3b   :  { %6751 = sst [smem:[#allocation101_spill]] %s5162_s3 }
  0x3c   :  { %3817 = shalt.err (!%p3814_p2)  }
  0x3d   :  { %s4974_s19 = smov [#allocation4]   ;;  %s4975_s12 = smov 1  }
  0x3e   :  { %66 = dma.hbm_to_smem %s5022_s5, 32, %s4974_s19, [#allocation3] }
  0x3f   :  { %s3061_s11 = sld [smem:[%s6570_s0 + %s4975_s12]]  }
  0x45   :  { %s3818_s16 = scalar_lea.hbm %s3061_s11, 32 }
  0x46   :  { %p3819_p3 = scmp.ne.s32.totalorder %s3061_s11, %s3818_s16  ;;  %p3822_p4 = scmp.lt.u32.totalorder %s3818_s16, %s3061_s11 }
  0x48   :  { %p3824_p5 = pnand %p3822_p4, %p3819_p3 }
  0x4a   :  { %3827 = shalt.err (!%p3824_p5)  }
  0x4b   :  { %s4976_s18 = smov [#allocation5]  }
  0x4c   :  { %68 = dma.hbm_to_smem %s3061_s11, 32, %s4976_s18, [#allocation3] }
  0x4d   :  { %4728 = dma.done.wait [#allocation3], 64 }
  0x4e   :  { %4729 = vsyncadd [#allocation3], 4294967232 }
  0x4f   :  { %70 = sfence }
  0x50   :  { %71 = vsyncpa [#allocation7], 0 }
  0x51   :  { %73 = vsyncpa [#allocation7 + $0x1], 0 }
  0x52   :  { %74 = vsyncpa [#allocation10], 0 }
  0x53   :  { %76 = vsyncpa [#allocation10 + $0x1], 0 }
  0x54   :  { %77 = vsyncpa [#allocation13], 0 }
  0x55   :  { %78 = vsyncpa [#allocation30], 0 }
  0x56   :  { %79 = vsyncpa [#allocation33], 0 }
  0x57   :  { %80 = vsyncpa [#allocation36], 0 }
  0x58   :  { %81 = vsyncpa [#allocation39], 0 }
  0x59   :  { %82 = vsyncpa [#allocation8], 0 }
  0x5a   :  { %84 = vsyncpa [#allocation8 + $0x1], 0 }
  0x5b   :  { %85 = vsyncpa [#allocation42], 0 }
  0x5c   :  { %87 = vsyncpa [#allocation42 + $0x1], 0  ;;  %s5171_s0 = smov 0   ;;  %s5173_s5 = smov 0  }
  0x5d   :  { %6752 = sst [smem:[#allocation102_spill]] %s5171_s0  ;;  %s5175_s23 = smov 0  }
  0x5e   :  { %s5177_s24 = smov 0   ;;  %s5179_s26 = smov 0  }
  0x5f   :  { %s5181_s1 = smov 0   ;;  %s5183_s6 = smov 0  }
  0x60   :  { %6753 = sst [smem:[#allocation103_spill]] %s5181_s1  ;;  %s5185_s19 = smov 0  }
  0x61   :  { %s5187_s12 = smov 0   ;;  %s5189_s2 = smov 0  }
  0x62   :  { %6754 = sst [smem:[#allocation104_spill]] %s5187_s12  ;;  %s5191_s7 = smov 0  }
  0x63   :  { %s5193_s11 = smov 0   ;;  %s5195_s16 = smov 0  }
  0x64   :  { %s5197_s18 = smov 0   ;;  %s5199_s3 = smov 0  }
  0x65   :  { %s5201_s8 = smov 0   ;;  %s5203_s13 = smov 0  }
  0x66   :  { %6755 = sst [smem:[#allocation105_spill]] %s5201_s8  ;;  %s5205_s29 = smov 0  }
  0x67   :  { %6756 = sst [smem:[#allocation106_spill]] %s5205_s29  ;;  %s5207_s25 = smov 0  }
  0x68   :  { %s5209_s17 = smov 0   ;;  %s5211_s9 = smov 0  }
  0x69   :  { %6757 = sst [smem:[#allocation107_spill]] %s5209_s17  ;;  %s5213_s14 = smov 0  }
  0x6a   :  { %s5215_s4 = smov 0   ;;  %s5217_s22 = smov 0  }
  0x6b   :  { %s5219_s10 = smov 0   ;;  %s5221_s20 = smov 0  }
  0x6c   :  { %s5223_s30 = smov 0   ;;  %s5225_s28 = smov 0  }
  0x6d   :  { %6758 = sst [smem:[#allocation108_spill]] %s5223_s30  ;;  %s5227_s15 = smov 0  }
  0x6e LB: > { %s6766_s0 = sld [smem:[#allocation102_spill]]  ;;  %s6767_s1 = sld [smem:[#allocation103_spill]]  ;;  %s4944_s15 = sphi %s5227_s15, %s7051_s15   ;;  %s4940_s28 = sphi %s5225_s28, %s7050_s28   ;;  %s4932_s20 = sphi %s5221_s20, %s7048_s20   ;;  %s4928_s10 = sphi %s5219_s10, %s7047_s10   ;;  %s4924_s22 = sphi %s5217_s22, %s7046_s22   ;;  %s4920_s4 = sphi %s5215_s4, %s7045_s4   ;;  %s4916_s14 = sphi %s5213_s14, %s7029_s14   ;;  %s4912_s9 = sphi %s5211_s9, %s7044_s9   ;;  %s4904_s25 = sphi %s5207_s25, %s7025_s25   ;;  %s4896_s13 = sphi %s5203_s13, %s7023_s13   ;;  %s4888_s3 = sphi %s5199_s3, %s7040_s3   ;;  %s4884_s18 = sphi %s5197_s18, %s7018_s18   ;;  %s4880_s16 = sphi %s5195_s16, %s7038_s16   ;;  %s4876_s11 = sphi %s5193_s11, %s7036_s11   ;;  %s4872_s7 = sphi %s5191_s7, %s7015_s7   ;;  %s4868_s2 = sphi %s5189_s2, %s7014_s2   ;;  %s4860_s19 = sphi %s5185_s19, %s7012_s19   ;;  %s4856_s6 = sphi %s5183_s6, %s7011_s6   ;;  %s4848_s26 = sphi %s5179_s26, %s7009_s26   ;;  %s4844_s24 = sphi %s5177_s24, %s7008_s24   ;;  %s4840_s23 = sphi %s5175_s23, %s7007_s23   ;;  %s4836_s5 = sphi %s5173_s5, %s7006_s5  }
  0x6f   : > { %s6768_s12 = sld [smem:[#allocation104_spill]]  ;;  %s6769_s8 = sld [smem:[#allocation105_spill]] }
  0x70   : > { %6771 = sst [smem:[#allocation103_spill]] %s4836_s5  ;;  %s6772_s29 = sld [smem:[#allocation106_spill]] }
  0x71   : > { %6773 = sst [smem:[#allocation104_spill]] %s4840_s23  ;;  %s6775_s17 = sld [smem:[#allocation107_spill]] }
  0x72   : > { %6774 = sst [smem:[#allocation106_spill]] %s4844_s24  ;;  %s6782_s30 = sld [smem:[#allocation108_spill]] }
  0x73   : > { %6776 = sst [smem:[#allocation107_spill]] %s4848_s26  ;;  %s105_s21 = sadd.s32 1, %s4940_s28 }
  0x74   : > { %6770 = sst [smem:[#allocation102_spill]] %s6766_s0  ;;  %s112_s0 = sadd.s32 1, %s4924_s22 }
  0x75   : > { %6777 = sst [smem:[#allocation105_spill]] %s6767_s1  ;;  %p6624_p7 = scmp.ne.s32.totalorder %s4924_s22, %s4920_s4 }
  0x76   : > { %6778 = sst [smem:[#allocation109_spill]] %s4856_s6  ;;  %p6634_p8 = scmp.eq.s32.totalorder %s4944_s15, 0 }
  0x77   : > { %6779 = sst [smem:[#allocation110_spill]] %s4860_s19  ;;  %p6622_p10 = scmp.ne.s32.totalorder %s4920_s4, %s4916_s14 }
  0x78   : > { %6780 = sst [smem:[#allocation111_spill]] %s6768_s12  ;;  %p5334_p9 = por %p6634_p8, %p6624_p7 }
  0x79   : > { %6781 = sst [smem:[#allocation112_spill]] %s4872_s7  ;;  %s135_s5 = sshra.s32 %s6782_s30, 7 }
  0x7a   : > { %6783 = sst [smem:[#allocation108_spill]] %s4876_s11  ;;  %s140_s23 = sand.u32 127, %s6782_s30 }
  0x7b   : > { %6784 = sst [smem:[#allocation113_spill]] %s4884_s18  ;;  %p161_p1 = scmp.ne.s32.totalorder %s4912_s9, %s6775_s17 }
  0x7c   : > { %6785 = sst [smem:[#allocation114_spill]] %s4888_s3  ;;  %p167_p2 = scmp.ne.s32.totalorder %s6775_s17, %s4904_s25 }
  0x7d   : > { %6786 = sst [smem:[#allocation115_spill]] %s4896_s13  ;;  %p5379_p3 = por %p161_p1, %p6634_p8 }
  0x7e   : > { %6787 = sst [smem:[#allocation116_spill]] %s6772_s29  ;;  %s253_s25 = sadd.s32 1, %s6772_s29 }
  0x7f   : > { %6788 = sst [smem:[#allocation117_spill]] %s6775_s17  ;;  %p402_p7 = scmp.ne.s32.totalorder %s4872_s7, %s4868_s2 }
  0x80   : > { %6789 = sst [smem:[#allocation118_spill]] %s4912_s9  ;;  %s6827_s17 = sld [smem:[#allocation107_spill]] }
  0x81   : > { %6790 = sst [smem:[#allocation119_spill]] %s4916_s14 }
  0x82   : > { %6791 = sst [smem:[#allocation120_spill]] %s4920_s4 }
  0x83   : > { %6792 = sst [smem:[#allocation121_spill]] %s4924_s22 }
  0x84   : > { %6793 = sst [smem:[#allocation122_spill]] %s4928_s10  ;;  %s5317_s10 = sadd.s32 4294967295, %s4944_s15  }
  0x85   : > { %6794 = sst [smem:[#allocation123_spill]] %s4932_s20  ;;  %s102_s20 = sadd.s32 1, %s6782_s30 }
  0x86   : > { %6795 = sst [smem:[#allocation124_spill]] %s6782_s30  ;;  %p103_p6 = scmp.ge.s32.totalorder %s102_s20, 2 }
  0x87   : > { %6796 = sst [smem:[#allocation125_spill]] %s4940_s28  ;;  %p6638_p12 = scmp.eq.s32.totalorder %s5317_s10, 0 }
  0x88   : > { %6797 = sst [smem:[#allocation126_spill]] %s4944_s15  ;;  %s7053_s20 = smov (%p103_p6, %s102_s20), 0 }
  0x89   : > { %6798 = sst [smem:[#allocation127_spill]] %s5317_s10  ;;  %s7055_s21 = smov (!%p103_p6, %s105_s21), %s4940_s28 }
  0x8a   : > { %6799 = sst [smem:[#allocation128_spill]] %s7053_s20  ;;  %p107_p11 = scmp.ge.s32.totalorder %s7055_s21, 2 }
  0x8b   : > { %s6800_s27 = scalar_select %p5334_p9, 1, 0 }
  0x8c   : > { %s7057_s21 = smov (%p107_p11, %s7055_s21), 0  ;;  %p5350_p13 = por %p6638_p12, %p6622_p10 }
  0x8d   : > { %6801 = sst [smem:[#allocation129_spill]] %s6800_s27  ;;  %s137_s27 = sadd.s32 %s4940_s28, %s135_s5 }
  0x8e   : > { %6802 = sst [smem:[#allocation130_spill]] %s7057_s21  ;;  %s5357_s26 = ssub.s32 %s4940_s28, %s7057_s21 }
  0x8f   : > { %s6803_s24 = scalar_select %p5350_p13, 1, 0 }
  0x90   : > { %6805 = sst [smem:[#allocation132_spill]] %s5357_s26  ;;  %s3092_s1 = sshll.u32 %s137_s27, 7 }
  0x91   : > { %6804 = sst [smem:[#allocation131_spill]] %s6803_s24  ;;  %p110_p0 = scmp.eq.s32.totalorder %s5357_s26, 0 }
  0x92   : > { %s5360_s14 = sadd.s32 %s3092_s1, %s140_s23  ;;  %s143_s24 = sshra.s32 %s7053_s20, 7 }
  0x93   : > { %s142_s4 = sld [smem:[#allocation4 + %s5360_s14]]  ;;  %s145_s5 = sadd.s32 %s143_s24, %s7057_s21 }
  0x94   : > { %s5365_s6 = scalar_select %p110_p0, %s4924_s22, %s112_s0  }
  0x95   : > { %s148_s28 = sand.u32 127, %s7053_s20  ;;  %s3093_s19 = sshll.u32 %s145_s5, 7 }
  0x96   : > { %6806 = sst [smem:[#allocation133_spill]] %s5365_s6  ;;  %s154_s27 = sadd.s32 1, %s4912_s9 }
  0x97   : > { %s5370_s26 = sadd.s32 %s3093_s19, %s148_s28  ;;  %s5385_s24 = ssub.s32 %s6782_s30, %s7053_s20 }
  0x98   : > { %s150_s23 = sld [smem:[#allocation4 + %s5370_s26]]  ;;  %p5389_p4 = por %p167_p2, %p6638_p12 }
  0x99   : > { %s6807_s0 = scalar_select %p5379_p3, 1, 0 }
  0x9a   : > { %s6808_s28 = scalar_select %p5389_p4, 1, 0 }
  0x9b   : > { %p251_p5 = scmp.eq.s32.totalorder %s5385_s24, 0  ;;  %p260_p6 = scmp.ne.s32.totalorder %s6772_s29, %s4896_s13 }
  0x9c   : > { %6809 = sst [smem:[#allocation134_spill]] %s6808_s28  ;;  %p266_p0 = scmp.ne.s32.totalorder %s4896_s13, %s6769_s8 }
  0x9d   : > { %s5398_s1 = scalar_select %p251_p5, %s6772_s29, %s253_s25  }
  0x9e   : > { %p5402_p11 = por %p260_p6, %p6634_p8  ;;  %s151_s19 = ssub.s32 %s142_s4, %s150_s23 }
  0x9f   : > { %6810 = sst [smem:[#allocation135_spill]] %s5398_s1  ;;  %p152_p1 = scmp.eq.s32.totalorder %s151_s19, 0 }
  0xa0   : > { %s6811_s6 = scalar_select %p5402_p11, 1, 0 }
  0xa1   : > { %s335_s5 = sld [smem:[#allocation5 + %s5360_s14]]  ;;  %p5411_p2 = por %p266_p0, %p6638_p12 }
  0xa2   : > { %s343_s25 = sld [smem:[#allocation5 + %s5370_s26]]  ;;  %s347_s20 = sadd.s32 1, %s4888_s3 }
  0xa3   : > { %s6812_s21 = scalar_select %p5411_p2, 1, 0 }
  0xa4   : > { %s5418_s12 = scalar_select %p152_p1, %s4912_s9, %s154_s27  }
  0xa5   : > { %6813 = sst [smem:[#allocation136_spill]] %s6812_s21  ;;  %p354_p5 = scmp.ne.s32.totalorder %s4888_s3, %s4884_s18 }
  0xa6   : > { %6814 = sst [smem:[#allocation137_spill]] %s5418_s12  ;;  %p360_p6 = scmp.ne.s32.totalorder %s4884_s18, %s4880_s16 }
  0xa7   : > { %s377_s8 = sld [smem:[#allocation5 + %s5360_s14]]  ;;  %p5428_p0 = por %p354_p5, %p6634_p8 }
  0xa8   : > { %s6815_s4 = sld [smem:[#allocation111_spill]]  ;;  %s6816_s19 = sld [smem:[#allocation110_spill]] }
  0xa9   : > { %s385_s23 = sld [smem:[#allocation5 + %s5370_s26]]  ;;  %p5434_p10 = por %p360_p6, %p6638_p12 }
  0xaa   : > { %s6817_s1 = scalar_select %p5428_p0, 1, 0 }
  0xab   : > { %s6819_s21 = sld [smem:[#allocation109_spill]]  ;;  %s389_s27 = sadd.s32 1, %s4876_s11 }
  0xac   : > { %6818 = sst [smem:[#allocation138_spill]] %s6817_s1  ;;  %p396_p1 = scmp.ne.s32.totalorder %s4876_s11, %s4872_s7 }
  0xad   : > { %s6820_s13 = scalar_select %p5434_p10, 1, 0 }
  0xae   : > { %s344_s16 = ssub.s32 %s335_s5, %s343_s25  ;;  %p5445_p2 = por %p396_p1, %p6634_p8 }
  0xaf   : > { %6821 = sst [smem:[#allocation109_spill]] %s6820_s13  ;;  %p345_p5 = scmp.eq.s32.totalorder %s344_s16, 0 }
  0xb0   : > { %s6822_s12 = scalar_select %p5445_p2, 1, 0 }
  0xb1   : > { %s6824_s18 = sld [smem:[#allocation105_spill]]  ;;  %p5451_p6 = por %p402_p7, %p6638_p12 }
  0xb2   : > { %6823 = sst [smem:[#allocation139_spill]] %s6822_s12  ;;  %s6829_s5 = sld [smem:[#allocation106_spill]] }
  0xb3   : > { %s6825_s28 = scalar_select %p5451_p6, 1, 0 }
  0xb4   : > { %s419_s13 = sld [smem:[#allocation5 + %s5360_s14]]  ;;  %s386_s2 = ssub.s32 %s377_s8, %s385_s23 }
  0xb5   : > { %6826 = sst [smem:[#allocation140_spill]] %s6825_s28  ;;  %p387_p1 = scmp.eq.s32.totalorder %s386_s2, 0 }
  0xb6   : > { %s5457_s1 = scalar_select %p345_p5, %s4888_s3, %s347_s20  }
  0xb7   : > { %s427_s25 = sld [smem:[#allocation5 + %s5370_s26]]  ;;  %s431_s16 = sadd.s32 1, %s6815_s4 }
  0xb8   : > { %6828 = sst [smem:[#allocation141_spill]] %s5457_s1  ;;  %p438_p8 = scmp.ne.s32.totalorder %s6815_s4, %s6816_s19 }
  0xb9   : > { %p444_p7 = scmp.ne.s32.totalorder %s6816_s19, %s6819_s21  ;;  %s6830_s7 = sld [smem:[#allocation120_spill]] }
  0xba   : > { %s5466_s28 = scalar_select %p387_p1, %s4876_s11, %s389_s27  }
  0xbb   : > { %p6832_p12 = scmp.eq.s32.totalorder %s4944_s15, 0  ;;  %p6835_p6 = scmp.eq.s32.totalorder %s5317_s10, 0 }
  0xbc   : > { %6831 = sst [smem:[#allocation106_spill]] %s5466_s28  ;;  %s6838_s23 = sld [smem:[#allocation132_spill]] }
  0xbd   : > { %p5470_p5 = por %p438_p8, %p6832_p12  ;;  %p5476_p10 = por %p444_p7, %p6835_p6 }
  0xbe   : > { %s461_s2 = sld [smem:[#allocation5 + %s5360_s14]]  ;;  %s428_s1 = ssub.s32 %s419_s13, %s427_s25 }
  0xbf   : > { %s6833_s20 = scalar_select %p5470_p5, 1, 0 }
  0xc0   : > { %s6836_s8 = scalar_select %p5476_p10, 1, 0 }
  0xc1   : > { %6834 = sst [smem:[#allocation142_spill]] %s6833_s20  ;;  %s6839_s21 = sld [smem:[#allocation104_spill]] }
  0xc2   : > { %6837 = sst [smem:[#allocation143_spill]] %s6836_s8  ;;  %s6840_s27 = sld [smem:[#allocation119_spill]] }
  0xc3   : > { %s469_s19 = sld [smem:[#allocation5 + %s5370_s26]]  ;;  %s473_s28 = sadd.s32 1, %s6824_s18 }
  0xc4   : > { %p429_p8 = scmp.eq.s32.totalorder %s428_s1, 0  ;;  %s6841_s12 = sld [smem:[#allocation103_spill]] }
  0xc5   : > { %p480_p12 = scmp.ne.s32.totalorder %s6824_s18, %s6827_s17  ;;  %s6842_s20 = sld [smem:[#allocation102_spill]] }
  0xc6   : > { %p486_p6 = scmp.ne.s32.totalorder %s6827_s17, %s6829_s5  ;;  %p829_p1 = scmp.eq.s32.totalorder %s5317_s10, 3 }
  0xc7   : > { %s7059_s4 = smov (!%p429_p8, %s6815_s4), %s431_s16  ;;  %p6844_p7 = scmp.eq.s32.totalorder %s4944_s15, 0 }
  0xc8   : > { %6843 = sst [smem:[#allocation144_spill]] %s7059_s4  ;;  %p6846_p4 = scmp.eq.s32.totalorder %s5317_s10, 0 }
  0xc9   : > { %p5493_p10 = por %p480_p12, %p6844_p7  ;;  %s470_s1 = ssub.s32 %s461_s2, %s469_s19 }
  0xca   : > { %p5499_p13 = por %p486_p6, %p6846_p4  ;;  %p6849_p5 = scmp.ne.s32.totalorder %s4924_s22, %s6830_s7 }
  0xcb   : > { %s6845_s26 = scalar_select %p5493_p10, 1, 0 }
  0xcc   : > { %s6847_s13 = scalar_select %p5499_p13, 1, 0 }
  0xcd   : > { %p5508_p2 = por %p829_p1, %p6849_p5  ;;  %p471_p8 = scmp.eq.s32.totalorder %s470_s1, 0 }
  0xce   : > { %6848 = sst [smem:[#allocation132_spill]] %s6847_s13  ;;  %s6852_s5 = sadd.s32 4294967294, %s4944_s15  }
  0xcf   : > { %s6850_s17 = scalar_select %p5508_p2, 1, 0 }
  0xd0   : > { %p835_p12 = scmp.eq.s32.totalorder %s6852_s5, 3  ;;  %s843_s25 = sor.u32 %s5385_s24, %s6838_s23 }
  0xd1   : > { %6851 = sst [smem:[#allocation145_spill]] %s6850_s17  ;;  %s846_s16 = sadd.s32 1, %s6839_s21 }
  0xd2   : > { %s7061_s18 = smov (!%p471_p8, %s6824_s18), %s473_s28  ;;  %p6854_p4 = scmp.ne.s32.totalorder %s6830_s7, %s6840_s27 }
  0xd3   : > { %6853 = sst [smem:[#allocation146_spill]] %s7061_s18  ;;  %p844_p7 = scmp.eq.s32.totalorder %s843_s25, 0 }
  0xd4   : > { %p5523_p6 = por %p835_p12, %p6854_p4  ;;  %p856_p13 = scmp.ne.s32.totalorder %s6839_s21, %s6841_s12 }
  0xd5   : > { %p862_p10 = scmp.ne.s32.totalorder %s6841_s12, %s6842_s20  ;;  %s7063_s21 = smov (!%p844_p7, %s6839_s21), %s846_s16 }
  0xd6   : > { %s6855_s4 = scalar_select %p5523_p6, 1, 0 }
  0xd7   : > { %6857 = sst [smem:[#allocation148_spill]] %s7063_s21  ;;  %p5536_p5 = por %p856_p13, %p829_p1 }
  0xd8   : > { %6856 = sst [smem:[#allocation147_spill]] %s6855_s4  ;;  %s6860_s24 = sld [smem:[#allocation77_spill]] }
  0xd9   : > { %s6858_s2 = scalar_select %p5536_p5, 1, 0 }
  0xda   : > { %p5540_p2 = por %p862_p10, %p835_p12  ;;  %p3102_p8 = scmp.ge.s32.totalorder %s4944_s15, 1 }
  0xdb   : > { %6859 = sst [smem:[#allocation149_spill]] %s6858_s2  ;;  %p870_p4 = scmp.lt.s32.totalorder %s4944_s15, 5 }
  0xdc   : > { %s6862_s23 = scalar_select %p5540_p2, 1, 0 }
  0xdd   : > { %p5546_p0 = pnand %p3102_p8, %p870_p4  ;;  %s4977_s12 = smov [#allocation12]  }
  0xde   : > { %s6861_s30 = smov %s6860_s24  ;;  %6863 = sst [smem:[#allocation150_spill]] %s6862_s23 }
  0xdf   : > { %s6864_s7 = scalar_select %p5546_p0, 1, 0 }
  0xe0   : > { %s882_s28 = sshll.u32 %s4977_s12, 4  ;;  %p3436_p13 = pneg %p5546_p0  ;;  %s5550_s28 = int_to_ptr.vmem [resolvable:$true] %s882_s28 }
  0xe1   : > { %6865 = sst [smem:[#allocation151_spill]] %s6864_s7  ;;  %p6866_p1 = scmp.eq.s32.totalorder %s5317_s10, 0 }
  0xe2   : > { %s4978_s19 = smov [#allocation29]   ;;  %s4979_s1 = smov [#allocation32]  }
  0xe3   : > { %p5556_p10 = pnand %p3436_p13, %p6866_p1  ;;  %s918_s27 = sshll.u32 %s4978_s19, 4  ;;  %s5560_s27 = int_to_ptr.vmem [resolvable:$true] %s918_s27 }
  0xe4   : > { %s942_s5 = sshll.u32 %s4979_s1, 4  ;;  %s3828_s25 = scalar_lea.hbm %s6860_s24, 128  ;;  %s5562_s5 = int_to_ptr.vmem [resolvable:$true] %s942_s5 }
  0xe5   : > { %p3829_p12 = scmp.ne.s32.totalorder %s6861_s30, %s3828_s25  ;;  %p5568_p7 = pneg %p5556_p10 }
  0xe6   : > { %p3835_p13 = scmp.lt.u32.totalorder %s3828_s25, %s6861_s30 }
  0xe7   : > { %p3831_p8 = pnand %p5568_p7, %p3829_p12 }
  0xe9   : > { %p3832_p4 = pneg %p3831_p8 }
  0xeb   : > { %p3837_p1 = pnand %p3835_p13, %p3832_p4 }
  0xed   : > { %3840 = shalt.err (!%p3837_p1)
}
  0xee   : > { %s3841_s12 = scalar_lea.vmem %s5550_s28, 128  ;;  %p3849_p0 = scmp.lt.s32.totalorder %s5550_s28, %s5550_s28 }
  0xef   : > { %p3842_p2 = scmp.ne.s32.totalorder %s5550_s28, %s3841_s12  ;;  %p3850_p11 = scmp.lt.s32.totalorder %s3841_s12, %s3841_s12 }
  0xf1   : > { %p3844_p6 = pnand %p3842_p2, %p5568_p7  ;;  %p3851_p3 = por %p3850_p11, %p3849_p0 }
  0xf3   : > { %p3845_p5 = pneg %p3844_p6 }
  0xf5   : > { %p3852_p9 = pnand %p3851_p3, %p3845_p5 }
  0xf7   : > { %3855 = shalt.err (!%p3852_p9)
}
  0xf8   : > { %s6663_s24 = smov 64   ;;  %s6869_s19 = sld [smem:[#allocation93_spill]] }
  0xf9   : > { %s6661_s1 = smov 4  }
  0xfa   : > { %3439 = dma.hbm_to_vmem [thread:$0]  (!%p5556_p10), %s6861_s30, 128, %s5550_s28, [#allocation13], %s6663_s24, %s6663_s24, %s6661_s1  }
  0xfe   : > { %s6870_s21 = smov %s6869_s19  ;;  %s3856_s25 = scalar_lea.hbm %s6869_s19, 16 }
  0xff   : > { %p3857_p2 = scmp.ne.s32.totalorder %s6870_s21, %s3856_s25  ;;  %p3863_p9 = scmp.lt.u32.totalorder %s3856_s25, %s6870_s21 }
 0x101   : > { %p3859_p11 = pnand %p3857_p2, %p5568_p7 }
 0x103   : > { %p3860_p3 = pneg %p3859_p11 }
 0x105   : > { %p3865_p0 = pnand %p3863_p9, %p3860_p3 }
 0x107   : > { %3868 = shalt.err (!%p3865_p0)
}
 0x108   : > { %s3869_s12 = scalar_lea.vmem %s5560_s27, 16  ;;  %s3876_s18 = scalar_lea.vmem %s5560_s27, 32 }
 0x109   : > { %p3870_p6 = scmp.ne.s32.totalorder %s5560_s27, %s3869_s12  ;;  %p3877_p8 = scmp.lt.s32.totalorder %s5560_s27, %s5560_s27 }
 0x10a   : > { %p3878_p4 = scmp.lt.s32.totalorder %s3876_s18, %s3869_s12 }
 0x10b   : > { %p3872_p5 = pnand %p3870_p6, %p5568_p7 }
 0x10c   : > { %p3879_p13 = por %p3878_p4, %p3877_p8 }
 0x10d   : > { %p3873_p12 = pneg %p3872_p5 }
 0x10f   : > { %p3880_p1 = pnand %p3879_p13, %p3873_p12 }
 0x111   : > { %3883 = shalt.err (!%p3880_p1)
}
 0x112   : > { %s6871_s28 = sld [smem:[#allocation95_spill]] }
 0x113   : > { %3448 = dma.hbm_to_vmem [thread:$0]  (!%p5556_p10), %s6870_s21, 16, %s5560_s27, [#allocation30]  }
 0x118   : > { %s6872_s1 = smov %s6871_s28  ;;  %s3884_s19 = scalar_lea.hbm %s6871_s28, 16 }
 0x119   : > { %p3885_p2 = scmp.ne.s32.totalorder %s6872_s1, %s3884_s19  ;;  %p3891_p9 = scmp.lt.u32.totalorder %s3884_s19, %s6872_s1 }
 0x11b   : > { %p3887_p11 = pnand %p3885_p2, %p5568_p7 }
 0x11d   : > { %p3888_p3 = pneg %p3887_p11 }
 0x11f   : > { %p3893_p0 = pnand %p3891_p9, %p3888_p3 }
 0x121   : > { %3896 = shalt.err (!%p3893_p0)
}
 0x122   : > { %s3897_s18 = scalar_lea.vmem %s5562_s5, 16  ;;  %s3904_s25 = scalar_lea.vmem %s5562_s5, 32 }
 0x123   : > { %p3898_p6 = scmp.ne.s32.totalorder %s5562_s5, %s3897_s18  ;;  %p3905_p8 = scmp.lt.s32.totalorder %s5562_s5, %s5562_s5 }
 0x124   : > { %p3906_p4 = scmp.lt.s32.totalorder %s3904_s25, %s3897_s18 }
 0x125   : > { %p3900_p5 = pnand %p3898_p6, %p5568_p7 }
 0x126   : > { %p3907_p13 = por %p3906_p4, %p3905_p8 }
 0x127   : > { %p3901_p12 = pneg %p3900_p5 }
 0x129   : > { %p3908_p1 = pnand %p3907_p13, %p3901_p12 }
 0x12b   : > { %3911 = shalt.err (!%p3908_p1)
}
 0x12c   : > { %s6873_s27 = sld [smem:[#allocation97_spill]]  ;;  %s4982_s12 = smov [#allocation35]  }
 0x12d   : > { %3454 = dma.hbm_to_vmem [thread:$0]  (!%p5556_p10), %s6872_s1, 16, %s5562_s5, [#allocation33]  }
 0x12e   : > { %s966_s28 = sshll.u32 %s4982_s12, 4  ;;  %s4983_s19 = smov [#allocation27]   ;;  %s967_s28 = int_to_ptr.vmem [resolvable:$true] %s966_s28 }
 0x12f   : > { %s896_s24 = sshll.u32 %s4983_s19, 4  ;;  %s5620_s24 = int_to_ptr.vmem [resolvable:$true] %s896_s24 }
 0x132   : > { %s3912_s18 = scalar_lea.hbm %s6873_s27, 16 }
 0x133   : > { %p3913_p2 = scmp.ne.s32.totalorder %s6873_s27, %s3912_s18  ;;  %p3919_p9 = scmp.lt.u32.totalorder %s3912_s18, %s6873_s27 }
 0x135   : > { %p3915_p11 = pnand %p3913_p2, %p5568_p7 }
 0x137   : > { %p3916_p3 = pneg %p3915_p11 }
 0x139   : > { %p3921_p0 = pnand %p3919_p9, %p3916_p3 }
 0x13b   : > { %3924 = shalt.err (!%p3921_p0)
}
 0x13c   : > { %s3925_s25 = scalar_lea.vmem %s967_s28, 16  ;;  %s3932_s5 = scalar_lea.vmem %s967_s28, 32 }
 0x13d   : > { %p3926_p6 = scmp.ne.s32.totalorder %s967_s28, %s3925_s25  ;;  %p3933_p8 = scmp.lt.s32.totalorder %s967_s28, %s967_s28 }
 0x13e   : > { %p3934_p4 = scmp.lt.s32.totalorder %s3932_s5, %s3925_s25 }
 0x13f   : > { %p3928_p5 = pnand %p3926_p6, %p5568_p7 }
 0x140   : > { %p3935_p13 = por %p3934_p4, %p3933_p8 }
 0x141   : > { %p3929_p12 = pneg %p3928_p5 }
 0x143   : > { %p3936_p1 = pnand %p3935_p13, %p3929_p12 }
 0x145   : > { %3939 = shalt.err (!%p3936_p1)
}
 0x146   : > { %s6874_s12 = sld [smem:[#allocation91_spill]] }
 0x147   : > { %3460 = dma.hbm_to_vmem [thread:$0]  (!%p5556_p10), %s6873_s27, 16, %s967_s28, [#allocation36]  }
 0x14c   : > { %s6875_s1 = smov %s6874_s12  ;;  %s3940_s19 = scalar_lea.hbm %s6874_s12, 16 }
 0x14d   : > { %p3941_p2 = scmp.ne.s32.totalorder %s6875_s1, %s3940_s19  ;;  %p3947_p9 = scmp.lt.u32.totalorder %s3940_s19, %s6875_s1 }
 0x14f   : > { %p3943_p11 = pnand %p3941_p2, %p5568_p7 }
 0x151   : > { %p3944_p3 = pneg %p3943_p11 }
 0x153   : > { %p3949_p0 = pnand %p3947_p9, %p3944_p3 }
 0x155   : > { %3952 = shalt.err (!%p3949_p0)
}
 0x156   : > { %s3953_s18 = scalar_lea.vmem %s5620_s24, 16  ;;  %s3960_s25 = scalar_lea.vmem %s5620_s24, 32 }
 0x157   : > { %p3954_p6 = scmp.ne.s32.totalorder %s5620_s24, %s3953_s18  ;;  %p3961_p8 = scmp.lt.s32.totalorder %s5620_s24, %s5620_s24 }
 0x158   : > { %p3962_p4 = scmp.lt.s32.totalorder %s3960_s25, %s3953_s18 }
 0x159   : > { %p3956_p5 = pnand %p3954_p6, %p5568_p7 }
 0x15a   : > { %p3963_p13 = por %p3962_p4, %p3961_p8 }
 0x15b   : > { %p3957_p12 = pneg %p3956_p5 }
 0x15d   : > { %p3964_p1 = pnand %p3963_p13, %p3957_p12 }
 0x15f   : > { %3967 = shalt.err (!%p3964_p1)
}
 0x160   : > { %s6876_s28 = sld [smem:[#allocation92_spill]]  ;;  %s4984_s5 = smov [#allocation28]  }
 0x161   : > { %3442 = dma.hbm_to_vmem [thread:$0]  (!%p5556_p10), %s6875_s1, 16, %s5620_s24, [#allocation10]  }
 0x162   : > { %s907_s12 = sshll.u32 %s4984_s5, 4  ;;  %s4985_s19 = smov [#allocation31]   ;;  %s908_s12 = int_to_ptr.vmem [resolvable:$true] %s907_s12 }
 0x163   : > { %s928_s27 = sshll.u32 %s4985_s19, 4  ;;  %s5648_s27 = int_to_ptr.vmem [resolvable:$true] %s928_s27 }
 0x166   : > { %s6877_s21 = smov %s6876_s28  ;;  %s3968_s18 = scalar_lea.hbm %s6876_s28, 16 }
 0x167   : > { %p3969_p2 = scmp.ne.s32.totalorder %s6877_s21, %s3968_s18  ;;  %p3975_p9 = scmp.lt.u32.totalorder %s3968_s18, %s6877_s21 }
 0x169   : > { %p3971_p11 = pnand %p3969_p2, %p5568_p7 }
 0x16b   : > { %p3972_p3 = pneg %p3971_p11 }
 0x16d   : > { %p3977_p0 = pnand %p3975_p9, %p3972_p3 }
 0x16f   : > { %3980 = shalt.err (!%p3977_p0)
}
 0x170   : > { %s3981_s25 = scalar_lea.vmem %s908_s12, 16  ;;  %s3988_s24 = scalar_lea.vmem %s908_s12, 32 }
 0x171   : > { %p3982_p6 = scmp.ne.s32.totalorder %s908_s12, %s3981_s25  ;;  %p3989_p8 = scmp.lt.s32.totalorder %s908_s12, %s908_s12 }
 0x172   : > { %p3990_p4 = scmp.lt.s32.totalorder %s3988_s24, %s3981_s25 }
 0x173   : > { %p3984_p5 = pnand %p3982_p6, %p5568_p7 }
 0x174   : > { %p3991_p13 = por %p3990_p4, %p3989_p8 }
 0x175   : > { %p3985_p12 = pneg %p3984_p5 }
 0x177   : > { %p3992_p1 = pnand %p3991_p13, %p3985_p12 }
 0x179   : > { %3995 = shalt.err (!%p3992_p1)
}
 0x17a   : > { %s6878_s28 = sld [smem:[#allocation94_spill]] }
 0x17b   : > { %3445 = dma.hbm_to_vmem [thread:$0]  (!%p5556_p10), %s6877_s21, 16, %s908_s12, [#allocation13]  }
 0x180   : > { %s6879_s1 = smov %s6878_s28  ;;  %s3996_s5 = scalar_lea.hbm %s6878_s28, 256 }
 0x181   : > { %p3997_p2 = scmp.ne.s32.totalorder %s6879_s1, %s3996_s5  ;;  %p4003_p9 = scmp.lt.u32.totalorder %s3996_s5, %s6879_s1 }
 0x183   : > { %p3999_p11 = pnand %p3997_p2, %p5568_p7 }
 0x185   : > { %p4000_p3 = pneg %p3999_p11 }
 0x187   : > { %p4005_p0 = pnand %p4003_p9, %p4000_p3 }
 0x189   : > { %4008 = shalt.err (!%p4005_p0)
}
 0x18a   : > { %s4009_s19 = scalar_lea.vmem %s5648_s27, 256  ;;  %p4017_p8 = scmp.lt.s32.totalorder %s5648_s27, %s5648_s27 }
 0x18b   : > { %p4010_p6 = scmp.ne.s32.totalorder %s5648_s27, %s4009_s19  ;;  %p4018_p4 = scmp.lt.s32.totalorder %s4009_s19, %s4009_s19 }
 0x18d   : > { %p4012_p5 = pnand %p4010_p6, %p5568_p7  ;;  %p4019_p13 = por %p4018_p4, %p4017_p8 }
 0x18f   : > { %p4013_p12 = pneg %p4012_p5 }
 0x191   : > { %p4020_p1 = pnand %p4019_p13, %p4013_p12 }
 0x193   : > { %4023 = shalt.err (!%p4020_p1)
}
 0x194   : > { %s6880_s12 = smov 4   ;;  %s6881_s18 = smov 64  }
 0x195   : > { %s6882_s25 = sld [smem:[#allocation96_spill]]  ;;  %s4986_s24 = smov [#allocation34]  }
 0x196   : > { %3451 = dma.hbm_to_vmem [thread:$0]  (!%p5556_p10), %s6879_s1, 256, %s5648_s27, [#allocation30], %s6881_s18, %s6881_s18, %s6880_s12  }
 0x197   : > { %s952_s28 = sshll.u32 %s4986_s24, 4  ;;  %s4987_s5 = smov [#allocation37]   ;;  %s953_s28 = int_to_ptr.vmem [resolvable:$true] %s952_s28 }
 0x198   : > { %s977_s30 = sshll.u32 %s4987_s5, 4  ;;  %s5678_s30 = int_to_ptr.vmem [resolvable:$true] %s977_s30 }
 0x19b   : > { %s6883_s21 = smov %s6882_s25  ;;  %s4024_s19 = scalar_lea.hbm %s6882_s25, 512 }
 0x19c   : > { %p4025_p2 = scmp.ne.s32.totalorder %s6883_s21, %s4024_s19  ;;  %p4031_p9 = scmp.lt.u32.totalorder %s4024_s19, %s6883_s21 }
 0x19e   : > { %p4027_p11 = pnand %p4025_p2, %p5568_p7 }
 0x1a0   : > { %p4028_p3 = pneg %p4027_p11 }
 0x1a2   : > { %p4033_p0 = pnand %p4031_p9, %p4028_p3 }
 0x1a4   : > { %4036 = shalt.err (!%p4033_p0)
}
 0x1a5   : > { %s4037_s23 = scalar_lea.vmem %s953_s28, 512  ;;  %p4045_p8 = scmp.lt.s32.totalorder %s953_s28, %s953_s28 }
 0x1a6   : > { %p4038_p6 = scmp.ne.s32.totalorder %s953_s28, %s4037_s23  ;;  %p4046_p4 = scmp.lt.s32.totalorder %s4037_s23, %s4037_s23 }
 0x1a8   : > { %p4040_p5 = pnand %p4038_p6, %p5568_p7  ;;  %p4047_p13 = por %p4046_p4, %p4045_p8 }
 0x1aa   : > { %p4041_p12 = pneg %p4040_p5 }
 0x1ac   : > { %p4048_p1 = pnand %p4047_p13, %p4041_p12 }
 0x1ae   : > { %4051 = shalt.err (!%p4048_p1)
}
 0x1af   : > { %s6884_s27 = sld [smem:[#allocation98_spill]] }
 0x1b0   : > { %3457 = dma.hbm_to_vmem [thread:$0]  (!%p5556_p10), %s6883_s21, 512, %s953_s28, [#allocation33], %s6881_s18, %s6881_s18, %s6880_s12  }
 0x1b5   : > { %s4052_s25 = scalar_lea.hbm %s6884_s27, 16 }
 0x1b6   : > { %p4053_p2 = scmp.ne.s32.totalorder %s6884_s27, %s4052_s25  ;;  %p4059_p9 = scmp.lt.u32.totalorder %s4052_s25, %s6884_s27 }
 0x1b8   : > { %p4055_p11 = pnand %p4053_p2, %p5568_p7 }
 0x1ba   : > { %p4056_p3 = pneg %p4055_p11 }
 0x1bc   : > { %p4061_p0 = pnand %p4059_p9, %p4056_p3 }
 0x1be   : > { %4064 = shalt.err (!%p4061_p0)
}
 0x1bf   : > { %s4065_s23 = scalar_lea.vmem %s5678_s30, 16  ;;  %s4072_s24 = scalar_lea.vmem %s5678_s30, 32 }
 0x1c0   : > { %p4066_p6 = scmp.ne.s32.totalorder %s5678_s30, %s4065_s23  ;;  %p4073_p8 = scmp.lt.s32.totalorder %s5678_s30, %s5678_s30 }
 0x1c1   : > { %p4074_p4 = scmp.lt.s32.totalorder %s4072_s24, %s4065_s23 }
 0x1c2   : > { %p4068_p5 = pnand %p4066_p6, %p5568_p7 }
 0x1c3   : > { %p4075_p13 = por %p4074_p4, %p4073_p8 }
 0x1c4   : > { %p4069_p12 = pneg %p4068_p5 }
 0x1c6   : > { %p4076_p1 = pnand %p4075_p13, %p4069_p12 }
 0x1c8   : > { %4079 = shalt.err (!%p4076_p1)
}
 0x1c9   : > { %s6885_s12 = sld [smem:[#allocation99_spill]]  ;;  %s4988_s18 = smov [#allocation38]  }
 0x1ca   : > { %3463 = dma.hbm_to_vmem [thread:$0]  (!%p5556_p10), %s6884_s27, 16, %s5678_s30, [#allocation36]  }
 0x1cb   : > { %s988_s28 = sshll.u32 %s4988_s18, 4  ;;  %s989_s28 = int_to_ptr.vmem [resolvable:$true] %s988_s28 }
 0x1cf   : > { %s6886_s1 = smov %s6885_s12  ;;  %s4080_s5 = scalar_lea.hbm %s6885_s12, 16 }
 0x1d0   : > { %p4081_p2 = scmp.ne.s32.totalorder %s6886_s1, %s4080_s5  ;;  %p4087_p9 = scmp.lt.u32.totalorder %s4080_s5, %s6886_s1 }
 0x1d2   : > { %p4083_p11 = pnand %p4081_p2, %p5568_p7 }
 0x1d4   : > { %p4084_p3 = pneg %p4083_p11 }
 0x1d6   : > { %p4089_p0 = pnand %p4087_p9, %p4084_p3 }
 0x1d8   : > { %4092 = shalt.err (!%p4089_p0)
}
 0x1d9   : > { %s4093_s19 = scalar_lea.vmem %s989_s28, 16  ;;  %s4100_s25 = scalar_lea.vmem %s989_s28, 32 }
 0x1da   : > { %p4094_p6 = scmp.ne.s32.totalorder %s989_s28, %s4093_s19  ;;  %p4101_p8 = scmp.lt.s32.totalorder %s989_s28, %s989_s28 }
 0x1db   : > { %p4102_p4 = scmp.lt.s32.totalorder %s4100_s25, %s4093_s19 }
 0x1dc   : > { %p4096_p5 = pnand %p4094_p6, %p5568_p7 }
 0x1dd   : > { %p4103_p13 = por %p4102_p4, %p4101_p8 }
 0x1de   : > { %p4097_p12 = pneg %p4096_p5 }
 0x1e0   : > { %p4104_p1 = pnand %p4103_p13, %p4097_p12 }
 0x1e2   : > { %4107 = shalt.err (!%p4104_p1)
}
 0x1e3   : > { %3466 = dma.hbm_to_vmem [thread:$0]  (!%p5556_p10), %s6886_s1, 16, %s989_s28, [#allocation39]  }
 0x1e4   : > { %p3113_p2 = scmp.ge.s32.totalorder %s4944_s15, 4 }
 0x1e5   : > { %s6887_s30 = sld [smem:[#allocation125_spill]] (!%p3113_p2)  ;;  %s6888_s23 = sld [smem:[#allocation74_spill]] (!%p3113_p2) }
 0x1e6   : > { %995 = sbr.rel (%p3113_p2) target bundleno = 930 (0x3a2), region = 56  ;;  %s6890_s16 = sld [smem:[#allocation129_spill]] (!%p3113_p2) }
 0x1e7   : > { %s6675_s24 = sand.u32 (!%p3113_p2), 1, %s4944_s15   ;;  %s1001_s12 = sand.u32 (!%p3113_p2), 1, %s4924_s22  }
 0x1e8   : > { %s5722_s18 = sshll.u32 (!%p3113_p2), %s1001_s12, 3  ;;  %s5734_s25 = scalar_lea.sflag (!%p3113_p2), [#allocation7], %s6675_s24 }
 0x1e9   : > { %s1003_s28 = scalar_lea.vmem (!%p3113_p2), [#allocation6], %s5722_s18 }
 0x1ea   : > { %s1010_s19 = sshll.u32 (!%p3113_p2), %s1003_s28, 4  ;;  %s1011_s19 = int_to_ptr.vmem [resolvable:$true] %s1010_s19 }
 0x1eb   : > { %s6889_s21 = smov (!%p3113_p2), %s6888_s23  ;;  %s5725_s5 = sshll.u32 (!%p3113_p2), %s6887_s30, 7 }
 0x1ec   : > { %s5729_s20 = scalar_lea.hbm (!%p3113_p2), %s6888_s23, %s5725_s5  ;;  %p6891_p7 = scmp.ne.s32.totalorder (!%p3113_p2), %s6890_s16, 0 }
 0x1ed   : > { %s4108_s1 = scalar_lea.hbm %s5729_s20, 128  ;;  %s4112_s30 = scalar_lea.hbm %s6889_s21, 256 }
 0x1ee   : > { %p4109_p10 = scmp.ne.s32.totalorder %s5729_s20, %s4108_s1  ;;  %p4113_p9 = scmp.lt.u32.totalorder %s5729_s20, %s6889_s21 }
 0x1ef   : > { %p4114_p0 = scmp.lt.u32.totalorder %s4112_s30, %s4108_s1  ;;  %p4116_p5 = scmp.lt.u32.totalorder %s4108_s1, %s5729_s20 }
 0x1f0   : > { %p4110_p11 = pnand %p4109_p10, %p6891_p7 }
 0x1f1   : > { %p4115_p6 = por %p4114_p0, %p4113_p9 }
 0x1f2   : > { %p4111_p3 = pneg %p4110_p11 }
 0x1f3   : > { %p4117_p12 = por %p4116_p5, %p4115_p6 }
 0x1f5   : > { %p4118_p8 = pnand %p4117_p12, %p4111_p3 }
 0x1f7   : > { %4121 = shalt.err (!%p4118_p8)
}
 0x1f8   : > { %s4122_s23 = scalar_lea.vmem %s1011_s19, 128  ;;  %s4989_s12 = smov [#allocation6]  }
 0x1f9   : > { %p4123_p4 = scmp.ne.s32.totalorder %s1011_s19, %s4122_s23  ;;  %s4126_s28 = sshll.u32 %s4989_s12, 4  ;;  %s4127_s28 = int_to_ptr.vmem [resolvable:$false] %s4126_s28 }
 0x1fa   : > { %s4128_s24 = scalar_lea.vmem %s4127_s28, 256  ;;  %p4129_p2 = scmp.lt.s32.totalorder %s1011_s19, %s4127_s28 }
 0x1fb   : > { %p4124_p13 = pnand %p4123_p4, %p6891_p7  ;;  %p4130_p10 = scmp.lt.s32.totalorder %s4128_s24, %s4122_s23 }
 0x1fd   : > { %p4125_p1 = pneg %p4124_p13  ;;  %p4131_p11 = por %p4130_p10, %p4129_p2 }
 0x1ff   : > { %p4132_p0 = pnand %p4131_p11, %p4125_p1 }
 0x201   : > { %4135 = shalt.err (!%p4132_p0)
}
 0x202   : > { %s6892_s1 = sld [smem:[#allocation76_spill]]  ;;  %s6893_s30 = sld [smem:[#allocation78_spill]] }
 0x203   : > { %3370 = dma.hbm_to_vmem [thread:$0]  (%p6891_p7), %s5729_s20, 128, %s1011_s19, %s5734_s25  }
 0x204   : > { %s1047_s23 = scalar_lea.vmem [#allocation11], %s5722_s18  ;;  %s1019_s28 = sand.u32 1, %s4912_s9  }
 0x205   : > { %s1054_s12 = sshll.u32 %s1047_s23, 4  ;;  %s3116_s21 = sshll.u32 %s1019_s28, 3  ;;  %s5755_s12 = int_to_ptr.vmem [resolvable:$true] %s1054_s12 }
 0x206   : > { %p6894_p3 = scmp.ne.s32.totalorder %s6807_s0, 0  ;;  %s1021_s4 = scalar_lea.vmem [#allocation9], %s3116_s21 }
 0x207   : > { %s1036_s2 = sshll.u32 %s1021_s4, 4  ;;  %s1068_s19 = scalar_lea.vmem [#allocation14], %s5722_s18  ;;  %s5769_s2 = int_to_ptr.vmem [resolvable:$true] %s1036_s2 }
 0x208   : > { %s5752_s24 = scalar_lea.hbm %s6892_s1, %s5725_s5  ;;  %s5765_s17 = scalar_lea.hbm %s6893_s30, %s5725_s5 }
 0x209   : > { %s3371_s27 = scalar_select %p6894_p3, [#allocation4], [#allocation43] }
 0x20a   : > { %s3372_s22 = scalar_select %p6894_p3, %s5360_s14, 0 }
 0x20b   : > { %s1075_s23 = sshll.u32 %s1068_s19, 4  ;;  %s5773_s28 = sand.u32 1, %s6772_s29   ;;  %s1076_s23 = int_to_ptr.vmem [resolvable:$true] %s1075_s23 }
 0x20c   : > { %s5767_s20 = sld [smem:[%s3371_s27 + %s3372_s22]]  ;;  %s5776_s9 = sshll.u32 %s5773_s28, 4 }
 0x20d   : > { %s4136_s21 = scalar_lea.hbm %s5765_s17, 128  ;;  %s4140_s4 = scalar_lea.hbm %s6893_s30, 256 }
 0x20e   : > { %p4137_p9 = scmp.ne.s32.totalorder %s5765_s17, %s4136_s21  ;;  %p4141_p12 = scmp.lt.u32.totalorder %s5765_s17, %s6893_s30 }
 0x20f   : > { %p4142_p8 = scmp.lt.u32.totalorder %s4140_s4, %s4136_s21  ;;  %p4144_p13 = scmp.lt.u32.totalorder %s4136_s21, %s5765_s17 }
 0x210   : > { %p4138_p6 = pnand %p4137_p9, %p6891_p7 }
 0x211   : > { %p4143_p4 = por %p4142_p8, %p4141_p12 }
 0x212   : > { %p4139_p5 = pneg %p4138_p6 }
 0x213   : > { %p4145_p1 = por %p4144_p13, %p4143_p4 }
 0x215   : > { %p4146_p2 = pnand %p4145_p1, %p4139_p5 }
 0x217   : > { %4149 = shalt.err (!%p4146_p2)
}
 0x218   : > { %s4150_s22 = scalar_lea.vmem %s1076_s23, 128  ;;  %s4990_s27 = smov [#allocation14]  }
 0x219   : > { %p4151_p10 = scmp.ne.s32.totalorder %s1076_s23, %s4150_s22  ;;  %s4154_s18 = sshll.u32 %s4990_s27, 4  ;;  %s4155_s18 = int_to_ptr.vmem [resolvable:$false] %s4154_s18 }
 0x21a   : > { %s4156_s5 = scalar_lea.vmem %s4155_s18, 256  ;;  %p4157_p9 = scmp.lt.s32.totalorder %s1076_s23, %s4155_s18 }
 0x21b   : > { %p4152_p11 = pnand %p4151_p10, %p6891_p7  ;;  %p4158_p6 = scmp.lt.s32.totalorder %s4156_s5, %s4150_s22 }
 0x21d   : > { %p4153_p0 = pneg %p4152_p11  ;;  %p4159_p3 = por %p4158_p6, %p4157_p9 }
 0x21f   : > { %p4160_p8 = pnand %p4159_p3, %p4153_p0 }
 0x221   : > { %4163 = shalt.err (!%p4160_p8)
}
 0x222   : > { %s6895_s19 = sld [smem:[#allocation124_spill]]  ;;  %s6896_s21 = sld [smem:[#allocation79_spill]] }
 0x223   : > { %s6897_s4 = sld [smem:[#allocation75_spill]]  ;;  %s1086_s18 = scalar_lea.vmem [#allocation15], %s5776_s9 }
 0x224   : > { %3375 = dma.hbm_to_vmem [thread:$0]  (%p6891_p7), %s5765_s17, 128, %s1076_s23, %s5734_s25  }
 0x225   : > { %s1093_s5 = sshll.u32 %s1086_s18, 4  ;;  %s3118_s29 = sshll.u32 %s5767_s20, 7  ;;  %s5801_s5 = int_to_ptr.vmem [resolvable:$true] %s1093_s5 }
 0x226   : > { %s6899_s8 = sand.u32 1, %s4944_s15   ;;  %p6900_p5 = scmp.ne.s32.totalorder %s6807_s0, 0 }
 0x227   : > { %s5806_s10 = scalar_lea.sflag [#allocation10], %s6899_s8 }
 0x228   : > { %s5793_s27 = sshll.u32 %s6895_s19, 8 }
 0x229   : > { %s6898_s30 = smov %s6897_s4  ;;  %s5797_s22 = scalar_lea.hbm %s6896_s21, %s5793_s27 }
 0x22a   : > { %s1034_s13 = scalar_lea.hbm %s6897_s4, %s3118_s29  ;;  %s4168_s17 = scalar_lea.hbm %s6898_s30, 256 }
 0x22b   : > { %s4164_s7 = scalar_lea.hbm %s1034_s13, 128  ;;  %p4169_p13 = scmp.lt.u32.totalorder %s1034_s13, %s6898_s30 }
 0x22c   : > { %p4165_p3 = scmp.ne.s32.totalorder %s1034_s13, %s4164_s7  ;;  %p4170_p1 = scmp.lt.u32.totalorder %s4168_s17, %s4164_s7 }
 0x22d   : > { %p4172_p10 = scmp.lt.u32.totalorder %s4164_s7, %s1034_s13 }
 0x22e   : > { %p4166_p12 = pnand %p4165_p3, %p6900_p5  ;;  %p4171_p2 = por %p4170_p1, %p4169_p13 }
 0x230   : > { %p4167_p4 = pneg %p4166_p12  ;;  %p4173_p11 = por %p4172_p10, %p4171_p2 }
 0x232   : > { %p4174_p0 = pnand %p4173_p11, %p4167_p4 }
 0x234   : > { %4177 = shalt.err (!%p4174_p0)
}
 0x235   : > { %s4178_s29 = scalar_lea.vmem %s5769_s2, 128  ;;  %s4991_s8 = smov [#allocation9]  }
 0x236   : > { %p4179_p9 = scmp.ne.s32.totalorder %s5769_s2, %s4178_s29  ;;  %s4182_s20 = sshll.u32 %s4991_s8, 4  ;;  %s4183_s20 = int_to_ptr.vmem [resolvable:$false] %s4182_s20 }
 0x237   : > { %s4184_s23 = scalar_lea.vmem %s4183_s20, 256  ;;  %p4185_p3 = scmp.lt.s32.totalorder %s5769_s2, %s4183_s20 }
 0x238   : > { %p4180_p6 = pnand %p4179_p9, %p6900_p5  ;;  %p4186_p12 = scmp.lt.s32.totalorder %s4184_s23, %s4178_s29 }
 0x23a   : > { %p4181_p8 = pneg %p4180_p6  ;;  %p4187_p13 = por %p4186_p12, %p4185_p3 }
 0x23c   : > { %p4188_p1 = pnand %p4187_p13, %p4181_p8 }
 0x23e   : > { %4191 = shalt.err (!%p4188_p1)
}
 0x23f   : > { %3373 = dma.hbm_to_vmem [thread:$0]  (%p6900_p5), %s1034_s13, 128, %s5769_s2, %s5806_s10  }
 0x240   : > { %s4192_s7 = scalar_lea.hbm %s5752_s24, 128  ;;  %s4196_s4 = scalar_lea.hbm %s6892_s1, 256 }
 0x241   : > { %p4193_p4 = scmp.ne.s32.totalorder %s5752_s24, %s4192_s7  ;;  %p4197_p11 = scmp.lt.u32.totalorder %s5752_s24, %s6892_s1 }
 0x242   : > { %p4198_p0 = scmp.lt.u32.totalorder %s4196_s4, %s4192_s7  ;;  %p4200_p6 = scmp.lt.u32.totalorder %s4192_s7, %s5752_s24 }
 0x243   : > { %p4194_p2 = pnand %p4193_p4, %p6891_p7 }
 0x244   : > { %p4199_p9 = por %p4198_p0, %p4197_p11 }
 0x245   : > { %p4195_p10 = pneg %p4194_p2 }
 0x246   : > { %p4201_p8 = por %p4200_p6, %p4199_p9 }
 0x248   : > { %p4202_p3 = pnand %p4201_p8, %p4195_p10 }
 0x24a   : > { %4205 = shalt.err (!%p4202_p3)
}
 0x24b   : > { %s4206_s0 = scalar_lea.vmem %s5755_s12, 128  ;;  %s4992_s13 = smov [#allocation11]  }
 0x24c   : > { %p4207_p12 = scmp.ne.s32.totalorder %s5755_s12, %s4206_s0  ;;  %s4210_s2 = sshll.u32 %s4992_s13, 4  ;;  %s4211_s2 = int_to_ptr.vmem [resolvable:$false] %s4210_s2 }
 0x24d   : > { %s4212_s18 = scalar_lea.vmem %s4211_s2, 256  ;;  %p4213_p1 = scmp.lt.s32.totalorder %s5755_s12, %s4211_s2 }
 0x24e   : > { %p4208_p5 = pnand %p4207_p12, %p6891_p7  ;;  %p4214_p4 = scmp.lt.s32.totalorder %s4212_s18, %s4206_s0 }
 0x250   : > { %p4209_p13 = pneg %p4208_p5  ;;  %p4215_p2 = por %p4214_p4, %p4213_p1 }
 0x252   : > { %p4216_p11 = pnand %p4215_p2, %p4209_p13 }
 0x254   : > { %4219 = shalt.err (!%p4216_p11)
}
 0x255   : > { %s6696_s17 = smov 64   ;;  %s6698_s29 = smov 4  }
 0x256   : > { %3374 = dma.hbm_to_vmem [thread:$0]  (%p6891_p7), %s5752_s24, 128, %s5755_s12, %s5806_s10, %s6696_s17, %s6696_s17, %s6698_s29  }
 0x257   : > { %s4220_s8 = scalar_lea.hbm %s5797_s22, 256  ;;  %p6901_p0 = scmp.ne.s32.totalorder %s6811_s6, 0 }
 0x258   : > { %p4221_p10 = scmp.ne.s32.totalorder %s5797_s22, %s4220_s8  ;;  %s4224_s20 = scalar_lea.hbm %s6896_s21, 512 }
 0x259   : > { %p4225_p8 = scmp.lt.u32.totalorder %s5797_s22, %s6896_s21  ;;  %p4226_p3 = scmp.lt.u32.totalorder %s4224_s20, %s4220_s8 }
 0x25a   : > { %p4222_p9 = pnand %p4221_p10, %p6901_p0  ;;  %p4228_p5 = scmp.lt.u32.totalorder %s4220_s8, %s5797_s22 }
 0x25b   : > { %p4227_p12 = por %p4226_p3, %p4225_p8 }
 0x25c   : > { %p4223_p6 = pneg %p4222_p9 }
 0x25d   : > { %p4229_p13 = por %p4228_p5, %p4227_p12 }
 0x25f   : > { %p4230_p1 = pnand %p4229_p13, %p4223_p6 }
 0x261   : > { %4233 = shalt.err (!%p4230_p1)
}
 0x262   : > { %s4234_s16 = scalar_lea.vmem %s5801_s5, 256  ;;  %s4995_s24 = smov [#allocation15]  }
 0x263   : > { %p4235_p4 = scmp.ne.s32.totalorder %s5801_s5, %s4234_s16  ;;  %s4238_s12 = sshll.u32 %s4995_s24, 4  ;;  %s4239_s12 = int_to_ptr.vmem [resolvable:$false] %s4238_s12 }
 0x264   : > { %s4240_s23 = scalar_lea.vmem %s4239_s12, 512  ;;  %p4241_p11 = scmp.lt.s32.totalorder %s5801_s5, %s4239_s12 }
 0x265   : > { %p4236_p7 = pnand %p4235_p4, %p6901_p0  ;;  %p4242_p10 = scmp.lt.s32.totalorder %s4240_s23, %s4234_s16 }
 0x267   : > { %p4237_p2 = pneg %p4236_p7  ;;  %p4243_p9 = por %p4242_p10, %p4241_p11 }
 0x269   : > { %p4244_p8 = pnand %p4243_p9, %p4237_p2 }
 0x26b   : > { %4247 = shalt.err (!%p4244_p8)
}
 0x26c   : > { %s6902_s7 = sld [smem:[#allocation80_spill]]  ;;  %s5864_s4 = sshll.u32 %s6895_s19, 4 }
 0x26d   : > { %3376 = dma.hbm_to_vmem [thread:$0]  (%p6901_p0), %s5797_s22, 256, %s5801_s5, %s5806_s10, %s6696_s17, %s6696_s17, %s6698_s29  }
 0x26e   : > { %s1106_s0 = scalar_lea.vmem [#allocation16], %s5773_s28 }
 0x26f   : > { %s1113_s13 = sshll.u32 %s1106_s0, 4  ;;  %s1114_s13 = int_to_ptr.vmem [resolvable:$true] %s1113_s13 }
 0x272   : > { %s6903_s1 = smov %s6902_s7  ;;  %s1111_s2 = scalar_lea.hbm %s6902_s7, %s5864_s4 }
 0x273   : > { %s4248_s18 = scalar_lea.hbm %s1111_s2, 16  ;;  %s4252_s8 = scalar_lea.hbm %s6903_s1, 32 }
 0x274   : > { %p4249_p6 = scmp.ne.s32.totalorder %s1111_s2, %s4248_s18  ;;  %p4253_p5 = scmp.lt.u32.totalorder %s1111_s2, %s6903_s1 }
 0x275   : > { %p4254_p13 = scmp.lt.u32.totalorder %s4252_s8, %s4248_s18  ;;  %p4256_p4 = scmp.lt.u32.totalorder %s4248_s18, %s1111_s2 }
 0x276   : > { %p4250_p3 = pnand %p4249_p6, %p6901_p0 }
 0x277   : > { %p4255_p1 = por %p4254_p13, %p4253_p5 }
 0x278   : > { %p4251_p12 = pneg %p4250_p3 }
 0x279   : > { %p4257_p7 = por %p4256_p4, %p4255_p1 }
 0x27b   : > { %p4258_p2 = pnand %p4257_p7, %p4251_p12 }
 0x27d   : > { %4261 = shalt.err (!%p4258_p2)
}
 0x27e   : > { %s4262_s22 = scalar_lea.vmem %s1114_s13, 16  ;;  %s4996_s5 = smov [#allocation16]  }
 0x27f   : > { %p4263_p11 = scmp.ne.s32.totalorder %s1114_s13, %s4262_s22  ;;  %s4266_s20 = sshll.u32 %s4996_s5, 4  ;;  %s4267_s20 = int_to_ptr.vmem [resolvable:$false] %s4266_s20 }
 0x280   : > { %s4268_s16 = scalar_lea.vmem %s4267_s20, 32  ;;  %p4269_p8 = scmp.lt.s32.totalorder %s1114_s13, %s4267_s20 }
 0x281   : > { %p4264_p10 = pnand %p4263_p11, %p6901_p0  ;;  %p4270_p6 = scmp.lt.s32.totalorder %s4268_s16, %s4262_s22 }
 0x283   : > { %p4265_p9 = pneg %p4264_p10  ;;  %p4271_p3 = por %p4270_p6, %p4269_p8 }
 0x285   : > { %p4272_p5 = pnand %p4271_p3, %p4265_p9 }
 0x287   : > { %4275 = shalt.err (!%p4272_p5)
}
 0x288   : > { %s6904_s24 = sld [smem:[#allocation81_spill]]  ;;  %s1123_s23 = scalar_lea.vmem [#allocation17], %s5773_s28 }
 0x289   : > { %3377 = dma.hbm_to_vmem [thread:$0]  (%p6901_p0), %s1111_s2, 16, %s1114_s13, %s5734_s25  }
 0x28a   : > { %s1130_s7 = sshll.u32 %s1123_s23, 4  ;;  %s1139_s0 = sand.u32 1, %s4888_s3   ;;  %s1131_s7 = int_to_ptr.vmem [resolvable:$true] %s1130_s7 }
 0x28b   : > { %s5884_s18 = sshll.u32 %s1139_s0, 4 }
 0x28e   : > { %s6905_s17 = smov %s6904_s24  ;;  %s5880_s12 = scalar_lea.hbm %s6904_s24, %s5864_s4 }
 0x28f   : > { %s4276_s8 = scalar_lea.hbm %s5880_s12, 16  ;;  %s4280_s22 = scalar_lea.hbm %s6905_s17, 32 }
 0x290   : > { %p4277_p12 = scmp.ne.s32.totalorder %s5880_s12, %s4276_s8  ;;  %p4281_p4 = scmp.lt.u32.totalorder %s5880_s12, %s6905_s17 }
 0x291   : > { %p4282_p7 = scmp.lt.u32.totalorder %s4280_s22, %s4276_s8  ;;  %p4284_p11 = scmp.lt.u32.totalorder %s4276_s8, %s5880_s12 }
 0x292   : > { %p4278_p13 = pnand %p4277_p12, %p6901_p0 }
 0x293   : > { %p4283_p2 = por %p4282_p7, %p4281_p4 }
 0x294   : > { %p4279_p1 = pneg %p4278_p13 }
 0x295   : > { %p4285_p10 = por %p4284_p11, %p4283_p2 }
 0x297   : > { %p4286_p9 = pnand %p4285_p10, %p4279_p1 }
 0x299   : > { %4289 = shalt.err (!%p4286_p9)
}
 0x29a   : > { %s4290_s13 = scalar_lea.vmem %s1131_s7, 16  ;;  %s4997_s2 = smov [#allocation17]  }
 0x29b   : > { %p4291_p8 = scmp.ne.s32.totalorder %s1131_s7, %s4290_s13  ;;  %s4294_s5 = sshll.u32 %s4997_s2, 4  ;;  %s4295_s5 = int_to_ptr.vmem [resolvable:$false] %s4294_s5 }
 0x29c   : > { %s4296_s20 = scalar_lea.vmem %s4295_s5, 32  ;;  %p4297_p5 = scmp.lt.s32.totalorder %s1131_s7, %s4295_s5 }
 0x29d   : > { %p4292_p6 = pnand %p4291_p8, %p6901_p0  ;;  %p4298_p12 = scmp.lt.s32.totalorder %s4296_s20, %s4290_s13 }
 0x29f   : > { %p4293_p3 = pneg %p4292_p6  ;;  %p4299_p13 = por %p4298_p12, %p4297_p5 }
 0x2a1   : > { %p4300_p4 = pnand %p4299_p13, %p4293_p3 }
 0x2a3   : > { %4303 = shalt.err (!%p4300_p4)
}
 0x2a4   : > { %s6906_s16 = sld [smem:[#allocation138_spill]]  ;;  %s6907_s24 = sld [smem:[#allocation139_spill]] }
 0x2a5   : > { %s6908_s23 = sld [smem:[#allocation111_spill]]  ;;  %s6909_s0 = sld [smem:[#allocation105_spill]] }
 0x2a6   : > { %3378 = dma.hbm_to_vmem [thread:$0]  (%p6901_p0), %s5880_s12, 16, %s1131_s7, %s5806_s10  }
 0x2a7   : > { %s1168_s8 = sand.u32 1, %s4876_s11   ;;  %s6911_s2 = sld [smem:[#allocation82_spill]] }
 0x2a8   : > { %s1141_s5 = scalar_lea.vmem [#allocation18], %s5884_s18  ;;  %s1169_s30 = scalar_lea.vmem [#allocation19], %s1168_s8 }
 0x2a9   : > { %s1156_s20 = sshll.u32 %s1141_s5, 4  ;;  %s1184_s12 = sshll.u32 %s1169_s30, 4  ;;  %s5907_s20 = int_to_ptr.vmem [resolvable:$true] %s1156_s20  ;;  %s5917_s12 = int_to_ptr.vmem [resolvable:$true] %s1184_s12 }
 0x2aa   : > { %p6910_p1 = scmp.ne.s32.totalorder %s6906_s16, 0  ;;  %p6913_p7 = scmp.ne.s32.totalorder %s6907_s24, 0 }
 0x2ab   : > { %s1193_s7 = sand.u32 1, %s6908_s23   ;;  %s1218_s11 = sand.u32 1, %s6909_s0  }
 0x2ac   : > { %s3379_s22 = scalar_select %p6910_p1, [#allocation5], [#allocation44] }
 0x2ad   : > { %s3380_s13 = scalar_select %p6910_p1, %s5360_s14, 0 }
 0x2ae   : > { %s6912_s29 = smov %s6911_s2  ;;  %s1194_s5 = scalar_lea.vmem [#allocation20], %s1193_s7 }
 0x2af   : > { %s1149_s1 = sld [smem:[%s3379_s22 + %s3380_s13]]  ;;  %s1209_s22 = sshll.u32 %s1194_s5, 4  ;;  %s5923_s22 = int_to_ptr.vmem [resolvable:$true] %s1209_s22 }
 0x2b0   : > { %s3382_s17 = scalar_select %p6913_p7, [#allocation5], [#allocation45] }
 0x2b1   : > { %s3383_s21 = scalar_select %p6913_p7, %s5360_s14, 0 }
 0x2b2   : > { %s4308_s30 = scalar_lea.hbm %s6912_s29, 512 }
 0x2b3   : > { %s5915_s3 = sld [smem:[%s3382_s17 + %s3383_s21]] }
 0x2b5   : > { %s3231_s18 = sshll.u32 %s1149_s1, 8 }
 0x2b6   : > { %s5921_s13 = scalar_lea.hbm %s6911_s2, %s3231_s18 }
 0x2b7   : > { %s4304_s8 = scalar_lea.hbm %s5921_s13, 256  ;;  %p4309_p9 = scmp.lt.u32.totalorder %s5921_s13, %s6912_s29 }
 0x2b8   : > { %p4305_p2 = scmp.ne.s32.totalorder %s5921_s13, %s4304_s8  ;;  %p4310_p8 = scmp.lt.u32.totalorder %s4308_s30, %s4304_s8 }
 0x2b9   : > { %p4312_p3 = scmp.lt.u32.totalorder %s4304_s8, %s5921_s13 }
 0x2ba   : > { %p4306_p11 = pnand %p4305_p2, %p6910_p1  ;;  %p4311_p6 = por %p4310_p8, %p4309_p9 }
 0x2bc   : > { %p4307_p10 = pneg %p4306_p11  ;;  %p4313_p5 = por %p4312_p3, %p4311_p6 }
 0x2be   : > { %p4314_p12 = pnand %p4313_p5, %p4307_p10 }
 0x2c0   : > { %4317 = shalt.err (!%p4314_p12)
}
 0x2c1   : > { %s4318_s1 = scalar_lea.vmem %s5907_s20, 256  ;;  %s4998_s21 = smov [#allocation18]  }
 0x2c2   : > { %p4319_p13 = scmp.ne.s32.totalorder %s5907_s20, %s4318_s1  ;;  %s4322_s17 = sshll.u32 %s4998_s21, 4  ;;  %s4323_s17 = int_to_ptr.vmem [resolvable:$false] %s4322_s17 }
 0x2c3   : > { %s4324_s23 = scalar_lea.vmem %s4323_s17, 512  ;;  %p4325_p2 = scmp.lt.s32.totalorder %s5907_s20, %s4323_s17 }
 0x2c4   : > { %p4320_p4 = pnand %p4319_p13, %p6910_p1  ;;  %p4326_p11 = scmp.lt.s32.totalorder %s4324_s23, %s4318_s1 }
 0x2c6   : > { %p4321_p0 = pneg %p4320_p4  ;;  %p4327_p9 = por %p4326_p11, %p4325_p2 }
 0x2c8   : > { %p4328_p8 = pnand %p4327_p9, %p4321_p0 }
 0x2ca   : > { %4331 = shalt.err (!%p4328_p8)
}
 0x2cb   : > { %s6914_s2 = smov 4   ;;  %s6915_s7 = smov 64  }
 0x2cc   : > { %s6916_s18 = sld [smem:[#allocation142_spill]]  ;;  %s6917_s5 = sld [smem:[#allocation83_spill]] }
 0x2cd   : > { %3381 = dma.hbm_to_vmem [thread:$0]  (%p6910_p1), %s5921_s13, 256, %s5907_s20, %s5734_s25, %s6915_s7, %s6915_s7, %s6914_s2  }
 0x2ce   : > { %s3134_s1 = sshll.u32 %s5915_s3, 4  ;;  %s5951_s21 = sshll.u32 %s1218_s11, 4 }
 0x2d2   : > { %s6918_s30 = smov %s6917_s5  ;;  %p6919_p10 = scmp.ne.s32.totalorder %s6916_s18, 0 }
 0x2d3   : > { %s1182_s16 = scalar_lea.hbm %s6917_s5, %s3134_s1  ;;  %s4336_s23 = scalar_lea.hbm %s6918_s30, 32 }
 0x2d4   : > { %s4332_s17 = scalar_lea.hbm %s1182_s16, 16  ;;  %p4337_p5 = scmp.lt.u32.totalorder %s1182_s16, %s6918_s30 }
 0x2d5   : > { %p4333_p0 = scmp.ne.s32.totalorder %s1182_s16, %s4332_s17  ;;  %p4338_p12 = scmp.lt.u32.totalorder %s4336_s23, %s4332_s17 }
 0x2d6   : > { %p4340_p4 = scmp.lt.u32.totalorder %s4332_s17, %s1182_s16 }
 0x2d7   : > { %p4334_p6 = pnand %p4333_p0, %p6913_p7  ;;  %p4339_p13 = por %p4338_p12, %p4337_p5 }
 0x2d9   : > { %p4335_p3 = pneg %p4334_p6  ;;  %p4341_p2 = por %p4340_p4, %p4339_p13 }
 0x2db   : > { %p4342_p11 = pnand %p4341_p2, %p4335_p3 }
 0x2dd   : > { %4345 = shalt.err (!%p4342_p11)
}
 0x2de   : > { %s4346_s3 = scalar_lea.vmem %s5917_s12, 16  ;;  %s4999_s11 = smov [#allocation19]  }
 0x2df   : > { %p4347_p1 = scmp.ne.s32.totalorder %s5917_s12, %s4346_s3  ;;  %s4350_s0 = sshll.u32 %s4999_s11, 4  ;;  %s4351_s0 = int_to_ptr.vmem [resolvable:$false] %s4350_s0 }
 0x2e0   : > { %s4352_s20 = scalar_lea.vmem %s4351_s0, 32  ;;  %p4353_p0 = scmp.lt.s32.totalorder %s5917_s12, %s4351_s0 }
 0x2e1   : > { %p4348_p9 = pnand %p4347_p1, %p6913_p7  ;;  %p4354_p6 = scmp.lt.s32.totalorder %s4352_s20, %s4346_s3 }
 0x2e3   : > { %p4349_p8 = pneg %p4348_p9  ;;  %p4355_p5 = por %p4354_p6, %p4353_p0 }
 0x2e5   : > { %p4356_p12 = pnand %p4355_p5, %p4349_p8 }
 0x2e7   : > { %4359 = shalt.err (!%p4356_p12)
}
 0x2e8   : > { %s6920_s13 = sld [smem:[#allocation86_spill]]  ;;  %s6922_s5 = sld [smem:[#allocation87_spill]] }
 0x2e9   : > { %3384 = dma.hbm_to_vmem [thread:$0]  (%p6913_p7), %s1182_s16, 16, %s5917_s12, %s5806_s10  }
 0x2ea   : > { %s3386_s23 = scalar_select %p6919_p10, %s5360_s14, 0 }
 0x2eb   : > { %p6923_p3 = scmp.ne.s32.totalorder %s6845_s26, 0  ;;  %s6924_s24 = sld [smem:[#allocation84_spill]] }
 0x2ec   : > { %s6926_s11 = scalar_select %p6919_p10, [#allocation5], [#allocation46] }
 0x2ed   : > { %s3388_s3 = scalar_select %p6923_p3, [#allocation5], [#allocation47] }
 0x2ee   : > { %s6921_s1 = smov %s6920_s13  ;;  %s1202_s0 = sld [smem:[%s6926_s11 + %s3386_s23]] }
 0x2ef   : > { %s1220_s20 = scalar_lea.vmem [#allocation21], %s5951_s21  ;;  %s7065_s14 = smov (!%p6923_p3, %s5360_s14), 0 }
 0x2f0   : > { %s1235_s29 = sshll.u32 %s1220_s20, 4  ;;  %s5981_s30 = sld [smem:[%s3388_s3 + %s7065_s14]]  ;;  %s5979_s29 = int_to_ptr.vmem [resolvable:$true] %s1235_s29 }
 0x2f1   : > { %s6925_s8 = smov %s6924_s24  ;;  %s5985_s12 = scalar_lea.hbm %s6920_s13, %s5793_s27 }
 0x2f2   : > { %s1249_s16 = scalar_lea.vmem [#allocation22], %s5776_s9  ;;  %s5992_s19 = scalar_lea.hbm %s6922_s5, %s5864_s4 }
 0x2f3   : > { %s1256_s15 = sshll.u32 %s1249_s16, 4  ;;  %s1269_s21 = scalar_lea.vmem [#allocation23], %s5773_s28  ;;  %s5988_s15 = int_to_ptr.vmem [resolvable:$true] %s1256_s15 }
 0x2f4   : > { %s3136_s23 = sshll.u32 %s1202_s0, 4  ;;  %s1276_s11 = sshll.u32 %s1269_s21, 4  ;;  %s5996_s11 = int_to_ptr.vmem [resolvable:$true] %s1276_s11 }
 0x2f5   : > { %s1207_s20 = scalar_lea.hbm %s6924_s24, %s3136_s23  ;;  %s4364_s14 = scalar_lea.hbm %s6925_s8, 32 }
 0x2f6   : > { %s4360_s17 = scalar_lea.hbm %s1207_s20, 16  ;;  %p4365_p2 = scmp.lt.u32.totalorder %s1207_s20, %s6925_s8 }
 0x2f7   : > { %p4361_p7 = scmp.ne.s32.totalorder %s1207_s20, %s4360_s17  ;;  %p4366_p11 = scmp.lt.u32.totalorder %s4364_s14, %s4360_s17 }
 0x2f8   : > { %p4368_p9 = scmp.lt.u32.totalorder %s4360_s17, %s1207_s20 }
 0x2f9   : > { %p4362_p13 = pnand %p4361_p7, %p6919_p10  ;;  %p4367_p1 = por %p4366_p11, %p4365_p2 }
 0x2fb   : > { %p4363_p4 = pneg %p4362_p13  ;;  %p4369_p8 = por %p4368_p9, %p4367_p1 }
 0x2fd   : > { %p4370_p0 = pnand %p4369_p8, %p4363_p4 }
 0x2ff   : > { %4373 = shalt.err (!%p4370_p0)
}
 0x300   : > { %s4374_s13 = scalar_lea.vmem %s5923_s22, 16  ;;  %s5000_s5 = smov [#allocation20]  }
 0x301   : > { %p4375_p6 = scmp.ne.s32.totalorder %s5923_s22, %s4374_s13  ;;  %s4378_s24 = sshll.u32 %s5000_s5, 4  ;;  %s4379_s24 = int_to_ptr.vmem [resolvable:$false] %s4378_s24 }
 0x302   : > { %s4380_s3 = scalar_lea.vmem %s4379_s24, 32  ;;  %p4381_p7 = scmp.lt.s32.totalorder %s5923_s22, %s4379_s24 }
 0x303   : > { %p4376_p5 = pnand %p4375_p6, %p6919_p10  ;;  %p4382_p13 = scmp.lt.s32.totalorder %s4380_s3, %s4374_s13 }
 0x305   : > { %p4377_p12 = pneg %p4376_p5  ;;  %p4383_p2 = por %p4382_p13, %p4381_p7 }
 0x307   : > { %p4384_p11 = pnand %p4383_p2, %p4377_p12 }
 0x309   : > { %4387 = shalt.err (!%p4384_p11)
}
 0x30a   : > { %s6927_s17 = sld [smem:[#allocation85_spill]]  ;;  %s6928_s0 = sld [smem:[#allocation88_spill]] }
 0x30b   : > { %3387 = dma.hbm_to_vmem [thread:$0]  (%p6919_p10), %s1207_s20, 16, %s5923_s22, %s5734_s25  }
 0x30c   : > { %s3232_s16 = sshll.u32 %s5981_s30, 8 }
 0x310   : > { %s6929_s21 = smov %s6928_s0  ;;  %s6013_s23 = scalar_lea.hbm %s6927_s17, %s3232_s16 }
 0x311   : > { %s6017_s14 = scalar_lea.hbm %s6928_s0, %s5793_s27  ;;  %s4388_s18 = scalar_lea.hbm %s6013_s23, 256 }
 0x312   : > { %p4389_p4 = scmp.ne.s32.totalorder %s6013_s23, %s4388_s18  ;;  %s4392_s13 = scalar_lea.hbm %s6927_s17, 512 }
 0x313   : > { %p4393_p8 = scmp.lt.u32.totalorder %s6013_s23, %s6927_s17  ;;  %p4394_p0 = scmp.lt.u32.totalorder %s4392_s13, %s4388_s18 }
 0x314   : > { %p4390_p1 = pnand %p4389_p4, %p6923_p3  ;;  %p4396_p5 = scmp.lt.u32.totalorder %s4388_s18, %s6013_s23 }
 0x315   : > { %p4395_p6 = por %p4394_p0, %p4393_p8 }
 0x316   : > { %p4391_p9 = pneg %p4390_p1 }
 0x317   : > { %p4397_p10 = por %p4396_p5, %p4395_p6 }
 0x319   : > { %p4398_p12 = pnand %p4397_p10, %p4391_p9 }
 0x31b   : > { %4401 = shalt.err (!%p4398_p12)
}
 0x31c   : > { %s4402_s22 = scalar_lea.vmem %s5979_s29, 256  ;;  %s5001_s27 = smov [#allocation21]  }
 0x31d   : > { %p4403_p7 = scmp.ne.s32.totalorder %s5979_s29, %s4402_s22  ;;  %s4406_s30 = sshll.u32 %s5001_s27, 4  ;;  %s4407_s30 = int_to_ptr.vmem [resolvable:$false] %s4406_s30 }
 0x31e   : > { %s4408_s20 = scalar_lea.vmem %s4407_s30, 512  ;;  %p4409_p11 = scmp.lt.s32.totalorder %s5979_s29, %s4407_s30 }
 0x31f   : > { %p4404_p13 = pnand %p4403_p7, %p6923_p3  ;;  %p4410_p4 = scmp.lt.s32.totalorder %s4408_s20, %s4402_s22 }
 0x321   : > { %p4405_p2 = pneg %p4404_p13  ;;  %p4411_p1 = por %p4410_p4, %p4409_p11 }
 0x323   : > { %p4412_p8 = pnand %p4411_p1, %p4405_p2 }
 0x325   : > { %4415 = shalt.err (!%p4412_p8)
}
 0x326   : > { %3390 = dma.hbm_to_vmem [thread:$0]  (%p6923_p3), %s6013_s23, 256, %s5979_s29, %s5806_s10, %s6915_s7, %s6915_s7, %s6914_s2  }
 0x327   : > { %s4416_s5 = scalar_lea.hbm %s5985_s12, 256  ;;  %p6930_p0 = scmp.ne.s32.totalorder %s6811_s6, 0 }
 0x328   : > { %p4417_p9 = scmp.ne.s32.totalorder %s5985_s12, %s4416_s5  ;;  %s4420_s26 = scalar_lea.hbm %s6921_s1, 512 }
 0x329   : > { %p4421_p10 = scmp.lt.u32.totalorder %s5985_s12, %s6921_s1  ;;  %p4422_p12 = scmp.lt.u32.totalorder %s4420_s26, %s4416_s5 }
 0x32a   : > { %p4418_p6 = pnand %p4417_p9, %p6930_p0  ;;  %p4424_p13 = scmp.lt.u32.totalorder %s4416_s5, %s5985_s12 }
 0x32b   : > { %p4423_p7 = por %p4422_p12, %p4421_p10 }
 0x32c   : > { %p4419_p5 = pneg %p4418_p6 }
 0x32d   : > { %p4425_p2 = por %p4424_p13, %p4423_p7 }
 0x32f   : > { %p4426_p11 = pnand %p4425_p2, %p4419_p5 }
 0x331   : > { %4429 = shalt.err (!%p4426_p11)
}
 0x332   : > { %s4430_s24 = scalar_lea.vmem %s5988_s15, 256  ;;  %s5002_s29 = smov [#allocation22]  }
 0x333   : > { %p4431_p4 = scmp.ne.s32.totalorder %s5988_s15, %s4430_s24  ;;  %s4434_s3 = sshll.u32 %s5002_s29, 4  ;;  %s4435_s3 = int_to_ptr.vmem [resolvable:$false] %s4434_s3 }
 0x334   : > { %s4436_s0 = scalar_lea.vmem %s4435_s3, 512  ;;  %p4437_p8 = scmp.lt.s32.totalorder %s5988_s15, %s4435_s3 }
 0x335   : > { %p4432_p3 = pnand %p4431_p4, %p6930_p0  ;;  %p4438_p9 = scmp.lt.s32.totalorder %s4436_s0, %s4430_s24 }
 0x337   : > { %p4433_p1 = pneg %p4432_p3  ;;  %p4439_p6 = por %p4438_p9, %p4437_p8 }
 0x339   : > { %p4440_p10 = pnand %p4439_p6, %p4433_p1 }
 0x33b   : > { %4443 = shalt.err (!%p4440_p10)
}
 0x33c   : > { %s6931_s16 = sld [smem:[#allocation87_spill]]  ;;  %s4444_s23 = scalar_lea.hbm %s5992_s19, 16 }
 0x33d   : > { %3391 = dma.hbm_to_vmem [thread:$0]  (%p6930_p0), %s5985_s12, 256, %s5988_s15, %s5734_s25, %s6915_s7, %s6915_s7, %s6914_s2  }
 0x33e   : > { %p4445_p5 = scmp.ne.s32.totalorder %s5992_s19, %s4444_s23  ;;  %p4452_p4 = scmp.lt.u32.totalorder %s4444_s23, %s5992_s19 }
 0x340   : > { %p4446_p12 = pnand %p4445_p5, %p6930_p0 }
 0x342   : > { %s6932_s27 = smov %s6931_s16  ;;  %p4447_p7 = pneg %p4446_p12 }
 0x343   : > { %s4448_s18 = scalar_lea.hbm %s6931_s16, 32  ;;  %p4449_p13 = scmp.lt.u32.totalorder %s5992_s19, %s6932_s27 }
 0x344   : > { %p4450_p2 = scmp.lt.u32.totalorder %s4448_s18, %s4444_s23 }
 0x346   : > { %p4451_p11 = por %p4450_p2, %p4449_p13 }
 0x348   : > { %p4453_p3 = por %p4452_p4, %p4451_p11 }
 0x34a   : > { %p4454_p1 = pnand %p4453_p3, %p4447_p7 }
 0x34c   : > { %4457 = shalt.err (!%p4454_p1)
}
 0x34d   : > { %s4458_s13 = scalar_lea.vmem %s5996_s11, 16  ;;  %s5003_s15 = smov [#allocation23]  }
 0x34e   : > { %p4459_p8 = scmp.ne.s32.totalorder %s5996_s11, %s4458_s13  ;;  %s4462_s12 = sshll.u32 %s5003_s15, 4  ;;  %s4463_s12 = int_to_ptr.vmem [resolvable:$false] %s4462_s12 }
 0x34f   : > { %s4464_s22 = scalar_lea.vmem %s4463_s12, 32  ;;  %p4465_p10 = scmp.lt.s32.totalorder %s5996_s11, %s4463_s12 }
 0x350   : > { %p4460_p9 = pnand %p4459_p8, %p6930_p0  ;;  %p4466_p5 = scmp.lt.s32.totalorder %s4464_s22, %s4458_s13 }
 0x352   : > { %p4461_p6 = pneg %p4460_p9  ;;  %p4467_p12 = por %p4466_p5, %p4465_p10 }
 0x354   : > { %p4468_p13 = pnand %p4467_p12, %p4461_p6 }
 0x356   : > { %4471 = shalt.err (!%p4468_p13)
}
 0x357   : > { %s6933_s30 = sld [smem:[#allocation89_spill]]  ;;  %s1287_s20 = scalar_lea.vmem [#allocation24], %s5776_s9 }
 0x358   : > { %3392 = dma.hbm_to_vmem [thread:$0]  (%p6930_p0), %s5992_s19, 16, %s5996_s11, %s5806_s10  }
 0x359   : > { %s1294_s5 = sshll.u32 %s1287_s20, 4  ;;  %s4472_s24 = scalar_lea.hbm %s6017_s14, 256  ;;  %s6080_s5 = int_to_ptr.vmem [resolvable:$true] %s1294_s5 }
 0x35a   : > { %p4473_p7 = scmp.ne.s32.totalorder %s6017_s14, %s4472_s24  ;;  %s4476_s29 = scalar_lea.hbm %s6929_s21, 512 }
 0x35b   : > { %p4477_p4 = scmp.lt.u32.totalorder %s6017_s14, %s6929_s21  ;;  %p4478_p3 = scmp.lt.u32.totalorder %s4476_s29, %s4472_s24 }
 0x35c   : > { %p4474_p2 = pnand %p4473_p7, %p6930_p0  ;;  %p4480_p8 = scmp.lt.u32.totalorder %s4472_s24, %s6017_s14 }
 0x35d   : > { %s6084_s26 = scalar_lea.hbm %s6933_s30, %s5864_s4  ;;  %p4479_p1 = por %p4478_p3, %p4477_p4 }
 0x35e   : > { %p4475_p11 = pneg %p4474_p2 }
 0x35f   : > { %p4481_p9 = por %p4480_p8, %p4479_p1 }
 0x361   : > { %p4482_p6 = pnand %p4481_p9, %p4475_p11 }
 0x363   : > { %4485 = shalt.err (!%p4482_p6)
}
 0x364   : > { %s4486_s9 = scalar_lea.vmem %s6080_s5, 256  ;;  %s5004_s19 = smov [#allocation24]  }
 0x365   : > { %p4487_p10 = scmp.ne.s32.totalorder %s6080_s5, %s4486_s9  ;;  %s4490_s4 = sshll.u32 %s5004_s19, 4  ;;  %s4491_s4 = int_to_ptr.vmem [resolvable:$false] %s4490_s4 }
 0x366   : > { %s4492_s11 = scalar_lea.vmem %s4491_s4, 512  ;;  %p4493_p13 = scmp.lt.s32.totalorder %s6080_s5, %s4491_s4 }
 0x367   : > { %p4488_p5 = pnand %p4487_p10, %p6930_p0  ;;  %p4494_p7 = scmp.lt.s32.totalorder %s4492_s11, %s4486_s9 }
 0x369   : > { %p4489_p12 = pneg %p4488_p5  ;;  %p4495_p2 = por %p4494_p7, %p4493_p13 }
 0x36b   : > { %p4496_p4 = pnand %p4495_p2, %p4489_p12 }
 0x36d   : > { %4499 = shalt.err (!%p4496_p4)
}
 0x36e   : > { %3393 = dma.hbm_to_vmem [thread:$0]  (%p6930_p0), %s6017_s14, 256, %s6080_s5, %s5734_s25, %s6915_s7, %s6915_s7, %s6914_s2  }
 0x36f   : > { %s1307_s3 = scalar_lea.vmem [#allocation25], %s5773_s28  ;;  %s3149_s16 = sshll.u32 %s5773_s28, 2 }
 0x370   : > { %s1314_s0 = sshll.u32 %s1307_s3, 4  ;;  %s4500_s23 = scalar_lea.hbm %s6084_s26, 16  ;;  %s1315_s0 = int_to_ptr.vmem [resolvable:$true] %s1314_s0 }
 0x371   : > { %p4501_p11 = scmp.ne.s32.totalorder %s6084_s26, %s4500_s23  ;;  %s4504_s18 = scalar_lea.hbm %s6933_s30, 32 }
 0x372   : > { %p4505_p8 = scmp.lt.u32.totalorder %s6084_s26, %s6933_s30  ;;  %p4506_p9 = scmp.lt.u32.totalorder %s4504_s18, %s4500_s23 }
 0x373   : > { %p4502_p3 = pnand %p4501_p11, %p6930_p0  ;;  %p4508_p10 = scmp.lt.u32.totalorder %s4500_s23, %s6084_s26 }
 0x374   : > { %p4507_p6 = por %p4506_p9, %p4505_p8 }
 0x375   : > { %p4503_p1 = pneg %p4502_p3 }
 0x376   : > { %p4509_p5 = por %p4508_p10, %p4507_p6 }
 0x378   : > { %p4510_p12 = pnand %p4509_p5, %p4503_p1 }
 0x37a   : > { %4513 = shalt.err (!%p4510_p12)
}
 0x37b   : > { %s4514_s13 = scalar_lea.vmem %s1315_s0, 16  ;;  %s5005_s2 = smov [#allocation25]  }
 0x37c   : > { %p4515_p13 = scmp.ne.s32.totalorder %s1315_s0, %s4514_s13  ;;  %s4518_s7 = sshll.u32 %s5005_s2, 4  ;;  %s4519_s7 = int_to_ptr.vmem [resolvable:$false] %s4518_s7 }
 0x37d   : > { %s4520_s14 = scalar_lea.vmem %s4519_s7, 32  ;;  %p4521_p4 = scmp.lt.s32.totalorder %s1315_s0, %s4519_s7 }
 0x37e   : > { %p4516_p7 = pnand %p4515_p13, %p6930_p0  ;;  %p4522_p11 = scmp.lt.s32.totalorder %s4520_s14, %s4514_s13 }
 0x380   : > { %p4517_p2 = pneg %p4516_p7  ;;  %p4523_p3 = por %p4522_p11, %p4521_p4 }
 0x382   : > { %p4524_p8 = pnand %p4523_p3, %p4517_p2 }
 0x384   : > { %4527 = shalt.err (!%p4524_p8)
}
 0x385   : > { %s6934_s15 = sld [smem:[#allocation124_spill]]  ;;  %s6935_s12 = sld [smem:[#allocation90_spill]] }
 0x386   : > { %3394 = dma.hbm_to_vmem [thread:$0]  (%p6930_p0), %s6084_s26, 16, %s1315_s0, %s5806_s10  }
 0x387   : > { %s1325_s20 = scalar_lea.vmem [#allocation26], %s3149_s16 }
 0x388   : > { %s1332_s5 = sshll.u32 %s1325_s20, 4  ;;  %s1333_s5 = int_to_ptr.vmem [resolvable:$true] %s1332_s5 }
 0x38b   : > { %s6936_s29 = smov %s6935_s12  ;;  %s3150_s22 = sshll.u32 %s6934_s15, 6 }
 0x38c   : > { %s1330_s24 = scalar_lea.hbm %s6935_s12, %s3150_s22  ;;  %s4532_s19 = scalar_lea.hbm %s6936_s29, 128 }
 0x38d   : > { %s4528_s9 = scalar_lea.hbm %s1330_s24, 64  ;;  %p4533_p10 = scmp.lt.u32.totalorder %s1330_s24, %s6936_s29 }
 0x38e   : > { %p4529_p1 = scmp.ne.s32.totalorder %s1330_s24, %s4528_s9  ;;  %p4534_p5 = scmp.lt.u32.totalorder %s4532_s19, %s4528_s9 }
 0x38f   : > { %p4536_p13 = scmp.lt.u32.totalorder %s4528_s9, %s1330_s24 }
 0x390   : > { %p4530_p9 = pnand %p4529_p1, %p6930_p0  ;;  %p4535_p12 = por %p4534_p5, %p4533_p10 }
 0x392   : > { %p4531_p6 = pneg %p4530_p9  ;;  %p4537_p7 = por %p4536_p13, %p4535_p12 }
 0x394   : > { %p4538_p2 = pnand %p4537_p7, %p4531_p6 }
 0x396   : > { %4541 = shalt.err (!%p4538_p2)
}
 0x397   : > { %s4542_s10 = scalar_lea.vmem %s1333_s5, 64  ;;  %s5006_s28 = smov [#allocation26]  }
 0x398   : > { %p4543_p4 = scmp.ne.s32.totalorder %s1333_s5, %s4542_s10  ;;  %s4546_s26 = sshll.u32 %s5006_s28, 4  ;;  %s4547_s26 = int_to_ptr.vmem [resolvable:$false] %s4546_s26 }
 0x399   : > { %s4548_s4 = scalar_lea.vmem %s4547_s26, 128  ;;  %p4549_p8 = scmp.lt.s32.totalorder %s1333_s5, %s4547_s26 }
 0x39a   : > { %p4544_p11 = pnand %p4543_p4, %p6930_p0  ;;  %p4550_p1 = scmp.lt.s32.totalorder %s4548_s4, %s4542_s10 }
 0x39c   : > { %p4545_p3 = pneg %p4544_p11  ;;  %p4551_p9 = por %p4550_p1, %p4549_p8 }
 0x39e   : > { %p4552_p5 = pnand %p4551_p9, %p4545_p3 }
 0x3a0   : > { %4555 = shalt.err (!%p4552_p5)
}
 0x3a1   : > { %3395 = dma.hbm_to_vmem [thread:$0]  (%p6930_p0), %s1330_s24, 64, %s1333_s5, %s5734_s25  }
 0x3a2 PF: > { %s6937_s11 = sld [smem:[#allocation151_spill]] }
 0x3a8   : > { %p6938_p6 = scmp.ne.s32.totalorder %s6937_s11, 0 }
 0x3a9   : > { %s6939_s3 = sld [smem:[#allocation127_spill]] (!%p6938_p6)  ;;  %s6940_s0 = sld [smem:[#allocation120_spill]] (!%p6938_p6) }
 0x3aa   : > { %1341 = sbr.rel (%p6938_p6) target bundleno = 3431 (0xd67), region = 124  ;;  %s6941_s16 = sld [smem:[#allocation131_spill]] (!%p6938_p6) }
 0x3af   : > { %s1343_s23 = sand.u32 (!%p6938_p6), 1, %s6939_s3   ;;  %s6712_s18 = sand.u32 (!%p6938_p6), 1, %s6940_s0  }
 0x3b0   : > { %s6142_s13 = sshll.u32 (!%p6938_p6), %s6712_s18, 3  ;;  %s6144_s2 = scalar_lea.sflag (!%p6938_p6), [#allocation7], %s1343_s23 }
 0x3b1   : > { %s1347_s6 = scalar_lea.vmem [#allocation6], %s6142_s13  ;;  %p6942_p10 = scmp.ne.s32.totalorder %s6941_s16, 0 }
 0x3b3   : > { %4731 = dma.done.wait (%p6942_p10), %s6144_s2, 128  }
 0x3b4   : > { %4733 = vsyncadd (%p6942_p10), %s6144_s2, 4294967168  ;;  %s6943_s25 = sld [smem:[#allocation117_spill]]  ;;  %s6156_s12 = scalar_lea.sflag [#allocation10], %s1343_s23 }
 0x3b5   : > { %s6944_s7 = sld [smem:[#allocation134_spill]] }
 0x3ba   : > { %s1354_s14 = sand.u32 1, %s6943_s25  }
 0x3bb   : > { %s6154_s15 = sshll.u32 %s1354_s14, 3  ;;  %p6945_p0 = scmp.ne.s32.totalorder %s6944_s7, 0 }
 0x3bc   : > { %s1356_s22 = scalar_lea.vmem [#allocation9], %s6154_s15 }
 0x3bd   : > { %4735 = dma.done.wait (%p6945_p0), %s6156_s12, 128  }
 0x3be   : > { %4737 = vsyncadd (%p6945_p0), %s6156_s12, 4294967168  ;;  %s1365_s20 = scalar_lea.vmem [#allocation11], %s6142_s13 }
 0x3bf   : > { %4739 = dma.done.wait (%p6942_p10), %s6156_s12, 128  }
 0x3c0   : > { %4741 = vsyncadd (%p6942_p10), %s6156_s12, 4294967168  ;;  %p6946_p12 = scmp.eq.s32.totalorder %s6939_s3, 0 }
 0x3c2   : > { %4743 = dma.done.wait (%p6946_p12), [#allocation13], 128   ;;  %p6947_p13 = pmov %p6946_p12 }
 0x3c4   : > { %4745 = vsyncadd (%p6947_p13), [#allocation13], 4294967168 }
 0x3c5   : > { %4747 = dma.done.wait (%p6942_p10), %s6144_s2, 128  }
 0x3c6   : > { %4749 = vsyncadd (%p6942_p10), %s6144_s2, 4294967168  ;;  %s6948_s24 = sld [smem:[#allocation115_spill]]  ;;  %s6949_s9 = sld [smem:[#allocation136_spill]] }
 0x3cc   : > { %s6184_s19 = sand.u32 1, %s6948_s24   ;;  %p6950_p7 = scmp.ne.s32.totalorder %s6949_s9, 0 }
 0x3cd   : > { %s6187_s10 = sshll.u32 %s6184_s19, 4 }
 0x3ce   : > { %s1387_s28 = scalar_lea.vmem [#allocation15], %s6187_s10 }
 0x3cf   : > { %4751 = dma.done.wait (%p6950_p7), %s6156_s12, 256  }
 0x3d0   : > { %4753 = vsyncadd (%p6950_p7), %s6156_s12, 4294967040 }
 0x3d1   : > { %4755 = dma.done.wait (%p6950_p7), %s6144_s2, 16  }
 0x3d2   : > { %4757 = vsyncadd (%p6950_p7), %s6144_s2, 4294967280 }
 0x3d3   : > { %4759 = dma.done.wait (%p6950_p7), %s6156_s12, 16  }
 0x3d4   : > { %4761 = vsyncadd (%p6950_p7), %s6156_s12, 4294967280  ;;  %s6951_s11 = sld [smem:[#allocation113_spill]]  ;;  %s6952_s0 = sld [smem:[#allocation109_spill]] }
 0x3da   : > { %s1410_s16 = sand.u32 1, %s6951_s11   ;;  %p6953_p2 = scmp.ne.s32.totalorder %s6952_s0, 0 }
 0x3db   : > { %s6211_s23 = sshll.u32 %s1410_s16, 4 }
 0x3dc   : > { %s1412_s25 = scalar_lea.vmem [#allocation18], %s6211_s23 }
 0x3dd   : > { %4763 = dma.done.wait (%p6953_p2), %s6144_s2, 256  }
 0x3de   : > { %4765 = vsyncadd (%p6953_p2), %s6144_s2, 4294967040  ;;  %s6954_s7 = sld [smem:[#allocation112_spill]]  ;;  %s6955_s14 = sld [smem:[#allocation140_spill]] }
 0x3e4   : > { %s1419_s24 = sand.u32 1, %s6954_s7   ;;  %p6956_p4 = scmp.ne.s32.totalorder %s6955_s14, 0 }
 0x3e5   : > { %s6221_s18 = scalar_lea.vmem [#allocation19], %s1419_s24 }
 0x3e6   : > { %4767 = dma.done.wait (%p6956_p4), %s6156_s12, 16  }
 0x3e7   : > { %4769 = vsyncadd (%p6956_p4), %s6156_s12, 4294967280  ;;  %s6957_s11 = sld [smem:[#allocation110_spill]]  ;;  %s6958_s16 = sld [smem:[#allocation143_spill]] }
 0x3ed   : > { %s1427_s5 = sand.u32 1, %s6957_s11   ;;  %p6959_p11 = scmp.ne.s32.totalorder %s6958_s16, 0 }
 0x3ee   : > { %s6230_s4 = scalar_lea.vmem [#allocation20], %s1427_s5 }
 0x3ef   : > { %4771 = dma.done.wait (%p6959_p11), %s6144_s2, 16  }
 0x3f0   : > { %4773 = vsyncadd (%p6959_p11), %s6144_s2, 4294967280  ;;  %s6960_s0 = sld [smem:[#allocation107_spill]] }
 0x3f1   : > { %s6961_s7 = sld [smem:[#allocation132_spill]] }
 0x3f6   : > { %s1435_s24 = sand.u32 1, %s6960_s0  }
 0x3f7   : > { %s6239_s26 = sshll.u32 %s1435_s24, 4  ;;  %p6962_p3 = scmp.ne.s32.totalorder %s6961_s7, 0 }
 0x3f8   : > { %s1437_s14 = scalar_lea.vmem [#allocation21], %s6239_s26 }
 0x3f9   : > { %4775 = dma.done.wait (%p6962_p3), %s6156_s12, 256  }
 0x3fa   : > { %4777 = vsyncadd (%p6962_p3), %s6156_s12, 4294967040  ;;  %s1446_s5 = scalar_lea.vmem [#allocation22], %s6187_s10 }
 0x3fb   : > { %4779 = dma.done.wait (%p6950_p7), %s6144_s2, 256  }
 0x3fc   : > { %4781 = vsyncadd (%p6950_p7), %s6144_s2, 4294967040 }
 0x3fd   : > { %4783 = dma.done.wait (%p6950_p7), %s6156_s12, 16  }
 0x3fe   : > { %4785 = vsyncadd (%p6950_p7), %s6156_s12, 4294967280  ;;  %s1463_s16 = scalar_lea.vmem [#allocation24], %s6187_s10 }
 0x3ff   : > { %4787 = dma.done.wait (%p6950_p7), %s6144_s2, 256  }
 0x400   : > { %4789 = vsyncadd (%p6950_p7), %s6144_s2, 4294967040 }
 0x401   : > { %4791 = dma.done.wait (%p6950_p7), %s6156_s12, 16  }
 0x402   : > { %4793 = vsyncadd (%p6950_p7), %s6156_s12, 4294967280  ;;  %s3162_s7 = sshll.u32 %s6184_s19, 2 }
 0x403   : > { %s6277_s24 = scalar_lea.vmem [#allocation26], %s3162_s7 }
 0x404   : > { %4795 = dma.done.wait (%p6950_p7), %s6144_s2, 64  }
 0x405   : > { %4797 = vsyncadd (%p6950_p7), %s6144_s2, 4294967232  ;;  %p6963_p8 = pmov %p6946_p12 }
 0x407   : > { %4799 = dma.done.wait (%p6963_p8), [#allocation10], 16   ;;  %p6964_p1 = pmov %p6963_p8 }
 0x409   : > { %4801 = vsyncadd (%p6964_p1), [#allocation10], 4294967280  ;;  %p6965_p9 = pmov %p6964_p1 }
 0x40a   : > { %p6966_p5 = pmov %p6964_p1 }
 0x40b   : > { %4803 = dma.done.wait (%p6965_p9), [#allocation13], 16  }
 0x40c   : > { %4805 = vsyncadd (%p6966_p5), [#allocation13], 4294967280  ;;  %p6967_p6 = pmov %p6964_p1 }
 0x40d   : > { %p6968_p10 = pmov %p6964_p1 }
 0x40e   : > { %4807 = dma.done.wait (%p6967_p6), [#allocation30], 272  }
 0x40f   : > { %4809 = vsyncadd (%p6968_p10), [#allocation30], 4294967024  ;;  %p6969_p0 = pmov %p6964_p1 }
 0x411   : > { %4811 = dma.done.wait (%p6969_p0), [#allocation33], 528   ;;  %p6970_p12 = pmov %p6969_p0 }
 0x412   : > { %p6971_p13 = pmov %p6969_p0 }
 0x413   : > { %4813 = vsyncadd (%p6970_p12), [#allocation33], 4294966768 }
 0x414   : > { %4815 = dma.done.wait (%p6971_p13), [#allocation36], 32   ;;  %p6972_p7 = pmov %p6969_p0 }
 0x415   : > { %p6973_p2 = pmov %p6969_p0 }
 0x416   : > { %4817 = vsyncadd (%p6972_p7), [#allocation36], 4294967264 }
 0x417   : > { %4819 = dma.done.wait (%p6973_p2), [#allocation39], 16   ;;  %p6974_p4 = pmov %p6969_p0 }
 0x418   : > { %s6975_s2 = sld [smem:[#allocation103_spill]]  ;;  %s1653_s7 = scalar_lea.vmem [#allocation40], %s6142_s13 }
 0x419   : > { %4821 = vsyncadd (%p6974_p4), [#allocation39], 4294967280  ;;  %s6976_s11 = sld [smem:[#allocation122_spill]] }
 0x41e   : > { %s6713_s12 = sand.u32 1, %s6975_s2  }
 0x41f   : > { %s6312_s9 = sshll.u32 %s6713_s12, 3  ;;  %p3174_p11 = scmp.ne.s32.totalorder %s6976_s11, 0 }
 0x420   : > { %s6714_s0 = scalar_lea.vmem [#allocation41], %s6312_s9  ;;  %vm1706_vm0 = vcmask (!%p3174_p11), 261120   ;;  %v5007_v0 = vmov (!%p3174_p11), 0.0  }
 0x421   : > { %1705 = sbr.rel (%p3174_p11) target bundleno = 1064 (0x428), region = 232  ;;  %1707 = vst.msk [vmem:[#allocation2] sm:$0xff] (!%p3174_p11), %vm1706_vm0, %v5007_v0 }
 0x428 PF: > { %v3778_v1 = vld [vmem:[%s1387_s28] sm:$0xff]   ;;  %v5008_v2 = vmov 0.0   ;;  %v3779_v3 = vld [vmem:[%s1446_s5] sm:$0xff]   ;;  %vm5009_vm1 = vmmov 0   ;;  %v3781_v5 = vld [vmem:[%s1446_s5 + $0x8] sm:$0xff]   ;;  %vm1735_vm2 = vcmask 261120  }
 0x429   : > { %3266 = vmatprep.subr.bf16.mxu0 %v5008_v2  ;;  %3274 = vmatprep.subr.bf16.mxu1 %v5008_v2  ;;  %v3780_v4 = vld [vmem:[%s1387_s28 + $0x8] sm:$0xff]   ;;  %v6335_v6 = vld [vmem:[%s1347_s6] sm:$0xff]  ;;  %s6977_s3 = scalar_lea.vmem [#allocation23], %s6184_s19  ;;  %s6978_s6 = scalar_lea.vmem [#allocation16], %s6184_s19  ;;  %vm2086_vm3 = vcmask 64512   ;;  %vm2187_vm5 = vcmask 130048  }
 0x42a   : > { %3267 = vmatpush3.bf16.msra.mxu0 %v3778_v1  ;;  %3270 = vmatprep.mubr.msk.bf16.mxu0 %vm5009_vm1, %v5008_v2  ;;  %v1709_v7 = vpack.c.bf16 %v6335_v6, %v6335_v6  ;;  %v3782_v8 = vld [vmem:[%s1365_s20] sm:$0xff]   ;;  %v3786_v10 = vld [vmem:[%s1412_s25] sm:$0xff]   ;;  %v3179_v18 = vld [vmem:[%s6977_s3] ss:$0 sm:$0xff]  ;;  %s6979_s15 = scalar_lea.vmem [#allocation17], %s6184_s19  ;;  %s6981_s20 = sld [smem:[#allocation123_spill]] }
 0x42b   : > { %3275 = vmatpush3.bf16.msra.mxu1 %v3779_v3  ;;  %3268 = vmatprep.subr.bf16.mxu0 %v5008_v2  ;;  %v3783_v9 = vld [vmem:[%s1463_s16] sm:$0xff]   ;;  %v3784_v11 = vld [vmem:[%s1463_s16 + $0x8] sm:$0xff]   ;;  %s6983_s11 = scalar_lea.vmem [#allocation14], %s6142_s13  ;;  %vm2251_vm6 = vcmask 1043456  }
 0x42c   : > { %3276 = vmatprep.subr.bf16.mxu1 %v5008_v2  ;;  %3278 = vmatprep.mubr.msk.bf16.mxu1 %vm5009_vm1, %v5008_v2  ;;  %v3789_v12 = vld [vmem:[%s1412_s25 + $0x8] sm:$0xff]  }
 0x42d   : > { %v1941_v13 = vld [vmem:[%s1356_s22] sm:$0xff]  ;;  %v3787_v16 = vld [vmem:[%s1437_s14 + $0x8] sm:$0xff]   ;;  %s6980_s22 = scalar_lea.vmem [#allocation25], %s6184_s19  ;;  %s6982_s19 = sld [smem:[#allocation122_spill]] }
 0x42e   : > { %3269 = vmatpush3.bf16.msra.mxu0 %v3780_v4  ;;  %v3785_v14 = vld [vmem:[%s1437_s14] sm:$0xff]   ;;  %v1942_v15 = vpack.c.bf16 %v1941_v13, %v1941_v13  ;;  %v3175_v25 = vld [vmem:[%s6978_s6] ss:$0 sm:$0xff] }
 0x42f   : > { %3277 = vmatpush3.bf16.msra.mxu1 %v3781_v5  ;;  %3282 = vmatprep.subr.bf16.mxu0 %v5008_v2  ;;  %v3788_v17 = vld [vmem:[#allocation12] sm:$0xff]   ;;  %v3188_v32 = vld [vmem:[%s6979_s15] ss:$0 sm:$0xff] }
 0x430   : > { %3290 = vmatprep.subr.bf16.mxu1 %v5008_v2  ;;  %v3184_v33 = vld [vmem:[%s6980_s22] ss:$0 sm:$0xff] }
 0x431   : > { %3271 = vmatmul.mubr.msk.bf16.vlgmr.msra.gmra.mrb[0].mxu0 %vm1735_vm2, %v1709_v7  ;;  %v3193_v48 = vld [vmem:[%s6221_s18] ss:$0 sm:$0xff]  ;;  %s3189_s18 = sshll.u32 %s6981_s20, 1 }
 0x432   : > { %3279 = vmatmul.mubr.msk.bf16.vlgmr.msra.gmra.mrb[0].mxu1 %vm1735_vm2, %v3782_v8  ;;  %3283 = vmatpush3.bf16.msra.mxu0 %v3783_v9  ;;  %v3197_v53 = vld [vmem:[%s6230_s4] ss:$0 sm:$0xff] }
 0x433   : > { %3284 = vmatprep.subr.bf16.mxu0 %v5008_v2  ;;  %3286 = vmatprep.mubr.msk.bf16.mxu0 %vm5009_vm1, %v5008_v2  ;;  %s6400_s10 = sadd.s32 %s6982_s19, %s3189_s18  ;;  %v2184_v3 = vld [vmem:[%s6983_s11] sm:$0xff]  ;;  %p3206_p9 = scmp.ne.s32.totalorder %s6982_s19, 1 }
 0x434   : > { %3291 = vmatpush3.bf16.msra.mxu1 %v3786_v10  ;;  %3294 = vmatprep.mubr.msk.bf16.mxu1 %vm5009_vm1, %v5008_v2  ;;  %s1927_s28 = sadd.s32 2, %s6400_s10  ;;  %vm2185_vm4 = vcmp.ne.f32.partialorder %v2184_v3, 0.0  ;;  %vm5011_vm7 = vmmov (!%p3206_p9), 0   ;;  %vm2457_vm8 = vcmask (!%p3206_p9), 523264  }
 0x435   : > { %3292 = vmatprep.subr.bf16.mxu1 %v5008_v2  ;;  %s1929_s26 = ssub.s32 0, %s1927_s28  ;;  %p1928_p3 = scmp.lt.s32.totalorder %s1927_s28, 0 }
 0x436   : > { %3285 = vmatpush3.bf16.msra.mxu0 %v3784_v11  ;;  %s3190_s4 = smin.u32 %s1929_s26, %s1927_s28 }
 0x437   : > { %3298 = vmatprep.subr.bf16.mxu0 %v5008_v2  ;;  %3790 = sdivrem.u32 %s3190_s4, 3 }
 0x438   : > { %3293 = vmatpush3.bf16.msra.mxu1 %v3789_v12 }
 0x439   : > { %3287 = vmatmul.mubr.msk.bf16.vlgmr.msra.gmra.mrb[4].mxu0 %vm1735_vm2, %v3782_v8  ;;  %3306 = vmatprep.subr.bf16.mxu1 %v5008_v2 }
 0x43a   : > { %3299 = vmatpush3.bf16.msra.mxu0 %v3785_v14  ;;  %3302 = vmatprep.mubr.msk.bf16.mxu0 %vm5009_vm1, %v5008_v2 }
 0x43b   : > { %3300 = vmatprep.subr.bf16.mxu0 %v5008_v2  ;;  %3295 = vmatmul.mubr.msk.bf16.vlgmr.msra.gmra.mrb[4].mxu1 %vm1735_vm2, %v1942_v15 }
 0x43c   : > { %3308 = vmatprep.mubr.msk.bf16.mxu1 %vm5009_vm1, %v5008_v2 }
 0x43e   : > { %3301 = vmatpush3.bf16.msra.mxu0 %v3787_v16  ;;  %v2247_v16 = vld [vmem:[%s6277_s24] sm:$0xf] }
 0x43f   : > { %3312 = vmatprep.subr.bf16.mxu0 %v5008_v2 }
 0x440   : > { %s3791_s23 = spop.drf %3790 }
 0x441   : > { %3303 = vmatmul.mubr.msk.bf16.vlgmr.msra.gmra.mrb[8].mxu0 %vm1735_vm2, %v3788_v17  ;;  %s1933_s25 = ssub.s32 0, %s3791_s23  ;;  %v2253_v17 = vsel %vm2251_vm6, %v2247_v16, 0 }
 0x442   : > { %3314 = vmatprep.mubr.msk.bf16.mxu0 %vm5009_vm1, %v5008_v2  ;;  %s7067_s25 = smov (!%p1928_p3, %s1933_s25), %s3791_s23 }
 0x443   : > { %p3192_p8 = scmp.lt.s32.totalorder %s7067_s25, 0  ;;  %s1939_s14 = sadd.s32 3, %s7067_s25 }
 0x445   : > { %s7069_s14 = smov (!%p3192_p8, %s1939_s14), %s7067_s25 }
 0x446   : > { %p2133_p1 = scmp.eq.s32.totalorder %s7069_s14, 0 }
 0x448   : > { %s2134_s5 = scalar_select %p2133_p1, 0.0, 1.0 }
 0x44a   : > { %v2135_v0 = vstv %s2134_s5 }
 0x504   : > { %v1773_v19 = vpop.f32.mrb[0].mxu0 }
 0x505   : > { %v1844_v20 = vpop.f32.mrb[0].mxu1  ;;  %v3272_v21 = vpop.f32.mrb[1].mxu0  ;;  %v1774_v30 = vadd.f32 %v3175_v25, %v1773_v19 }
 0x506   : > { %v1845_v22 = vadd.f32 %v3179_v18, %v1844_v20  ;;  %v3280_v23 = vpop.f32.mrb[1].mxu1  ;;  %v1776_v24 = vpop.f32.mrb[2].mxu0 }
 0x507   : > { %v1847_v26 = vpop.f32.mrb[2].mxu1  ;;  %v3273_v27 = vpop.f32.mrb[3].mxu0  ;;  %v1922_v37 = vadd.f32 %v3188_v32, %v1774_v30 }
 0x508   : > { %v1848_v28 = vadd.f32 %v3179_v18, %v1847_v26  ;;  %v3281_v29 = vpop.f32.mrb[3].mxu1  ;;  %v2245_v27 = vld [vmem:[#allocation2] sm:$0xff] }
 0x509   : > { %v1923_v47 = vpack.c.bf16 %v1922_v37, %v1922_v37 }
 0x50a   : > { %v1924_v31 = vpack.c.bf16 %v1848_v28, %v1845_v22 }
 0x50c   : > { %v1908_v34 = vpop.f32.mrb[4].mxu0  ;;  %v2141_v35 = vsel %vm2086_vm3, %v1924_v31, 0 }
 0x50d   : > { %3313 = vmatpush3.bf16.xpose.msra.mxu0 %v2141_v35  ;;  %v3288_v36 = vpop.f32.mrb[5].mxu0  ;;  %v1909_v40 = vadd.f32 %v3184_v33, %v1908_v34  ;;  %v3207_v34 = vld [vmem:[#allocation27] ss:$0 sm:$0xff] (!%p3206_p9) }
 0x50e   : > { %v1911_v38 = vpop.f32.mrb[6].mxu0  ;;  %v2003_v39 = vpop.f32.mrb[4].mxu1  ;;  %3324 = vmatprep.subr.bf16.mxu0 %v5008_v2 }
 0x50f   : > { %v1912_v41 = vadd.f32 %v3184_v33, %v1911_v38  ;;  %v3289_v42 = vpop.f32.mrb[7].mxu0  ;;  %v3296_v43 = vpop.f32.mrb[5].mxu1  ;;  %v2004_v51 = vadd.f32 %v3193_v48, %v2003_v39 }
 0x510   : > { %v2006_v44 = vpop.f32.mrb[6].mxu1  ;;  %v3796_v43 = vld [vmem:[#allocation31] sm:$0xff] (!%p3206_p9)  }
 0x511   : > { %v2201_v45 = vpack.c.bf16 %v1912_v41, %v1909_v40  ;;  %v3297_v46 = vpop.f32.mrb[7].mxu1  ;;  %v2016_v57 = vadd.f32 %v3197_v53, %v2004_v51  ;;  %v5010_v44 = vmov (!%p3206_p9), 0.0   ;;  %v3209_v51 = vld [vmem:[#allocation29] ss:$0 sm:$0xff] (!%p3206_p9) }
 0x513   : > { %v2084_v58 = vpack.c.bf16 %v2016_v57, %v2016_v57  ;;  %v3800_v57 = vld [vmem:[#allocation34 + $0x10] sm:$0xff] (!%p3206_p9)  }
 0x514   : > { %3315 = vmatmul.mubr.msk.bf16.vlgmr.msra.gmra.mrb[12].mxu0 %vm2086_vm3, %v1923_v47  ;;  %v2077_v49 = vpop.f32.mrb[8].mxu0 }
 0x515   : > { %v3304_v50 = vpop.f32.mrb[9].mxu0  ;;  %3326 = vmatprep.mubr.msk.bf16.mxu0 %vm5009_vm1, %v5008_v2  ;;  %3325 = vmatpush3.bf16.msra.mxu0 %v2253_v17 }
 0x516   : > { %v2080_v52 = vpop.f32.mrb[10].mxu0  ;;  %3330 = vmatprep.subr.bf16.mxu0 (!%p3206_p9), %v5010_v44 }
 0x517   : > { %v2085_v54 = vpack.c.bf16 %v2080_v52, %v2077_v49  ;;  %v3305_v55 = vpop.f32.mrb[11].mxu0  ;;  %v3208_v49 = vld [vmem:[#allocation28] ss:$0 sm:$0xff] (!%p3206_p9) }
 0x518   : > { %v3798_v55 = vld [vmem:[#allocation34] sm:$0xff] (!%p3206_p9)  }
 0x519   : > { %v2091_v56 = vsel %vm2086_vm3, %v2085_v54, 0 }
 0x51a   : > { %3307 = vmatpush3.bf16.xpose.msra.mxu1 %v2091_v56  ;;  %v3799_v56 = vld [vmem:[#allocation34 + $0x8] sm:$0xff] (!%p3206_p9)  }
 0x51b   : > { %3318 = vmatprep.subr.bf16.mxu1 %v5008_v2 }
 0x521   : > { %3309 = vmatmul.mubr.msk.bf16.vlgmr.msra.gmra.mrb[8].mxu1 %vm2086_vm3, %v2084_v58  ;;  %v3801_v58 = vld [vmem:[#allocation34 + $0x18] sm:$0xff] (!%p3206_p9)  }
 0x522   : > { %3319 = vmatpush3.bf16.msra.mxu1 %v2201_v45  ;;  %3320 = vmatprep.mubr.msk.bf16.mxu1 %vm5009_vm1, %v5008_v2  ;;  %v3797_v45 = vld [vmem:[#allocation31 + $0x8] sm:$0xff] (!%p3206_p9)  }
 0x523   : > { %3338 = vmatprep.subr.bf16.mxu1 (!%p3206_p9), %v5010_v44 }
 0x5e7   : > { %v2177_v59 = vpop.f32.mrb[12].mxu0 }
 0x5e8   : > { %v3316_v60 = vpop.f32.mrb[13].mxu0 }
 0x5e9   : > { %v2180_v61 = vpop.f32.mrb[14].mxu0 }
 0x5ea   : > { %v3317_v62 = vpop.f32.mrb[15].mxu0 }
 0x5f4   : > { %v2127_v63 = vpop.f32.mrb[8].mxu1 }
 0x5f5   : > { %v2136_v1 = vmul.f32 %v2135_v0, %v2127_v63  ;;  %v3310_v2 = vpop.f32.mrb[9].mxu1 }
 0x5f6   : > { %v2130_v4 = vpop.f32.mrb[10].mxu1 }
 0x5f7   : > { %v2178_v5 = vadd.f32 %v2177_v59, %v2136_v1  ;;  %v3311_v7 = vpop.f32.mrb[11].mxu1  ;;  %v3210_v59 = vld [vmem:[#allocation32] ss:$0 sm:$0xff] (!%p3206_p9) }
 0x5f9   : > { %v2183_v8 = vmul.f32 0.35355338, %v2178_v5 }
 0x5fb   : > { %v2186_v9 = vsel %vm2185_vm4, -1e+09, %v2183_v8 }
 0x5fc   : > { %v2188_v10 = vsel %vm2187_vm5, %v2186_v9, -inf }
 0x5fd   : > { %2189 = vmax.xlane.f32.xlu0 %v2188_v10 }
 0x68a   : > { %v2190_v11 = vpop.xlane.xlu0 %2189 }
 0x68b   : > { %v2191_v12 = vsub.f32 %v2186_v9, %v2190_v11 }
 0x68d   : > { %v2192_v13 = vmul.f32 1.442695, %v2191_v12  ;;  %v3214_v12 = vld [vmem:[#allocation35] ss:$0 sm:$0xff] (!%p3206_p9) }
 0x68f   : > { %3792 = vpow2.f32 %v2192_v13 }
 0x699   : > { %v3793_v14 = vpop.eup %3792 }
 0x69a   : > { %v2194_v15 = vsel %vm2187_vm5, %v3793_v14, 0.0 }
 0x69b   : > { %2195 = vadd.xlane.f32.xlu0 %v2194_v15 }
 0x728   : > { %v2196_v18 = vpop.xlane.xlu0 %2195 }
 0x729   : > { %3794 = vrcp.f32 %v2196_v18 }
 0x733   : > { %v3795_v19 = vpop.eup %3794 }
 0x734   : > { %v2198_v20 = vmul.f32 %v3795_v19, %v3793_v14 }
 0x736   : > { %2199 = vst.msk [vmem:[%s6714_s0] sm:$0xff] %vm2187_vm5, %v2198_v20  ;;  %v2200_v21 = vpack.c.bf16 %v2198_v20, %v2198_v20 }
 0x738   : > { %3321 = vmatmul.mubr.msk.bf16.vlgmr.msra.gmra.mrb[12].mxu1 %vm2187_vm5, %v2200_v21 }
 0x739   : > { %3346 = vmatprep.mubr.msk.bf16.mxu1 (!%p3206_p9), %vm5011_vm7, %v5010_v44  ;;  %3339 = vmatpush3.bf16.msra.mxu1 (!%p3206_p9), %v3798_v55 }
 0x73a   : > { %3340 = vmatprep.subr.bf16.mxu1 (!%p3206_p9), %v5010_v44 }
 0x73d   : > { %3341 = vmatpush3.bf16.msra.mxu1 (!%p3206_p9), %v3799_v56 }
 0x73e   : > { %3342 = vmatprep.subr.bf16.mxu1 (!%p3206_p9), %v5010_v44 }
 0x741   : > { %3343 = vmatpush3.bf16.msra.mxu1 (!%p3206_p9), %v3800_v57 }
 0x742   : > { %3344 = vmatprep.subr.bf16.mxu1 (!%p3206_p9), %v5010_v44 }
 0x745   : > { %3345 = vmatpush3.bf16.msra.mxu1 (!%p3206_p9), %v3801_v58 }
 0x80b   : > { %v2239_v22 = vpop.f32.mrb[12].mxu1 }
 0x80c   : > { %v2246_v23 = vpack.c.bf16 %v2239_v22, %v2239_v22  ;;  %v3322_v24 = vpop.f32.mrb[13].mxu1 }
 0x80d   : > { %v2242_v25 = vpop.f32.mrb[14].mxu1 }
 0x80e   : > { %v3323_v26 = vpop.f32.mrb[15].mxu1  ;;  %3327 = vmatmul.mubr.msk.bf16.vlgmr.msra.gmra.mrb[16].mxu0 %vm2086_vm3, %v2246_v23 }
 0x80f   : > { %3334 = vmatprep.mubr.msk.bf16.mxu0 (!%p3206_p9), %vm5011_vm7, %v5010_v44  ;;  %3331 = vmatpush3.bf16.msra.mxu0 (!%p3206_p9), %v3796_v43 }
 0x810   : > { %3332 = vmatprep.subr.bf16.mxu0 (!%p3206_p9), %v5010_v44 }
 0x813   : > { %3333 = vmatpush3.bf16.msra.mxu0 (!%p3206_p9), %v3797_v45 }
 0x8de   : > { %2300 = sbr.rel (%p3206_p9) target bundleno = 3374 (0xd2e), region = 236 }
 0x8e1   : > { %v2289_v28 = vpop.f32.mrb[16].mxu0 }
 0x8e2   : > { %v2295_v29 = vadd.f32 %v2289_v28, %v2245_v27  ;;  %v3328_v30 = vpop.f32.mrb[17].mxu0 }
 0x8e3   : > { %v2292_v31 = vpop.f32.mrb[18].mxu0 }
 0x8e4   : > { %2296 = vst.msk [vmem:[#allocation2] sm:$0xff] %vm1735_vm2, %v2295_v29  ;;  %v3329_v32 = vpop.f32.mrb[19].mxu0  ;;  %v3220_v29 = vld [vmem:[#allocation37] ss:$0 sm:$0xff] (!%p3206_p9)  ;;  %v3221_v31 = vld [vmem:[#allocation38] ss:$0 sm:$0xff] (!%p3206_p9) }
 0x8eb   : > { %v2301_v33 = vld [vmem:[#allocation2] sm:$0xff] }
 0x8ec   : > { %v2302_v35 = vadd.f32 %v2301_v33, %v6335_v6 }
 0x8ee   : > { %v2310_v36 = vadd.f32 %v3207_v34, %v2302_v35 }
 0x8f0   : > { %v2311_v37 = vsel %vm1735_vm2, %v2310_v36, 0.0 }
 0x8f1   : > { %2312 = vadd.xlane.f32.xlu0 %v2311_v37 }
 0x97e   : > { %v2313_v38 = vpop.xlane.xlu0 %2312 }
 0x97f   : > { %v2315_v39 = vmul.f32 0.03125, %v2313_v38 }
 0x981   : > { %v2316_v40 = vsub.f32 %v2310_v36, %v2315_v39 }
 0x983   : > { %v2317_v41 = vmul.f32 %v2316_v40, %v2316_v40 }
 0x985   : > { %v2318_v42 = vsel %vm1735_vm2, %v2317_v41, 0.0 }
 0x986   : > { %2319 = vadd.xlane.f32.xlu0 %v2318_v42 }
 0xa13   : > { %v2320_v6 = vpop.xlane.xlu0 %2319 }
 0xa14   : > { %v2321_v46 = vmul.f32 0.03125, %v2320_v6 }
 0xa16   : > { %v2322_v47 = vadd.f32 1e-12, %v2321_v46 }
 0xa18   : > { %3802 = vrsqrt.f32 %v2322_v47 }
 0xa22   : > { %v3803_v48 = vpop.eup %3802 }
 0xa23   : > { %v2324_v50 = vmul.f32 %v3803_v48, %v2316_v40 }
 0xa25   : > { %v2332_v52 = vmul.f32 %v3208_v49, %v2324_v50 }
 0xa27   : > { %v2340_v53 = vadd.f32 %v3209_v51, %v2332_v52 }
 0xa29   : > { %v2341_v54 = vpack.c.bf16 %v2340_v53, %v2340_v53 }
 0xa2b   : > { %3335 = vmatmul.mubr.msk.bf16.vlgmr.msra.gmra.mrb[0].mxu0 %vm1735_vm2, %v2341_v54 }
 0xafe   : > { %v2402_v60 = vpop.f32.mrb[0].mxu0 }
 0xaff   : > { %v2403_v61 = vadd.f32 %v3210_v59, %v2402_v60  ;;  %v3336_v62 = vpop.f32.mrb[1].mxu0 }
 0xb00   : > { %v2405_v63 = vpop.f32.mrb[2].mxu0 }
 0xb01   : > { %v2409_v0 = vmul.f32 0.044715, %v2403_v61  ;;  %v3337_v1 = vpop.f32.mrb[3].mxu0  ;;  %v2408_v8 = vmul.f32 0.5, %v2403_v61 }
 0xb03   : > { %v2410_v2 = vmul.f32 %v2409_v0, %v2403_v61 }
 0xb05   : > { %v2411_v3 = vmul.f32 %v2410_v2, %v2403_v61 }
 0xb07   : > { %v2412_v4 = vadd.f32 %v2411_v3, %v2403_v61 }
 0xb09   : > { %v2413_v5 = vmul.f32 0.7978846, %v2412_v4 }
 0xb0b   : > { %3804 = vtanh.f32 %v2413_v5 }
 0xb15   : > { %v3805_v7 = vpop.eup %3804 }
 0xb16   : > { %v2415_v9 = vadd.f32 1.0, %v3805_v7 }
 0xb18   : > { %v2416_v10 = vmul.f32 %v2415_v9, %v2408_v8 }
 0xb1a   : > { %v2417_v11 = vpack.c.bf16 %v2416_v10, %v2416_v10 }
 0xb1c   : > { %3347 = vmatmul.mubr.msk.bf16.vlgmr.msra.gmra.mrb[0].mxu1 %vm2457_vm8, %v2417_v11 }
 0xbef   : > { %v2495_v13 = vpop.f32.mrb[0].mxu1 }
 0xbf0   : > { %v2496_v14 = vadd.f32 %v3214_v12, %v2495_v13  ;;  %v3348_v15 = vpop.f32.mrb[1].mxu1 }
 0xbf1   : > { %v2498_v16 = vpop.f32.mrb[2].mxu1 }
 0xbf2   : > { %v3349_v17 = vpop.f32.mrb[3].mxu1  ;;  %v2501_v18 = vadd.f32 %v2496_v14, %v2340_v53 }
 0xbf4   : > { %v2502_v19 = vsel %vm1735_vm2, %v2501_v18, 0.0 }
 0xbf5   : > { %2503 = vadd.xlane.f32.xlu1 %v2502_v19 }
 0xc82   : > { %v2504_v20 = vpop.xlane.xlu1 %2503 }
 0xc83   : > { %v2505_v21 = vmul.f32 0.03125, %v2504_v20 }
 0xc85   : > { %v2506_v22 = vsub.f32 %v2501_v18, %v2505_v21 }
 0xc87   : > { %v2507_v23 = vmul.f32 %v2506_v22, %v2506_v22 }
 0xc89   : > { %v2508_v24 = vsel %vm1735_vm2, %v2507_v23, 0.0 }
 0xc8a   : > { %2509 = vadd.xlane.f32.xlu1 %v2508_v24 }
 0xd17   : > { %v2510_v25 = vpop.xlane.xlu1 %2509 }
 0xd18   : > { %v2511_v26 = vmul.f32 0.03125, %v2510_v25 }
 0xd1a   : > { %v2512_v27 = vadd.f32 1e-12, %v2511_v26 }
 0xd1c   : > { %3806 = vrsqrt.f32 %v2512_v27 }
 0xd26   : > { %v3807_v28 = vpop.eup %3806 }
 0xd27   : > { %v2514_v30 = vmul.f32 %v3807_v28, %v2506_v22 }
 0xd29   : > { %v2522_v32 = vmul.f32 %v3220_v29, %v2514_v30 }
 0xd2b   : > { %v2530_v33 = vadd.f32 %v3221_v31, %v2522_v32 }
 0xd2d   : > { %2531 = vst.msk [vmem:[%s1653_s7] sm:$0xff] %vm1735_vm2, %v2530_v33 }
 0xd2e PF: > { %s6984_s16 = sld [smem:[#allocation123_spill]]  ;;  %s6985_s24 = sld [smem:[#allocation100_spill]] }
 0xd2f   : > { %s6987_s2 = sld [smem:[#allocation120_spill]]  ;;  %s6988_s3 = sld [smem:[#allocation145_spill]] }
 0xd30   : > { %s2551_s22 = sshll.u32 %s1653_s7, 4  ;;  %s5012_s28 = smov [#allocation40]   ;;  %s2552_s22 = int_to_ptr.vmem [resolvable:$true] %s2551_s22 }
 0xd31   : > { %s4556_s18 = scalar_lea.vmem %s2552_s22, 128  ;;  %s4560_s26 = sshll.u32 %s5012_s28, 4  ;;  %s4561_s26 = int_to_ptr.vmem [resolvable:$false] %s4560_s26 }
 0xd32   : > { %p4557_p5 = scmp.ne.s32.totalorder %s2552_s22, %s4556_s18  ;;  %s4562_s4 = scalar_lea.vmem %s4561_s26, 256 }
 0xd33   : > { %p4563_p12 = scmp.lt.s32.totalorder %s2552_s22, %s4561_s26  ;;  %p4564_p13 = scmp.lt.s32.totalorder %s4562_s4, %s4556_s18 }
 0xd34   : > { %s6986_s12 = smov %s6985_s24  ;;  %s3224_s6 = sshll.u32 %s6984_s16, 7 }
 0xd35   : > { %s6426_s15 = scalar_lea.hbm %s6985_s24, %s3224_s6  ;;  %s6989_s20 = sand.u32 1, %s6987_s2  }
 0xd36   : > { %s2533_s19 = scalar_lea.sflag [#allocation8], %s6989_s20  ;;  %p6990_p6 = scmp.ne.s32.totalorder %s6988_s3, 0 }
 0xd37   : > { %p4565_p7 = por %p4564_p13, %p4563_p12 }
 0xd38   : > { %p4558_p10 = pnand %p4557_p5, %p6990_p6 }
 0xd3a   : > { %p4559_p0 = pneg %p4558_p10 }
 0xd3c   : > { %p4566_p2 = pnand %p4565_p7, %p4559_p0 }
 0xd3e   : > { %4569 = shalt.err (!%p4566_p2)
}
 0xd3f   : > { %s4570_s13 = scalar_lea.hbm %s6426_s15, 128  ;;  %s4574_s7 = scalar_lea.hbm %s6986_s12, 256 }
 0xd40   : > { %p4571_p4 = scmp.ne.s32.totalorder %s6426_s15, %s4570_s13  ;;  %p4575_p8 = scmp.lt.u32.totalorder %s6426_s15, %s6986_s12 }
 0xd41   : > { %p4576_p1 = scmp.lt.u32.totalorder %s4574_s7, %s4570_s13  ;;  %p4578_p5 = scmp.lt.u32.totalorder %s4570_s13, %s6426_s15 }
 0xd42   : > { %p4572_p11 = pnand %p4571_p4, %p6990_p6 }
 0xd43   : > { %p4577_p9 = por %p4576_p1, %p4575_p8 }
 0xd44   : > { %p4573_p3 = pneg %p4572_p11 }
 0xd45   : > { %p4579_p10 = por %p4578_p5, %p4577_p9 }
 0xd47   : > { %p4580_p0 = pnand %p4579_p10, %p4573_p3 }
 0xd49   : > { %4583 = shalt.err (!%p4580_p0)
}
 0xd4a   : > { %s6991_s23 = sld [smem:[#allocation101_spill]]  ;;  %s6993_s25 = sld [smem:[#allocation103_spill]] }
 0xd4b   : > { %s6994_s14 = sld [smem:[#allocation149_spill]]  ;;  %s3226_s5 = sshll.u32 %s6400_s10, 7 }
 0xd4c   : > { %3432 = dma.vmem_to_hbm [thread:$0]  (%p6990_p6), %s2552_s22, 128, %s6426_s15, %s2533_s19  }
 0xd4d   : > { %s6995_s11 = scalar_lea.vmem [#allocation41], %s6312_s9  ;;  %s5013_s3 = smov [#allocation41]  }
 0xd4e   : > { %s2566_s16 = sshll.u32 %s6995_s11, 4  ;;  %s4588_s18 = sshll.u32 %s5013_s3, 4  ;;  %s2567_s16 = int_to_ptr.vmem [resolvable:$true] %s2566_s16  ;;  %s4589_s18 = int_to_ptr.vmem [resolvable:$false] %s4588_s18 }
 0xd4f   : > { %s4584_s20 = scalar_lea.vmem %s2567_s16, 128  ;;  %s4590_s28 = scalar_lea.vmem %s4589_s18, 256 }
 0xd50   : > { %s6992_s0 = smov %s6991_s23  ;;  %s6449_s24 = scalar_lea.hbm %s6991_s23, %s3226_s5 }
 0xd51   : > { %s6996_s2 = sand.u32 1, %s6993_s25   ;;  %p4585_p12 = scmp.ne.s32.totalorder %s2567_s16, %s4584_s20 }
 0xd52   : > { %s2538_s6 = scalar_lea.sflag [#allocation42], %s6996_s2  ;;  %p6997_p13 = scmp.ne.s32.totalorder %s6994_s14, 0 }
 0xd53   : > { %p4591_p4 = scmp.lt.s32.totalorder %s2567_s16, %s4589_s18  ;;  %p4592_p11 = scmp.lt.s32.totalorder %s4590_s28, %s4584_s20 }
 0xd54   : > { %p4586_p7 = pnand %p4585_p12, %p6997_p13 }
 0xd55   : > { %p4593_p6 = por %p4592_p11, %p4591_p4 }
 0xd56   : > { %p4587_p2 = pneg %p4586_p7 }
 0xd58   : > { %p4594_p3 = pnand %p4593_p6, %p4587_p2 }
 0xd5a   : > { %4597 = shalt.err (!%p4594_p3)
}
 0xd5b   : > { %s4598_s9 = scalar_lea.hbm %s6449_s24, 128  ;;  %s4602_s10 = scalar_lea.hbm %s6992_s0, 512 }
 0xd5c   : > { %p4599_p8 = scmp.ne.s32.totalorder %s6449_s24, %s4598_s9  ;;  %p4603_p5 = scmp.lt.u32.totalorder %s6449_s24, %s6992_s0 }
 0xd5d   : > { %p4604_p10 = scmp.lt.u32.totalorder %s4602_s10, %s4598_s9  ;;  %p4606_p12 = scmp.lt.u32.totalorder %s4598_s9, %s6449_s24 }
 0xd5e   : > { %p4600_p1 = pnand %p4599_p8, %p6997_p13 }
 0xd5f   : > { %p4605_p0 = por %p4604_p10, %p4603_p5 }
 0xd60   : > { %p4601_p9 = pneg %p4600_p1 }
 0xd61   : > { %p4607_p7 = por %p4606_p12, %p4605_p0 }
 0xd63   : > { %p4608_p2 = pnand %p4607_p7, %p4601_p9 }
 0xd65   : > { %4611 = shalt.err (!%p4608_p2)
}
 0xd66   : > { %3433 = dma.vmem_to_hbm [thread:$0]  (%p6997_p13), %s2567_s16, 128, %s6449_s24, %s2538_s6  }
 0xd67 PF: > { %s6998_s15 = sld [smem:[#allocation126_spill]]  ;;  %s6999_s22 = sld [smem:[#allocation119_spill]] }
 0xd68   : > { %s7000_s19 = sld [smem:[#allocation147_spill]] }
 0xd6d   : > { %p3494_p4 = scmp.ge.s32.totalorder %s6998_s15, 2  ;;  %s2578_s26 = sand.u32 1, %s6999_s22  }
 0xd6e   : > { %p7001_p11 = scmp.ne.s32.totalorder %s7000_s19, 0  ;;  %s2579_s4 = scalar_lea.sflag [#allocation8], %s2578_s26 }
 0xd70   : > { %p3468_p6 = pnand %p3494_p4, %p7001_p11 }
 0xd72   : > { %4823 = dma.done.wait (!%p3468_p6), %s2579_s4, 128  }
 0xd73   : > { %4825 = vsyncadd (!%p3468_p6), %s2579_s4, 4294967168  ;;  %s7002_s13 = sld [smem:[#allocation102_spill]] }
 0xd74   : > { %s7003_s7 = sld [smem:[#allocation150_spill]] }
 0xd79   : > { %s2587_s23 = sand.u32 1, %s7002_s13  }
 0xd7a   : > { %p7004_p3 = scmp.ne.s32.totalorder %s7003_s7, 0  ;;  %s2588_s25 = scalar_lea.sflag [#allocation42], %s2587_s23 }
 0xd7c   : > { %p3471_p8 = pnand %p3494_p4, %p7004_p3 }
 0xd7e   : > { %4827 = dma.done.wait (!%p3471_p8), %s2588_s25, 128  }
 0xd7f   : > { %4829 = vsyncadd (!%p3471_p8), %s2588_s25, 4294967168  ;;  %s6717_s0 = sadd.s32 1, %s6998_s15   ;;  %s7005_s14 = sld [smem:[#allocation103_spill]] }
 0xd80   : > { %s7006_s5 = sld [smem:[#allocation104_spill]]  ;;  %s7007_s23 = sld [smem:[#allocation148_spill]] }
 0xd81   : > { %s7008_s24 = sld [smem:[#allocation107_spill]]  ;;  %s7009_s26 = sld [smem:[#allocation105_spill]] }
 0xd82   : > { %s7010_s11 = sld [smem:[#allocation146_spill]]  ;;  %s7011_s6 = sld [smem:[#allocation110_spill]] }
 0xd83   : > { %s7012_s19 = sld [smem:[#allocation111_spill]]  ;;  %s7013_s16 = sld [smem:[#allocation144_spill]] }
 0xd84   : > { %s7014_s2 = sld [smem:[#allocation112_spill]]  ;;  %s7015_s7 = sld [smem:[#allocation108_spill]] }
 0xd85   : > { %s7016_s20 = sld [smem:[#allocation106_spill]]  ;;  %s7017_s3 = sld [smem:[#allocation113_spill]] }
 0xd86   : > { %s7018_s18 = sld [smem:[#allocation114_spill]]  ;;  %s7019_s28 = sld [smem:[#allocation141_spill]] }
 0xd87   : > { %p6476_p13 = scmp.ge.s32.totalorder %s6717_s0, 6   ;;  %s7021_s10 = sld [smem:[#allocation115_spill]] }
 0xd88   : > { %7022 = sst [smem:[#allocation102_spill]] %s7005_s14  ;;  %s7023_s13 = sld [smem:[#allocation116_spill]] }
 0xd89   : > { %s7024_s22 = sld [smem:[#allocation135_spill]]  ;;  %s7025_s25 = sld [smem:[#allocation117_spill]] }
 0xd8a   : > { %s7026_s4 = sld [smem:[#allocation118_spill]]  ;;  %s7027_s1 = sld [smem:[#allocation137_spill]] }
 0xd8b   : > { %7028 = sst [smem:[#allocation103_spill]] %s7010_s11  ;;  %s7029_s14 = sld [smem:[#allocation120_spill]] }
 0xd8c   : > { %s7030_s0 = sld [smem:[#allocation121_spill]]  ;;  %s7031_s8 = sld [smem:[#allocation133_spill]] }
 0xd8d   : > { %7032 = sst [smem:[#allocation104_spill]] %s7013_s16  ;;  %s7034_s17 = sld [smem:[#allocation125_spill]] }
 0xd8e   : > { %s7033_s12 = sld [smem:[#allocation124_spill]]  ;;  %s7035_s21 = sld [smem:[#allocation128_spill]] }
 0xd8f   : > { %s7036_s11 = smov %s7016_s20  ;;  %s7037_s27 = sld [smem:[#allocation130_spill]] }
 0xd90   : > { %s7038_s16 = smov %s7017_s3  ;;  %s7040_s3 = smov %s7019_s28 }
 0xd91   : > { %7041 = sst [smem:[#allocation105_spill]] %s7021_s10  ;;  %s7044_s9 = smov %s7027_s1 }
 0xd92   : > { %7042 = sst [smem:[#allocation106_spill]] %s7024_s22  ;;  %s7046_s22 = smov %s7031_s8 }
 0xd93   : > { %7043 = sst [smem:[#allocation107_spill]] %s7026_s4  ;;  %s7045_s4 = smov %s7030_s0 }
 0xd94   : > { %s7047_s10 = smov %s7033_s12  ;;  %s7048_s20 = smov %s7034_s17 }
 0xd95   : > { %7049 = sst [smem:[#allocation108_spill]] %s7035_s21  ;;  %s7050_s28 = smov %s7037_s27 }
 0xd96   : > { %s7051_s15 = sadd.s32 1, %s6998_s15   ;;  %92 = sbr.rel (!%p6476_p13) target bundleno = 110 (0x6e), region = 430 }
 0xd9d   :  { %2593 = vsyncpa [#allocation7], 1 }
 0xd9e   :  { %2595 = vsyncpa [#allocation7 + $0x1], 1 }
 0xd9f   :  { %2596 = vsyncpa [#allocation10], 1 }
 0xda0   :  { %2598 = vsyncpa [#allocation10 + $0x1], 1 }
 0xda1   :  { %2599 = vsyncpa [#allocation13], 1 }
 0xda2   :  { %2600 = vsyncpa [#allocation30], 1 }
 0xda3   :  { %2601 = vsyncpa [#allocation33], 1 }
 0xda4   :  { %2602 = vsyncpa [#allocation36], 1 }
 0xda5   :  { %2603 = vsyncpa [#allocation39], 1 }
 0xda6   :  { %2604 = vsyncpa [#allocation8], 1 }
 0xda7   :  { %2606 = vsyncpa [#allocation8 + $0x1], 1 }
 0xda8   :  { %2607 = vsyncpa [#allocation42], 1 }
 0xda9   :  { %2609 = vsyncpa [#allocation42 + $0x1], 1 }

</bundles_post_ra>
